<compile_context>
chip_gen: v6e
topology: v6e:2x2x1
jax: 0.10.0
libtpu: 0.0.40
codegen_flags: <defaults>
</compile_context>

<pallas_src>
import functools

import jax
import jax.numpy as jnp
from jax.experimental import pallas as pl
from jax.experimental.pallas import tpu as pltpu

EPS = 1e-5            # InstanceNorm eps (PyTorch default, affine=False)
NEG_SLOPE = 0.2       # LeakyReLU slope
_TILE_N = 1024        # target points per tile
ACT_DT = jnp.bfloat16  # HBM storage dtype for inter-kernel activations
_VMEM_LIMIT = 48 * 1024 * 1024

_CP_RED = pltpu.CompilerParams(dimension_semantics=("parallel", "arbitrary"),
                               vmem_limit_bytes=_VMEM_LIMIT)
_CP_PAR = pltpu.CompilerParams(dimension_semantics=("parallel", "parallel"),
                               vmem_limit_bytes=_VMEM_LIMIT)


# ------------------------------------------------------------ small helpers --

def _leaky(x):
    return jnp.where(x > 0, x, NEG_SLOPE * x)


def _norm_act(y, st, count):
    """InstanceNorm (affine=False) from (sum, sumsq) over `count` + LeakyReLU."""
    mean = st[0:1, :] * (1.0 / count)
    var = st[1:2, :] * (1.0 / count) - mean * mean
    inv = jax.lax.rsqrt(jnp.maximum(var, 0.0) + EPS)
    return _leaky((y - mean) * inv)


def _grid(n, target=_TILE_N):
    """Largest multiple-of-8 tile dividing n (<= target); full-N otherwise."""
    if n <= target:
        return n, 1
    t = (target // 8) * 8
    while t >= 8:
        if n % t == 0:
            return t, n // t
        t -= 8
    return n, 1


def _tile_spec(tn, c):
    return pl.BlockSpec((1, tn, c), lambda b, n: (b, n, 0))


def _row_spec(rows, c):
    return pl.BlockSpec((1, rows, c), lambda b, n: (b, 0, 0))


def _full_src_spec(N, c):
    # full-N per-batch block, batch dim squeezed -> kernel ref is 2-D [N, c]
    return pl.BlockSpec((None, N, c), lambda b, n: (b, 0, 0))


def _w_spec(cin, cout):
    return pl.BlockSpec((cin, cout), lambda b, n: (0, 0))


def _pad_last(a, m):
    pad = (-a.shape[-1]) % m
    if pad:
        a = jnp.pad(a, [(0, 0)] * (a.ndim - 1) + [(0, pad)])
    return a


def _bias3(b, batch):
    b = jnp.asarray(b, jnp.float32)
    if b.ndim == 1:
        b = b[None, None, :]
    elif b.ndim == 2:
        b = b[:, None, :]
    return jnp.broadcast_to(b, (batch, 1, b.shape[-1]))


def _shift_stats(st, db, n):
    """Stats of (y + db) from stats of y (db constant over the N axis)."""
    s = st[:, 0, :]
    ss = st[:, 1, :]
    return jnp.stack([s + n * db, ss + 2.0 * db * s + n * (db * db)], axis=1)


# --------------------------------------------- in-kernel row gather + probe --

_GATHER_IMPL = None
_GATHER_PROBED = False


def _take_rows_impl(impl, src, col):
    if impl == 0:
        return jnp.take(src, col, axis=0)
    return jnp.take_along_axis(src, col[:, None], axis=0)


def _take_rows(src, col):
    return _take_rows_impl(_GATHER_IMPL, src, col)


def _gather_impl():
    """One-time probe: does a sublane row gather lower inside a Pallas kernel?"""
    global _GATHER_IMPL, _GATHER_PROBED
    if _GATHER_PROBED:
        return _GATHER_IMPL
    _GATHER_PROBED = True
    src = (jnp.arange(64 * 256, dtype=jnp.float32) % 251.0).reshape(64, 256)
    idx = ((jnp.arange(16, dtype=jnp.int32) * 7 + 3) % 64)
    idx2d = jnp.stack([idx] * 8, axis=1)          # mimic the real (tn, k) tile
    want = jnp.take(src, idx, axis=0)
    for impl in (0, 1):
        def kern(s_ref, i_ref, o_ref, impl=impl):
            o_ref[...] = _take_rows_impl(impl, s_ref[...], i_ref[...][:, 0])
        try:
            got = pl.pallas_call(
                kern, out_shape=jax.ShapeDtypeStruct((16, 256), jnp.float32),
            )(src, idx2d)
            got = jax.block_until_ready(got)
            if bool(jnp.allclose(got, want)):
                _GATHER_IMPL = impl
                break
        except Exception:
            continue
    return _GATHER_IMPL


# -------------------------------------------------------------------- kernels --

def _project0_kernel(x_ref, w_ref, b_ref, slab_ref):
    # Raw-input EdgeConv projection: slab = [x@W_top | x@(W_bot-W_top)+b].
    x = x_ref[0].astype(jnp.bfloat16)
    slab_ref[0] = jnp.dot(x, w_ref[...],
                          preferred_element_type=jnp.float32) + b_ref[0]


def _norm_project_h_kernel(y_ref, st_ref, w_ref, b_ref, h_ref, slab_ref, *, count):
    # Fused: previous EdgeConv's InstanceNorm+LeakyReLU, feats output (bf16),
    # and the next EdgeConv's projection as one 128-lane slab (f32).
    h = _norm_act(y_ref[0].astype(jnp.float32), st_ref[0], count)
    h_ref[0] = h.astype(h_ref.dtype)
    slab_ref[0] = jnp.dot(h.astype(jnp.bfloat16), w_ref[...],
                          preferred_element_type=jnp.float32) + b_ref[0]


def _norm_project_split_kernel(y_ref, st_ref, pb_ref, w_ref, b_ref,
                               zn_ref, zb_ref, *, count, c):
    # Semantic branch: norm(y + pre-bias) + combined projection; zn stays f32
    # (gather source), zb goes out as bf16.
    h = _norm_act(y_ref[0].astype(jnp.float32) + pb_ref[0], st_ref[0], count)
    o = jnp.dot(h.astype(jnp.bfloat16), w_ref[...],
                preferred_element_type=jnp.float32) + b_ref[0]
    zn_ref[0] = o[:, :c]
    zb_ref[0] = o[:, c:].astype(zb_ref.dtype)


def _neighbor_reduce(src, idx):
    """Running (max, sum, sumsq) of gathered neighbor rows, unrolled over k."""
    k = idx.shape[1]
    gmax = gsum = gss = None
    for j in range(k):
        g = _take_rows(src, idx[:, j])
        if j == 0:
            gmax, gsum, gss = g, g, g * g
        else:
            gmax = jnp.maximum(gmax, g)
            gsum = gsum + g
            gss = gss + g * g
    return gmax, gsum, gss


def _gc_combine(gmax, gsum, gss, zb, kf):
    # y_ij = zn[idx] + zb_i ; pre-norm max over j, plus the two moments:
    #   sum_j y = gsum + k*zb ;  sum_j y^2 = gss + 2*zb*gsum + k*zb^2
    y = gmax + zb
    psum = gsum + kf * zb
    pss = gss + 2.0 * zb * gsum + kf * (zb * zb)
    return y, psum, pss


def _gc_slab_kernel(idx_ref, src_ref, y_ref, st_ref, acc_ref, *, c, k, tn):
    # Backbone EdgeConv gather+combine; zb is the [c:2c] lane half of the
    # VMEM-resident slab at this tile's own rows.
    nt = pl.program_id(1)

    @pl.when(nt == 0)
    def _():
        acc_ref[...] = jnp.zeros_like(acc_ref)

    src = src_ref[...]                               # [N, 2c] f32 (resident)
    idx = idx_ref[0]                                 # [tn, k] int32
    gmax, gsum, gss = _neighbor_reduce(src, idx)     # [tn, 2c] each
    row0 = pl.multiple_of(nt * tn, 8)
    zb = src_ref[pl.ds(row0, tn), :][:, c:]          # own rows, zb lanes
    y, psum, pss = _gc_combine(gmax[:, :c], gsum[:, :c], gss[:, :c], zb, float(k))
    y_ref[0] = y.astype(y_ref.dtype)
    acc_ref[0:1, :] += jnp.sum(psum, axis=0, keepdims=True)
    acc_ref[1:2, :] += jnp.sum(pss, axis=0, keepdims=True)

    @pl.when(nt == pl.num_programs(1) - 1)
    def _():
        st_ref[0] = acc_ref[...]


def _gc_sep_kernel(idx_ref, src_ref, zb_ref, y_ref, st_ref, acc_ref, *, k):
    # Semantic EdgeConv gather+combine; zn resident, zb streamed as bf16 tiles.
    nt = pl.program_id(1)

    @pl.when(nt == 0)
    def _():
        acc_ref[...] = jnp.zeros_like(acc_ref)

    src = src_ref[...]                               # [N, c] f32 (resident)
    idx = idx_ref[0]
    gmax, gsum, gss = _neighbor_reduce(src, idx)
    zb = zb_ref[0].astype(jnp.float32)
    y, psum, pss = _gc_combine(gmax, gsum, gss, zb, float(k))
    y_ref[0] = y.astype(y_ref.dtype)
    acc_ref[0:1, :] += jnp.sum(psum, axis=0, keepdims=True)
    acc_ref[1:2, :] += jnp.sum(pss, axis=0, keepdims=True)

    @pl.when(nt == pl.num_programs(1) - 1)
    def _():
        st_ref[0] = acc_ref[...]


def _make_fuse_entry_kernel(n_prev, count):
    # Reads all backbone feats once (normalizing the last conv in-register) and
    # emits: embedding (sum, sumsq, colmax) for the global pool, plus the two
    # branch-entry matmuls (y1, ys1) and their stats.  hcat never exists.
    def kernel(*refs):
        fs = refs[:n_prev]
        (y2_ref, st2_ref, we_ref, wo_ref, ws_ref, be_ref, bo_ref, bs_ref,
         ste_ref, mxe_ref, y1_ref, st1_ref, ys_ref, sts_ref,
         acce_ref, mxa_ref, acco_ref, accs_ref) = refs[n_prev:]

        nt = pl.program_id(1)

        @pl.when(nt == 0)
        def _():
            acce_ref[...] = jnp.zeros_like(acce_ref)
            mxa_ref[...] = jnp.full_like(mxa_ref, -jnp.inf)
            acco_ref[...] = jnp.zeros_like(acco_ref)
            accs_ref[...] = jnp.zeros_like(accs_ref)

        cw = y2_ref.shape[-1]
        f_last = _norm_act(y2_ref[0].astype(jnp.float32), st2_ref[0], count)
        feats = [r[0] for r in fs] + [f_last.astype(jnp.bfloat16)]

        def entry(w_ref, b):
            acc = None
            for ti, f in enumerate(feats):
                d = jnp.dot(f, w_ref[ti * cw:(ti + 1) * cw, :],
                            preferred_element_type=jnp.float32)
                acc = d if acc is None else acc + d
            return acc + b

        ye = entry(we_ref, be_ref[0])
        acce_ref[0:1, :] += jnp.sum(ye, axis=0, keepdims=True)
        acce_ref[1:2, :] += jnp.sum(ye * ye, axis=0, keepdims=True)
        mxa_ref[...] = jnp.maximum(mxa_ref[...],
                                   jnp.max(ye, axis=0, keepdims=True))

        y1 = entry(wo_ref, bo_ref[0])
        y1_ref[0] = y1.astype(y1_ref.dtype)
        acco_ref[0:1, :] += jnp.sum(y1, axis=0, keepdims=True)
        acco_ref[1:2, :] += jnp.sum(y1 * y1, axis=0, keepdims=True)

        ys = entry(ws_ref, bs_ref[0])
        ys_ref[0] = ys.astype(ys_ref.dtype)
        accs_ref[0:1, :] += jnp.sum(ys, axis=0, keepdims=True)
        accs_ref[1:2, :] += jnp.sum(ys * ys, axis=0, keepdims=True)

        @pl.when(nt == pl.num_programs(1) - 1)
        def _():
            ste_ref[0] = acce_ref[...]
            mxe_ref[0] = mxa_ref[...]
            st1_ref[0] = acco_ref[...]
            sts_ref[0] = accs_ref[...]

    return kernel


def _norm_mm_stats_kernel(y_ref, st_ref, pb_ref, w_ref, b_ref,
                          y2_ref, st2_ref, acc_ref, *, count):
    # Fused middle layer: norm(prev + pre-bias) + act + matmul + next stats.
    nt = pl.program_id(1)

    @pl.when(nt == 0)
    def _():
        acc_ref[...] = jnp.zeros_like(acc_ref)

    h = _norm_act(y_ref[0].astype(jnp.float32) + pb_ref[0], st_ref[0], count)
    y2 = jnp.dot(h.astype(jnp.bfloat16), w_ref[...],
                 preferred_element_type=jnp.float32) + b_ref[0]
    y2_ref[0] = y2.astype(y2_ref.dtype)
    acc_ref[0:1, :] += jnp.sum(y2, axis=0, keepdims=True)
    acc_ref[1:2, :] += jnp.sum(y2 * y2, axis=0, keepdims=True)

    @pl.when(nt == pl.num_programs(1) - 1)
    def _():
        st2_ref[0] = acc_ref[...]


def _norm_mm_kernel(y_ref, st_ref, w_ref, b_ref, o_ref, *, count):
    # Fused head: norm + act + Conv1d(ks=1) at the head's natural width.
    h = _norm_act(y_ref[0].astype(jnp.float32), st_ref[0], count)
    o_ref[0] = jnp.dot(h.astype(jnp.bfloat16), w_ref[...],
                       preferred_element_type=jnp.float32) + b_ref[0]


# ------------------------------------------------------------------ wrappers --

def project0(x, wcomb, bcomb):
    B, N, cin = x.shape
    cout = wcomb.shape[1]
    tn, nt = _grid(N)
    return pl.pallas_call(
        _project0_kernel,
        out_shape=jax.ShapeDtypeStruct((B, N, cout), jnp.float32),
        grid=(B, nt),
        in_specs=[_tile_spec(tn, cin), _w_spec(cin, cout), _row_spec(1, cout)],
        out_specs=_tile_spec(tn, cout),
        compiler_params=_CP_PAR,
    )(x, wcomb.astype(jnp.bfloat16), bcomb)


def norm_project_h(y, st, wcomb, bcomb, *, count):
    B, N, cin = y.shape
    cout = wcomb.shape[1]
    tn, nt = _grid(N)
    return pl.pallas_call(
        functools.partial(_norm_project_h_kernel, count=float(count)),
        out_shape=(jax.ShapeDtypeStruct((B, N, cin), ACT_DT),        # feats
                   jax.ShapeDtypeStruct((B, N, cout), jnp.float32)),  # slab
        grid=(B, nt),
        in_specs=[_tile_spec(tn, cin), _row_spec(2, cin),
                  _w_spec(cin, cout), _row_spec(1, cout)],
        out_specs=(_tile_spec(tn, cin), _tile_spec(tn, cout)),
        compiler_params=_CP_PAR,
    )(y, st, wcomb.astype(jnp.bfloat16), bcomb)


def norm_project_split(y, st, pb, wcomb, bcomb, *, count):
    B, N, cin = y.shape
    cout2 = wcomb.shape[1]
    c = cout2 // 2
    tn, nt = _grid(N)
    return pl.pallas_call(
        functools.partial(_norm_project_split_kernel, count=float(count), c=c),
        out_shape=(jax.ShapeDtypeStruct((B, N, c), jnp.float32),     # zn
                   jax.ShapeDtypeStruct((B, N, c), ACT_DT)),         # zb
        grid=(B, nt),
        in_specs=[_tile_spec(tn, cin), _row_spec(2, cin), _row_spec(1, cin),
                  _w_spec(cin, cout2), _row_spec(1, cout2)],
        out_specs=(_tile_spec(tn, c), _tile_spec(tn, c)),
        compiler_params=_CP_PAR,
    )(y, st, pb, wcomb.astype(jnp.bfloat16), bcomb)


def gc_slab(idx, slab, *, c, k):
    B, N, cs = slab.shape
    tn, nt = _grid(N)
    return pl.pallas_call(
        functools.partial(_gc_slab_kernel, c=c, k=k, tn=tn),
        out_shape=(jax.ShapeDtypeStruct((B, N, c), ACT_DT),
                   jax.ShapeDtypeStruct((B, 2, c), jnp.float32)),
        grid=(B, nt),
        in_specs=[pl.BlockSpec((1, tn, idx.shape[-1]), lambda b, n: (b, n, 0)),
                  _full_src_spec(N, cs)],
        out_specs=(_tile_spec(tn, c), _row_spec(2, c)),
        scratch_shapes=[pltpu.VMEM((2, c), jnp.float32)],
        compiler_params=_CP_RED,
    )(idx, slab)


def gc_sep(idx, zn, zb, *, k):
    B, N, c = zn.shape
    tn, nt = _grid(N)
    return pl.pallas_call(
        functools.partial(_gc_sep_kernel, k=k),
        out_shape=(jax.ShapeDtypeStruct((B, N, c), ACT_DT),
                   jax.ShapeDtypeStruct((B, 2, c), jnp.float32)),
        grid=(B, nt),
        in_specs=[pl.BlockSpec((1, tn, idx.shape[-1]), lambda b, n: (b, n, 0)),
                  _full_src_spec(N, c), _tile_spec(tn, c)],
        out_specs=(_tile_spec(tn, c), _row_spec(2, c)),
        scratch_shapes=[pltpu.VMEM((2, c), jnp.float32)],
        compiler_params=_CP_RED,
    )(idx, zn, zb)


def _xla_gc(idx, zn, zb, *, k):
    # TODO(synk): fallback when the in-kernel sublane row gather does not lower
    # on this Mosaic build; the gather+reduce then runs in plain XLA.
    def one(z, i):
        g = jnp.take(z, i, axis=0)                    # [N, K, C]
        return g.max(axis=1), g.sum(axis=1), jnp.sum(g * g, axis=1)

    gmax, gsum, gss = jax.vmap(one)(zn.astype(jnp.float32), idx)
    zbf = zb.astype(jnp.float32)
    y, psum, pss = _gc_combine(gmax, gsum, gss, zbf, float(k))
    st = jnp.stack([psum.sum(axis=1), pss.sum(axis=1)], axis=1)
    return y.astype(ACT_DT), st


def edge_gc_slab(idx, slab, *, c, k):
    if _gather_impl() is not None:
        return gc_slab(idx, slab, c=c, k=k)
    return _xla_gc(idx, slab[..., :c], slab[..., c:], k=k)


def edge_gc_sep(idx, zn, zb, *, k):
    if _gather_impl() is not None:
        return gc_sep(idx, zn, zb, k=k)
    return _xla_gc(idx, zn, zb, k=k)


def fuse_entry(prev_feats, y_last, st_last, w_emb, w_off, w_sem,
               b_emb, b_off, b_sem, *, count):
    B, N, c = y_last.shape
    n_prev = len(prev_feats)
    e = w_emb.shape[1]
    co = w_off.shape[1]
    cin = w_emb.shape[0]
    tn, nt = _grid(N)
    kern = _make_fuse_entry_kernel(n_prev, float(count))
    in_specs = ([_tile_spec(tn, c)] * n_prev
                + [_tile_spec(tn, c), _row_spec(2, c),
                   _w_spec(cin, e), _w_spec(cin, co), _w_spec(cin, co),
                   _row_spec(1, e), _row_spec(1, co), _row_spec(1, co)])
    out_shape = (jax.ShapeDtypeStruct((B, 2, e), jnp.float32),
                 jax.ShapeDtypeStruct((B, 1, e), jnp.float32),
                 jax.ShapeDtypeStruct((B, N, co), ACT_DT),
                 jax.ShapeDtypeStruct((B, 2, co), jnp.float32),
                 jax.ShapeDtypeStruct((B, N, co), ACT_DT),
                 jax.ShapeDtypeStruct((B, 2, co), jnp.float32))
    out_specs = (_row_spec(2, e), _row_spec(1, e),
                 _tile_spec(tn, co), _row_spec(2, co),
                 _tile_spec(tn, co), _row_spec(2, co))
    scratch = [pltpu.VMEM((2, e), jnp.float32), pltpu.VMEM((1, e), jnp.float32),
               pltpu.VMEM((2, co), jnp.float32), pltpu.VMEM((2, co), jnp.float32)]
    return pl.pallas_call(
        kern, out_shape=out_shape, grid=(B, nt),
        in_specs=in_specs, out_specs=out_specs, scratch_shapes=scratch,
        compiler_params=_CP_RED,
    )(*prev_feats, y_last, st_last,
      w_emb.astype(jnp.bfloat16), w_off.astype(jnp.bfloat16),
      w_sem.astype(jnp.bfloat16), b_emb, b_off, b_sem)


def norm_mm_stats(y, st, pb, w, b, *, count):
    B, N, cin = y.shape
    cout = w.shape[1]
    tn, nt = _grid(N)
    return pl.pallas_call(
        functools.partial(_norm_mm_stats_kernel, count=float(count)),
        out_shape=(jax.ShapeDtypeStruct((B, N, cout), ACT_DT),
                   jax.ShapeDtypeStruct((B, 2, cout), jnp.float32)),
        grid=(B, nt),
        in_specs=[_tile_spec(tn, cin), _row_spec(2, cin), _row_spec(1, cin),
                  _w_spec(cin, cout), _row_spec(1, cout)],
        out_specs=(_tile_spec(tn, cout), _row_spec(2, cout)),
        scratch_shapes=[pltpu.VMEM((2, cout), jnp.float32)],
        compiler_params=_CP_RED,
    )(y, st, pb, w.astype(jnp.bfloat16), b)


def norm_mm(y, st, w, b, *, count):
    B, N, cin = y.shape
    cout = w.shape[1]
    tn, nt = _grid(N)
    return pl.pallas_call(
        functools.partial(_norm_mm_kernel, count=float(count)),
        out_shape=jax.ShapeDtypeStruct((B, N, cout), jnp.float32),
        grid=(B, nt),
        in_specs=[_tile_spec(tn, cin), _row_spec(2, cin),
                  _w_spec(cin, cout), _row_spec(1, cout)],
        out_specs=_tile_spec(tn, cout),
        compiler_params=_CP_PAR,
    )(y, st, w.astype(jnp.bfloat16), b)


# ----------------------------------------------------------------- JAX glue --

def knn(p, k, *, chunk=4096):
    """p: [B, N, 3] -> [B, N, k] int32 (self included), row-chunked distances."""
    # TODO(synk): top-k neighbor selection stays in XLA (no clean Pallas top-k).
    B, N, _ = p.shape
    sq = jnp.sum(p * p, axis=-1)
    c = min(chunk, N)
    while N % c:
        c -= 1
    nb = N // c
    pc = jnp.transpose(p.reshape(B, nb, c, 3), (1, 0, 2, 3))
    sc = jnp.transpose(sq.reshape(B, nb, c), (1, 0, 2))

    def one(args):
        pcb, scb = args
        d2 = (scb[:, :, None]
              - 2.0 * jnp.einsum('bic,bjc->bij', pcb, p)
              + sq[:, None, :])
        _, idx = jax.lax.top_k(-d2, k)
        return idx.astype(jnp.int32)

    idx = jax.lax.map(one, (pc, sc))
    return jnp.transpose(idx, (1, 0, 2, 3)).reshape(B, N, k)


# ---------------------------------------------------------------- parameters --

def _init_linear(key, cin, cout):
    kw, kb = jax.random.split(key)
    w = jax.random.normal(kw, (cin, cout), jnp.float32) / jnp.sqrt(float(cin))
    b = 0.01 * jax.random.normal(kb, (cout,), jnp.float32)
    return w, b


def _init_edgeconv_combined(key, cin, cout, pad_rows_to=None):
    # EdgeConv on [x_j - x_i ; x_i]: y_ij = x_j@W_top + x_i@(W_bot - W_top) + b.
    # Stored as the combined [cin, 2*cout] weight [W_top | W_bot-W_top] and the
    # combined bias [0 | b] so projection is one matmul + one lane-dense store.
    w, b = _init_linear(key, 2 * cin, cout)
    wt = w[:cin]
    wd = w[cin:] - w[:cin]
    wcomb = jnp.concatenate([wt, wd], axis=1)
    if pad_rows_to is not None and pad_rows_to > cin:
        wcomb = jnp.pad(wcomb, ((0, pad_rows_to - cin), (0, 0)))
    bcomb = jnp.concatenate([jnp.zeros((cout,), jnp.float32), b])
    return wcomb, bcomb


def init_params(key, in_ch, emb_dims, n_edgeconvs, out_ch):
    keys = iter(jax.random.split(key, 16))
    params = {}
    c = in_ch
    for i in range(n_edgeconvs):
        pad_to = ((in_ch + 7) // 8) * 8 if i == 0 else None
        params[f'ec{i}'] = _init_edgeconv_combined(next(keys), c, 64,
                                                   pad_rows_to=pad_to)
        c = 64
    params['emb'] = _init_linear(next(keys), n_edgeconvs * 64, emb_dims)
    feat_dim = emb_dims + n_edgeconvs * 64
    params['off_mlp1a'] = _init_linear(next(keys), feat_dim, 256)
    params['off_mlp1b'] = _init_linear(next(keys), 256, 128)
    params['off_head'] = _init_linear(next(keys), 128, 3)
    params['sem_mlp1'] = _init_linear(next(keys), feat_dim, 256)
    params['sem_ec'] = _init_edgeconv_combined(next(keys), 256, 256)
    params['sem_mlp2a'] = _init_linear(next(keys), 256, 256)
    params['sem_mlp2b'] = _init_linear(next(keys), 256, 128)
    params['sem_head'] = _init_linear(next(keys), 128, out_ch)
    return params


# ------------------------------------------------------------------- forward --

def teethgnn_forward(params, x_ncw, *, k, n_edgeconvs, global_pool="max"):
    """x_ncw: [B, C_in, N] (PyTorch layout).
    Returns (logits [B, out, N], t, offsets [B, 3, N])."""
    if global_pool != "max":
        # TODO(synk): "avg" global pool needs the normalized embedding
        # materialized; only the default "max" path is implemented.
        raise NotImplementedError("only global_pool='max' is implemented")

    x = jnp.transpose(x_ncw, (0, 2, 1)).astype(jnp.float32)     # [B, N, C_in]
    B, N, _ = x.shape
    p = x[:, :, :3]
    t = jnp.ones((1, 1), jnp.float32)                           # use_stn=False

    x16 = _pad_last(x, 8)          # pad only to a sublane-friendly lane count

    # ---- Backbone_Seg (static knn graph) ----
    idx = knn(p, k)
    wc0, bc0 = params['ec0']
    slab = project0(x16, wc0, _bias3(bc0, B))                    # [B,N,128] f32
    y_e, st_e = edge_gc_slab(idx, slab, c=64, k=k)

    feats = []
    for i in range(1, n_edgeconvs):
        wci, bci = params[f'ec{i}']
        h_prev, slab = norm_project_h(y_e, st_e, wci, _bias3(bci, B), count=N * k)
        feats.append(h_prev)                                     # bf16 feats
        y_e, st_e = edge_gc_slab(idx, slab, c=64, k=k)

    # ---- global max pool + both branch-entry layers (hcat never built) ----
    w_emb, b_emb = params['emb']
    w1, b1 = params['off_mlp1a']
    ws1, bs1 = params['sem_mlp1']
    e_dims = w_emb.shape[1]

    ste, mxe, y1, st1_raw, ys1, sts1_raw = fuse_entry(
        feats, y_e, st_e,
        w_emb, w1[e_dims:], ws1[e_dims:],
        _bias3(b_emb, B), _bias3(b1, B), _bias3(bs1, B),
        count=N * k)

    # g: max pool commutes with LeakyReLU∘InstanceNorm, so only (sum,sumsq,max)
    # of the raw embedding are needed.
    mean = ste[:, 0, :] / N
    var = jnp.maximum(ste[:, 1, :] / N - mean * mean, 0.0)
    g = _leaky((mxe[:, 0, :] - mean) * jax.lax.rsqrt(var + EPS))  # [B, emb]

    # g contributes a per-(batch, channel) constant to each branch entry layer:
    # applied as a pre-norm bias with analytically corrected stats.
    db_off = g @ w1[:e_dims]
    db_sem = g @ ws1[:e_dims]
    st1 = _shift_stats(st1_raw, db_off, float(N))
    sts1 = _shift_stats(sts1_raw, db_sem, float(N))

    # ---- OffsetBranch ----  (Dropout2d == identity at inference)
    w2, b2 = params['off_mlp1b']
    y2, st2 = norm_mm_stats(y1, st1, db_off[:, None, :], w2, _bias3(b2, B),
                            count=N)
    wh, bh = params['off_head']
    offsets = norm_mm(y2, st2, wh, _bias3(bh, B), count=N)        # [B, N, 3]

    # ---- SemanticBranch ----
    p2 = p + offsets                                              # detach: fwd no-op
    idx2 = knn(p2, k)
    wcs, bcs = params['sem_ec']
    zn, zb = norm_project_split(ys1, sts1, db_sem[:, None, :], wcs,
                                _bias3(bcs, B), count=N)
    ye, se = edge_gc_sep(idx2, zn, zb, k=k)
    wa, ba = params['sem_mlp2a']
    za = jnp.zeros((B, 1, wa.shape[0]), jnp.float32)
    ya, sa = norm_mm_stats(ye, se, za, wa, _bias3(ba, B), count=N * k)
    wb, bb = params['sem_mlp2b']
    zb0 = jnp.zeros((B, 1, wb.shape[0]), jnp.float32)
    yb, sb = norm_mm_stats(ya, sa, zb0, wb, _bias3(bb, B), count=N)
    whs, bhs = params['sem_head']
    logits = norm_mm(yb, sb, whs, _bias3(bhs, B), count=N)        # [B, N, out]

    return (jnp.transpose(logits, (0, 2, 1)), t,
            jnp.transpose(offsets, (0, 2, 1)))


if __name__ == "__main__":
    B, N = 2, 64
    K = 8
    IN_CH = 15        # TeethGNN per-face feature dim (first 3 channels = xyz)
    OUT_CH = 8
    EMB = 64
    N_EC = 3

    _gather_impl()    # probe the in-kernel row gather once, outside jit

    key = jax.random.PRNGKey(0)
    kx, kp = jax.random.split(key)
    params = init_params(kp, IN_CH, EMB, N_EC, OUT_CH)
    x = jax.random.normal(kx, (B, IN_CH, N), jnp.float32)

    fwd = jax.jit(functools.partial(teethgnn_forward, k=K, n_edgeconvs=N_EC))
    logits, t, offsets = fwd(params, x)
    jax.block_until_ready((logits, t, offsets))

    assert logits.shape == (B, OUT_CH, N)
    assert t.shape == (1, 1)
    assert offsets.shape == (B, 3, N)
    print("KERNEL_OK")
</pallas_src>

<mosaic_0001>
module attributes {stable_mosaic.version = 11 : i64} {
  func.func @_project0_kernel(%arg0: i32, %arg1: i32, %arg2: memref<1x64x16xf32, #tpu.memory_space<vmem>>, %arg3: memref<16x128xbf16, #tpu.memory_space<vmem>>, %arg4: memref<1x1x128xf32, #tpu.memory_space<vmem>>, %arg5: memref<1x64x128xf32, #tpu.memory_space<vmem>>) attributes {dimension_semantics = [#tpu.dimension_semantics<parallel>, #tpu.dimension_semantics<parallel>], iteration_bounds = array<i64: 2, 1>, scalar_prefetch = 0 : i64, scratch_operands = 0 : i64, tpu.core_type = #tpu.core_type<tc>, window_params = [{transform_indices = @transform_0, window_bounds = array<i64: 1, 64, 16>}, {pipeline_mode = #tpu.pipeline_mode<synchronous>, transform_indices = @transform_1, window_bounds = array<i64: 16, 128>}, {transform_indices = @transform_2, window_bounds = array<i64: 1, 1, 128>}, {transform_indices = @transform_3, window_bounds = array<i64: 1, 64, 128>}]} {
    %c0 = arith.constant 0 : index
    %c0_0 = arith.constant 0 : index
    %c0_1 = arith.constant 0 : index
    %0 = vector.load %arg2[%c0, %c0_0, %c0_1] : memref<1x64x16xf32, #tpu.memory_space<vmem>>, vector<1x64x16xf32>
    %1 = vector.shape_cast %0 : vector<1x64x16xf32> to vector<64x16xf32>
    %2 = arith.truncf %1 : vector<64x16xf32> to vector<64x16xbf16>
    %c0_2 = arith.constant 0 : index
    %c0_3 = arith.constant 0 : index
    %3 = vector.load %arg3[%c0_2, %c0_3] : memref<16x128xbf16, #tpu.memory_space<vmem>>, vector<16x128xbf16>
    %cst = arith.constant dense<0.000000e+00> : vector<64x128xf32>
    %4 = tpu.matmul %2, %3, %cst {dimension_numbers = #tpu.dot_dimension_numbers<[1], [0], [0], [1], [0, 0, 1, 1], [], []>} : vector<64x16xbf16>, vector<16x128xbf16>, vector<64x128xf32> -> vector<64x128xf32>
    %c0_4 = arith.constant 0 : index
    %c0_5 = arith.constant 0 : index
    %c0_6 = arith.constant 0 : index
    %5 = vector.load %arg4[%c0_4, %c0_5, %c0_6] : memref<1x1x128xf32, #tpu.memory_space<vmem>>, vector<1x1x128xf32>
    %6 = vector.shape_cast %5 : vector<1x1x128xf32> to vector<1x128xf32>
    %7 = vector.broadcast %6 : vector<1x128xf32> to vector<64x128xf32>
    %8 = arith.addf %4, %7 : vector<64x128xf32>
    %c0_7 = arith.constant 0 : index
    %c0_8 = arith.constant 0 : index
    %c0_9 = arith.constant 0 : index
    %9 = vector.load %arg5[%c0_7, %c0_8, %c0_9] : memref<1x64x128xf32, #tpu.memory_space<vmem>>, vector<1x64x128xf32>
    %10 = vector.shape_cast %9 : vector<1x64x128xf32> to vector<64x128xf32>
    %11 = vector.shape_cast %8 : vector<64x128xf32> to vector<1x64x128xf32>
    tpu.vector_store %arg5[%c0_7, %c0_8, %c0_9], %11 {strides = array<i32>} : memref<1x64x128xf32, #tpu.memory_space<vmem>>, vector<1x64x128xf32>,
    return
  }
  func.func @transform_0(%arg0: i32, %arg1: i32) -> (i32, i32, i32) {
    %c0_i32 = arith.constant 0 : i32
    %c0_i32_0 = arith.constant 0 : i32
    return %arg0, %arg1, %c0_i32 : i32, i32, i32
  }
  func.func @transform_1(%arg0: i32, %arg1: i32) -> (i32, i32) {
    %c0_i32 = arith.constant 0 : i32
    %c0_i32_0 = arith.constant 0 : i32
    %c0_i32_1 = arith.constant 0 : i32
    return %c0_i32, %c0_i32_0 : i32, i32
  }
  func.func @transform_2(%arg0: i32, %arg1: i32) -> (i32, i32, i32) {
    %c0_i32 = arith.constant 0 : i32
    %c0_i32_0 = arith.constant 0 : i32
    %c0_i32_1 = arith.constant 0 : i32
    return %arg0, %c0_i32, %c0_i32_0 : i32, i32, i32
  }
  func.func @transform_3(%arg0: i32, %arg1: i32) -> (i32, i32, i32) {
    %c0_i32 = arith.constant 0 : i32
    %c0_i32_0 = arith.constant 0 : i32
    return %arg0, %arg1, %c0_i32 : i32, i32, i32
  }
}

module attributes {stable_mosaic.version = 11 : i64} {
  func.func @_norm_project_h_kernel(%arg0: i32, %arg1: i32, %arg2: memref<1x64x64xbf16, #tpu.memory_space<vmem>>, %arg3: memref<1x2x64xf32, #tpu.memory_space<vmem>>, %arg4: memref<64x128xbf16, #tpu.memory_space<vmem>>, %arg5: memref<1x1x128xf32, #tpu.memory_space<vmem>>, %arg6: memref<1x64x64xbf16, #tpu.memory_space<vmem>>, %arg7: memref<1x64x128xf32, #tpu.memory_space<vmem>>) attributes {dimension_semantics = [#tpu.dimension_semantics<parallel>, #tpu.dimension_semantics<parallel>], iteration_bounds = array<i64: 2, 1>, scalar_prefetch = 0 : i64, scratch_operands = 0 : i64, tpu.core_type = #tpu.core_type<tc>, window_params = [{transform_indices = @transform_0, window_bounds = array<i64: 1, 64, 64>}, {transform_indices = @transform_1, window_bounds = array<i64: 1, 2, 64>}, {pipeline_mode = #tpu.pipeline_mode<synchronous>, transform_indices = @transform_2, window_bounds = array<i64: 64, 128>}, {transform_indices = @transform_3, window_bounds = array<i64: 1, 1, 128>}, {transform_indices = @transform_4, window_bounds = array<i64: 1, 64, 64>}, {transform_indices = @transform_5, window_bounds = array<i64: 1, 64, 128>}]} {
    %c0 = arith.constant 0 : index
    %c0_0 = arith.constant 0 : index
    %c0_1 = arith.constant 0 : index
    %0 = vector.load %arg2[%c0, %c0_0, %c0_1] : memref<1x64x64xbf16, #tpu.memory_space<vmem>>, vector<1x64x64xbf16>
    %1 = vector.shape_cast %0 : vector<1x64x64xbf16> to vector<64x64xbf16>
    %2 = arith.extf %1 : vector<64x64xbf16> to vector<64x64xf32>
    %c0_2 = arith.constant 0 : index
    %c0_3 = arith.constant 0 : index
    %c0_4 = arith.constant 0 : index
    %3 = vector.load %arg3[%c0_2, %c0_3, %c0_4] : memref<1x2x64xf32, #tpu.memory_space<vmem>>, vector<1x2x64xf32>
    %4 = vector.shape_cast %3 : vector<1x2x64xf32> to vector<2x64xf32>
    %5 = vector.extract_strided_slice %4 {offsets = [0, 0], sizes = [1, 64], strides = [1, 1]} : vector<2x64xf32> to vector<1x64xf32>
    %cst = arith.constant 0.001953125 : f32
    %6 = vector.broadcast %cst : f32 to vector<1x64xf32>
    %7 = arith.mulf %5, %6 : vector<1x64xf32>
    %8 = vector.extract_strided_slice %4 {offsets = [1, 0], sizes = [1, 64], strides = [1, 1]} : vector<2x64xf32> to vector<1x64xf32>
    %cst_5 = arith.constant 0.001953125 : f32
    %9 = vector.broadcast %cst_5 : f32 to vector<1x64xf32>
    %10 = arith.mulf %8, %9 : vector<1x64xf32>
    %11 = arith.mulf %7, %7 : vector<1x64xf32>
    %12 = arith.subf %10, %11 : vector<1x64xf32>
    %cst_6 = arith.constant 0.000000e+00 : f32
    %13 = vector.broadcast %cst_6 : f32 to vector<1x64xf32>
    %14 = arith.maximumf %12, %13 : vector<1x64xf32>
    %cst_7 = arith.constant 9.99999974E-6 : f32
    %15 = vector.broadcast %cst_7 : f32 to vector<1x64xf32>
    %16 = arith.addf %14, %15 : vector<1x64xf32>
    %17 = math.rsqrt %16 : vector<1x64xf32>
    %18 = vector.broadcast %7 : vector<1x64xf32> to vector<64x64xf32>
    %19 = arith.subf %2, %18 : vector<64x64xf32>
    %20 = vector.broadcast %17 : vector<1x64xf32> to vector<64x64xf32>
    %21 = arith.mulf %19, %20 : vector<64x64xf32>
    %cst_8 = arith.constant 0.000000e+00 : f32
    %22 = vector.broadcast %cst_8 : f32 to vector<64x64xf32>
    %23 = arith.cmpf ogt, %21, %22 : vector<64x64xf32>
    %cst_9 = arith.constant 2.000000e-01 : f32
    %24 = vector.broadcast %cst_9 : f32 to vector<64x64xf32>
    %25 = arith.mulf %24, %21 : vector<64x64xf32>
    %26 = arith.select %23, %21, %25 : vector<64x64xi1>, vector<64x64xf32>
    %27 = arith.truncf %26 : vector<64x64xf32> to vector<64x64xbf16>
    %c0_10 = arith.constant 0 : index
    %c0_11 = arith.constant 0 : index
    %c0_12 = arith.constant 0 : index
    %28 = vector.load %arg6[%c0_10, %c0_11, %c0_12] : memref<1x64x64xbf16, #tpu.memory_space<vmem>>, vector<1x64x64xbf16>
    %29 = vector.shape_cast %28 : vector<1x64x64xbf16> to vector<64x64xbf16>
    %30 = vector.shape_cast %27 : vector<64x64xbf16> to vector<1x64x64xbf16>
    tpu.vector_store %arg6[%c0_10, %c0_11, %c0_12], %30 {strides = array<i32>} : memref<1x64x64xbf16, #tpu.memory_space<vmem>>, vector<1x64x64xbf16>,
    %31 = arith.truncf %26 : vector<64x64xf32> to vector<64x64xbf16>
    %c0_13 = arith.constant 0 : index
    %c0_14 = arith.constant 0 : index
    %32 = vector.load %arg4[%c0_13, %c0_14] : memref<64x128xbf16, #tpu.memory_space<vmem>>, vector<64x128xbf16>
    %cst_15 = arith.constant dense<0.000000e+00> : vector<64x128xf32>
    %33 = tpu.matmul %31, %32, %cst_15 {dimension_numbers = #tpu.dot_dimension_numbers<[1], [0], [0], [1], [0, 0, 1, 1], [], []>} : vector<64x64xbf16>, vector<64x128xbf16>, vector<64x128xf32> -> vector<64x128xf32>
    %c0_16 = arith.constant 0 : index
    %c0_17 = arith.constant 0 : index
    %c0_18 = arith.constant 0 : index
    %34 = vector.load %arg5[%c0_16, %c0_17, %c0_18] : memref<1x1x128xf32, #tpu.memory_space<vmem>>, vector<1x1x128xf32>
    %35 = vector.shape_cast %34 : vector<1x1x128xf32> to vector<1x128xf32>
    %36 = vector.broadcast %35 : vector<1x128xf32> to vector<64x128xf32>
    %37 = arith.addf %33, %36 : vector<64x128xf32>
    %c0_19 = arith.constant 0 : index
    %c0_20 = arith.constant 0 : index
    %c0_21 = arith.constant 0 : index
    %38 = vector.load %arg7[%c0_19, %c0_20, %c0_21] : memref<1x64x128xf32, #tpu.memory_space<vmem>>, vector<1x64x128xf32>
    %39 = vector.shape_cast %38 : vector<1x64x128xf32> to vector<64x128xf32>
    %40 = vector.shape_cast %37 : vector<64x128xf32> to vector<1x64x128xf32>
    tpu.vector_store %arg7[%c0_19, %c0_20, %c0_21], %40 {strides = array<i32>} : memref<1x64x128xf32, #tpu.memory_space<vmem>>, vector<1x64x128xf32>,
    return
  }
  func.func @transform_0(%arg0: i32, %arg1: i32) -> (i32, i32, i32) {
    %c0_i32 = arith.constant 0 : i32
    %c0_i32_0 = arith.constant 0 : i32
    return %arg0, %arg1, %c0_i32 : i32, i32, i32
  }
  func.func @transform_1(%arg0: i32, %arg1: i32) -> (i32, i32, i32) {
    %c0_i32 = arith.constant 0 : i32
    %c0_i32_0 = arith.constant 0 : i32
    %c0_i32_1 = arith.constant 0 : i32
    return %arg0, %c0_i32, %c0_i32_0 : i32, i32, i32
  }
  func.func @transform_2(%arg0: i32, %arg1: i32) -> (i32, i32) {
    %c0_i32 = arith.constant 0 : i32
    %c0_i32_0 = arith.constant 0 : i32
    %c0_i32_1 = arith.constant 0 : i32
    return %c0_i32, %c0_i32_0 : i32, i32
  }
  func.func @transform_3(%arg0: i32, %arg1: i32) -> (i32, i32, i32) {
    %c0_i32 = arith.constant 0 : i32
    %c0_i32_0 = arith.constant 0 : i32
    %c0_i32_1 = arith.constant 0 : i32
    return %arg0, %c0_i32, %c0_i32_0 : i32, i32, i32
  }
  func.func @transform_4(%arg0: i32, %arg1: i32) -> (i32, i32, i32) {
    %c0_i32 = arith.constant 0 : i32
    %c0_i32_0 = arith.constant 0 : i32
    return %arg0, %arg1, %c0_i32 : i32, i32, i32
  }
  func.func @transform_5(%arg0: i32, %arg1: i32) -> (i32, i32, i32) {
    %c0_i32 = arith.constant 0 : i32
    %c0_i32_0 = arith.constant 0 : i32
    return %arg0, %arg1, %c0_i32 : i32, i32, i32
  }
}

module attributes {stable_mosaic.version = 11 : i64} {
  func.func @kernel(%arg0: i32, %arg1: i32, %arg2: memref<1x64x64xbf16, #tpu.memory_space<vmem>>, %arg3: memref<1x64x64xbf16, #tpu.memory_space<vmem>>, %arg4: memref<1x64x64xbf16, #tpu.memory_space<vmem>>, %arg5: memref<1x2x64xf32, #tpu.memory_space<vmem>>, %arg6: memref<192x64xbf16, #tpu.memory_space<vmem>>, %arg7: memref<192x256xbf16, #tpu.memory_space<vmem>>, %arg8: memref<192x256xbf16, #tpu.memory_space<vmem>>, %arg9: memref<1x1x64xf32, #tpu.memory_space<vmem>>, %arg10: memref<1x1x256xf32, #tpu.memory_space<vmem>>, %arg11: memref<1x1x256xf32, #tpu.memory_space<vmem>>, %arg12: memref<1x2x64xf32, #tpu.memory_space<vmem>>, %arg13: memref<1x1x64xf32, #tpu.memory_space<vmem>>, %arg14: memref<1x64x256xbf16, #tpu.memory_space<vmem>>, %arg15: memref<1x2x256xf32, #tpu.memory_space<vmem>>, %arg16: memref<1x64x256xbf16, #tpu.memory_space<vmem>>, %arg17: memref<1x2x256xf32, #tpu.memory_space<vmem>>, %arg18: memref<2x64xf32, #tpu.memory_space<vmem>>, %arg19: memref<1x64xf32, #tpu.memory_space<vmem>>, %arg20: memref<2x256xf32, #tpu.memory_space<vmem>>, %arg21: memref<2x256xf32, #tpu.memory_space<vmem>>) attributes {dimension_semantics = [#tpu.dimension_semantics<parallel>, #tpu.dimension_semantics<arbitrary>], iteration_bounds = array<i64: 2, 1>, scalar_prefetch = 0 : i64, scratch_operands = 4 : i64, tpu.core_type = #tpu.core_type<tc>, window_params = [{transform_indices = @transform_0, window_bounds = array<i64: 1, 64, 64>}, {transform_indices = @transform_1, window_bounds = array<i64: 1, 64, 64>}, {transform_indices = @transform_2, window_bounds = array<i64: 1, 64, 64>}, {transform_indices = @transform_3, window_bounds = array<i64: 1, 2, 64>}, {pipeline_mode = #tpu.pipeline_mode<synchronous>, transform_indices = @transform_4, window_bounds = array<i64: 192, 64>}, {pipeline_mode = #tpu.pipeline_mode<synchronous>, transform_indices = @transform_5, window_bounds = array<i64: 192, 256>}, {pipeline_mode = #tpu.pipeline_mode<synchronous>, transform_indices = @transform_6, window_bounds = array<i64: 192, 256>}, {transform_indices = @transform_7, window_bounds = array<i64: 1, 1, 64>}, {transform_indices = @transform_8, window_bounds = array<i64: 1, 1, 256>}, {transform_indices = @transform_9, window_bounds = array<i64: 1, 1, 256>}, {transform_indices = @transform_10, window_bounds = array<i64: 1, 2, 64>}, {transform_indices = @transform_11, window_bounds = array<i64: 1, 1, 64>}, {transform_indices = @transform_12, window_bounds = array<i64: 1, 64, 256>}, {transform_indices = @transform_13, window_bounds = array<i64: 1, 2, 256>}, {transform_indices = @transform_14, window_bounds = array<i64: 1, 64, 256>}, {transform_indices = @transform_15, window_bounds = array<i64: 1, 2, 256>}]} {
    %c0_i32 = arith.constant 0 : i32
    %0 = arith.cmpi eq, %arg1, %c0_i32 : i32
    %1 = arith.extui %0 : i1 to i32
    %c0_i32_0 = arith.constant 0 : i32
    %2 = arith.cmpi ne, %1, %c0_i32_0 : i32
    scf.if %2 {
      %cst_93 = arith.constant 0.000000e+00 : f32
      %120 = vector.broadcast %cst_93 : f32 to vector<2x64xf32>
      %c0_94 = arith.constant 0 : index
      %c0_95 = arith.constant 0 : index
      %121 = vector.load %arg18[%c0_94, %c0_95] : memref<2x64xf32, #tpu.memory_space<vmem>>, vector<2x64xf32>
      tpu.vector_store %arg18[%c0_94, %c0_95], %120 {strides = array<i32>} : memref<2x64xf32, #tpu.memory_space<vmem>>, vector<2x64xf32>,
      %cst_96 = arith.constant 0xFF800000 : f32
      %122 = vector.broadcast %cst_96 : f32 to vector<1x64xf32>
      %c0_97 = arith.constant 0 : index
      %c0_98 = arith.constant 0 : index
      %123 = vector.load %arg19[%c0_97, %c0_98] : memref<1x64xf32, #tpu.memory_space<vmem>>, vector<1x64xf32>
      tpu.vector_store %arg19[%c0_97, %c0_98], %122 {strides = array<i32>} : memref<1x64xf32, #tpu.memory_space<vmem>>, vector<1x64xf32>,
      %cst_99 = arith.constant 0.000000e+00 : f32
      %124 = vector.broadcast %cst_99 : f32 to vector<2x256xf32>
      %c0_100 = arith.constant 0 : index
      %c0_101 = arith.constant 0 : index
      %125 = vector.load %arg20[%c0_100, %c0_101] : memref<2x256xf32, #tpu.memory_space<vmem>>, vector<2x256xf32>
      tpu.vector_store %arg20[%c0_100, %c0_101], %124 {strides = array<i32>} : memref<2x256xf32, #tpu.memory_space<vmem>>, vector<2x256xf32>,
      %cst_102 = arith.constant 0.000000e+00 : f32
      %126 = vector.broadcast %cst_102 : f32 to vector<2x256xf32>
      %c0_103 = arith.constant 0 : index
      %c0_104 = arith.constant 0 : index
      %127 = vector.load %arg21[%c0_103, %c0_104] : memref<2x256xf32, #tpu.memory_space<vmem>>, vector<2x256xf32>
      tpu.vector_store %arg21[%c0_103, %c0_104], %126 {strides = array<i32>} : memref<2x256xf32, #tpu.memory_space<vmem>>, vector<2x256xf32>,
    } else {
    }
    %c0 = arith.constant 0 : index
    %c0_1 = arith.constant 0 : index
    %c0_2 = arith.constant 0 : index
    %3 = vector.load %arg4[%c0, %c0_1, %c0_2] : memref<1x64x64xbf16, #tpu.memory_space<vmem>>, vector<1x64x64xbf16>
    %4 = vector.shape_cast %3 : vector<1x64x64xbf16> to vector<64x64xbf16>
    %5 = arith.extf %4 : vector<64x64xbf16> to vector<64x64xf32>
    %c0_3 = arith.constant 0 : index
    %c0_4 = arith.constant 0 : index
    %c0_5 = arith.constant 0 : index
    %6 = vector.load %arg5[%c0_3, %c0_4, %c0_5] : memref<1x2x64xf32, #tpu.memory_space<vmem>>, vector<1x2x64xf32>
    %7 = vector.shape_cast %6 : vector<1x2x64xf32> to vector<2x64xf32>
    %8 = vector.extract_strided_slice %7 {offsets = [0, 0], sizes = [1, 64], strides = [1, 1]} : vector<2x64xf32> to vector<1x64xf32>
    %cst = arith.constant 0.001953125 : f32
    %9 = vector.broadcast %cst : f32 to vector<1x64xf32>
    %10 = arith.mulf %8, %9 : vector<1x64xf32>
    %11 = vector.extract_strided_slice %7 {offsets = [1, 0], sizes = [1, 64], strides = [1, 1]} : vector<2x64xf32> to vector<1x64xf32>
    %cst_6 = arith.constant 0.001953125 : f32
    %12 = vector.broadcast %cst_6 : f32 to vector<1x64xf32>
    %13 = arith.mulf %11, %12 : vector<1x64xf32>
    %14 = arith.mulf %10, %10 : vector<1x64xf32>
    %15 = arith.subf %13, %14 : vector<1x64xf32>
    %cst_7 = arith.constant 0.000000e+00 : f32
    %16 = vector.broadcast %cst_7 : f32 to vector<1x64xf32>
    %17 = arith.maximumf %15, %16 : vector<1x64xf32>
    %cst_8 = arith.constant 9.99999974E-6 : f32
    %18 = vector.broadcast %cst_8 : f32 to vector<1x64xf32>
    %19 = arith.addf %17, %18 : vector<1x64xf32>
    %20 = math.rsqrt %19 : vector<1x64xf32>
    %21 = vector.broadcast %10 : vector<1x64xf32> to vector<64x64xf32>
    %22 = arith.subf %5, %21 : vector<64x64xf32>
    %23 = vector.broadcast %20 : vector<1x64xf32> to vector<64x64xf32>
    %24 = arith.mulf %22, %23 : vector<64x64xf32>
    %cst_9 = arith.constant 0.000000e+00 : f32
    %25 = vector.broadcast %cst_9 : f32 to vector<64x64xf32>
    %26 = arith.cmpf ogt, %24, %25 : vector<64x64xf32>
    %cst_10 = arith.constant 2.000000e-01 : f32
    %27 = vector.broadcast %cst_10 : f32 to vector<64x64xf32>
    %28 = arith.mulf %27, %24 : vector<64x64xf32>
    %29 = arith.select %26, %24, %28 : vector<64x64xi1>, vector<64x64xf32>
    %c0_11 = arith.constant 0 : index
    %c0_12 = arith.constant 0 : index
    %c0_13 = arith.constant 0 : index
    %30 = vector.load %arg2[%c0_11, %c0_12, %c0_13] : memref<1x64x64xbf16, #tpu.memory_space<vmem>>, vector<1x64x64xbf16>
    %31 = vector.shape_cast %30 : vector<1x64x64xbf16> to vector<64x64xbf16>
    %c0_14 = arith.constant 0 : index
    %c0_15 = arith.constant 0 : index
    %c0_16 = arith.constant 0 : index
    %32 = vector.load %arg3[%c0_14, %c0_15, %c0_16] : memref<1x64x64xbf16, #tpu.memory_space<vmem>>, vector<1x64x64xbf16>
    %33 = vector.shape_cast %32 : vector<1x64x64xbf16> to vector<64x64xbf16>
    %34 = arith.truncf %29 : vector<64x64xf32> to vector<64x64xbf16>
    %c0_17 = arith.constant 0 : index
    %c0_18 = arith.constant 0 : index
    %c0_19 = arith.constant 0 : index
    %35 = vector.load %arg9[%c0_17, %c0_18, %c0_19] : memref<1x1x64xf32, #tpu.memory_space<vmem>>, vector<1x1x64xf32>
    %36 = vector.shape_cast %35 : vector<1x1x64xf32> to vector<1x64xf32>
    %c0_20 = arith.constant 0 : index
    %c0_21 = arith.constant 0 : index
    %37 = vector.load %arg6[%c0_20, %c0_21] : memref<192x64xbf16, #tpu.memory_space<vmem>>, vector<64x64xbf16>
    %cst_22 = arith.constant dense<0.000000e+00> : vector<64x64xf32>
    %38 = tpu.matmul %31, %37, %cst_22 {dimension_numbers = #tpu.dot_dimension_numbers<[1], [0], [0], [1], [0, 0, 1, 1], [], []>} : vector<64x64xbf16>, vector<64x64xbf16>, vector<64x64xf32> -> vector<64x64xf32>
    %c64 = arith.constant 64 : index
    %c0_23 = arith.constant 0 : index
    %39 = vector.load %arg6[%c64, %c0_23] : memref<192x64xbf16, #tpu.memory_space<vmem>>, vector<64x64xbf16>
    %cst_24 = arith.constant dense<0.000000e+00> : vector<64x64xf32>
    %40 = tpu.matmul %33, %39, %cst_24 {dimension_numbers = #tpu.dot_dimension_numbers<[1], [0], [0], [1], [0, 0, 1, 1], [], []>} : vector<64x64xbf16>, vector<64x64xbf16>, vector<64x64xf32> -> vector<64x64xf32>
    %41 = arith.addf %38, %40 : vector<64x64xf32>
    %c128 = arith.constant 128 : index
    %c0_25 = arith.constant 0 : index
    %42 = vector.load %arg6[%c128, %c0_25] : memref<192x64xbf16, #tpu.memory_space<vmem>>, vector<64x64xbf16>
    %cst_26 = arith.constant dense<0.000000e+00> : vector<64x64xf32>
    %43 = tpu.matmul %34, %42, %cst_26 {dimension_numbers = #tpu.dot_dimension_numbers<[1], [0], [0], [1], [0, 0, 1, 1], [], []>} : vector<64x64xbf16>, vector<64x64xbf16>, vector<64x64xf32> -> vector<64x64xf32>
    %44 = arith.addf %41, %43 : vector<64x64xf32>
    %45 = vector.broadcast %36 : vector<1x64xf32> to vector<64x64xf32>
    %46 = arith.addf %44, %45 : vector<64x64xf32>
    %c0_27 = arith.constant 0 : index
    %c0_28 = arith.constant 0 : index
    %47 = vector.load %arg18[%c0_27, %c0_28] : memref<2x64xf32, #tpu.memory_space<vmem>>, vector<1x64xf32>
    %cst_29 = arith.constant dense<0.000000e+00> : vector<64xf32>
    %48 = vector.multi_reduction <add>, %46, %cst_29 [0] : vector<64x64xf32> to vector<64xf32>
    %49 = vector.shape_cast %48 : vector<64xf32> to vector<1x64xf32>
    %50 = arith.addf %47, %49 : vector<1x64xf32>
    %c0_30 = arith.constant 0 : index
    %c0_31 = arith.constant 0 : index
    %51 = vector.load %arg18[%c0_30, %c0_31] : memref<2x64xf32, #tpu.memory_space<vmem>>, vector<1x64xf32>
    tpu.vector_store %arg18[%c0_30, %c0_31], %50 {strides = array<i32>} : memref<2x64xf32, #tpu.memory_space<vmem>>, vector<1x64xf32>,
    %c1 = arith.constant 1 : index
    %c0_32 = arith.constant 0 : index
    %52 = vector.load %arg18[%c1, %c0_32] : memref<2x64xf32, #tpu.memory_space<vmem>>, vector<1x64xf32>
    %53 = arith.mulf %46, %46 : vector<64x64xf32>
    %cst_33 = arith.constant dense<0.000000e+00> : vector<64xf32>
    %54 = vector.multi_reduction <add>, %53, %cst_33 [0] : vector<64x64xf32> to vector<64xf32>
    %55 = vector.shape_cast %54 : vector<64xf32> to vector<1x64xf32>
    %56 = arith.addf %52, %55 : vector<1x64xf32>
    %c1_34 = arith.constant 1 : index
    %c0_35 = arith.constant 0 : index
    %57 = vector.load %arg18[%c1_34, %c0_35] : memref<2x64xf32, #tpu.memory_space<vmem>>, vector<1x64xf32>
    tpu.vector_store %arg18[%c1_34, %c0_35], %56 {strides = array<i32>} : memref<2x64xf32, #tpu.memory_space<vmem>>, vector<1x64xf32>,
    %c0_36 = arith.constant 0 : index
    %c0_37 = arith.constant 0 : index
    %58 = vector.load %arg19[%c0_36, %c0_37] : memref<1x64xf32, #tpu.memory_space<vmem>>, vector<1x64xf32>
    %cst_38 = arith.constant dense<0xFF800000> : vector<64xf32>
    %59 = vector.multi_reduction <maximumf>, %46, %cst_38 [0] : vector<64x64xf32> to vector<64xf32>
    %60 = vector.shape_cast %59 : vector<64xf32> to vector<1x64xf32>
    %61 = arith.maximumf %58, %60 : vector<1x64xf32>
    %c0_39 = arith.constant 0 : index
    %c0_40 = arith.constant 0 : index
    %62 = vector.load %arg19[%c0_39, %c0_40] : memref<1x64xf32, #tpu.memory_space<vmem>>, vector<1x64xf32>
    tpu.vector_store %arg19[%c0_39, %c0_40], %61 {strides = array<i32>} : memref<1x64xf32, #tpu.memory_space<vmem>>, vector<1x64xf32>,
    %c0_41 = arith.constant 0 : index
    %c0_42 = arith.constant 0 : index
    %c0_43 = arith.constant 0 : index
    %63 = vector.load %arg10[%c0_41, %c0_42, %c0_43] : memref<1x1x256xf32, #tpu.memory_space<vmem>>, vector<1x1x256xf32>
    %64 = vector.shape_cast %63 : vector<1x1x256xf32> to vector<1x256xf32>
    %c0_44 = arith.constant 0 : index
    %c0_45 = arith.constant 0 : index
    %65 = vector.load %arg7[%c0_44, %c0_45] : memref<192x256xbf16, #tpu.memory_space<vmem>>, vector<64x256xbf16>
    %cst_46 = arith.constant dense<0.000000e+00> : vector<64x256xf32>
    %66 = tpu.matmul %31, %65, %cst_46 {dimension_numbers = #tpu.dot_dimension_numbers<[1], [0], [0], [1], [0, 0, 1, 1], [], []>} : vector<64x64xbf16>, vector<64x256xbf16>, vector<64x256xf32> -> vector<64x256xf32>
    %c64_47 = arith.constant 64 : index
    %c0_48 = arith.constant 0 : index
    %67 = vector.load %arg7[%c64_47, %c0_48] : memref<192x256xbf16, #tpu.memory_space<vmem>>, vector<64x256xbf16>
    %cst_49 = arith.constant dense<0.000000e+00> : vector<64x256xf32>
    %68 = tpu.matmul %33, %67, %cst_49 {dimension_numbers = #tpu.dot_dimension_numbers<[1], [0], [0], [1], [0, 0, 1, 1], [], []>} : vector<64x64xbf16>, vector<64x256xbf16>, vector<64x256xf32> -> vector<64x256xf32>
    %69 = arith.addf %66, %68 : vector<64x256xf32>
    %c128_50 = arith.constant 128 : index
    %c0_51 = arith.constant 0 : index
    %70 = vector.load %arg7[%c128_50, %c0_51] : memref<192x256xbf16, #tpu.memory_space<vmem>>, vector<64x256xbf16>
    %cst_52 = arith.constant dense<0.000000e+00> : vector<64x256xf32>
    %71 = tpu.matmul %34, %70, %cst_52 {dimension_numbers = #tpu.dot_dimension_numbers<[1], [0], [0], [1], [0, 0, 1, 1], [], []>} : vector<64x64xbf16>, vector<64x256xbf16>, vector<64x256xf32> -> vector<64x256xf32>
    %72 = arith.addf %69, %71 : vector<64x256xf32>
    %73 = vector.broadcast %64 : vector<1x256xf32> to vector<64x256xf32>
    %74 = arith.addf %72, %73 : vector<64x256xf32>
    %75 = arith.truncf %74 : vector<64x256xf32> to vector<64x256xbf16>
    %c0_53 = arith.constant 0 : index
    %c0_54 = arith.constant 0 : index
    %c0_55 = arith.constant 0 : index
    %76 = vector.load %arg14[%c0_53, %c0_54, %c0_55] : memref<1x64x256xbf16, #tpu.memory_space<vmem>>, vector<1x64x256xbf16>
    %77 = vector.shape_cast %76 : vector<1x64x256xbf16> to vector<64x256xbf16>
    %78 = vector.shape_cast %75 : vector<64x256xbf16> to vector<1x64x256xbf16>
    tpu.vector_store %arg14[%c0_53, %c0_54, %c0_55], %78 {strides = array<i32>} : memref<1x64x256xbf16, #tpu.memory_space<vmem>>, vector<1x64x256xbf16>,
    %c0_56 = arith.constant 0 : index
    %c0_57 = arith.constant 0 : index
    %79 = vector.load %arg20[%c0_56, %c0_57] : memref<2x256xf32, #tpu.memory_space<vmem>>, vector<1x256xf32>
    %cst_58 = arith.constant dense<0.000000e+00> : vector<256xf32>
    %80 = vector.multi_reduction <add>, %74, %cst_58 [0] : vector<64x256xf32> to vector<256xf32>
    %81 = vector.shape_cast %80 : vector<256xf32> to vector<1x256xf32>
    %82 = arith.addf %79, %81 : vector<1x256xf32>
    %c0_59 = arith.constant 0 : index
    %c0_60 = arith.constant 0 : index
    %83 = vector.load %arg20[%c0_59, %c0_60] : memref<2x256xf32, #tpu.memory_space<vmem>>, vector<1x256xf32>
    tpu.vector_store %arg20[%c0_59, %c0_60], %82 {strides = array<i32>} : memref<2x256xf32, #tpu.memory_space<vmem>>, vector<1x256xf32>,
    %c1_61 = arith.constant 1 : index
    %c0_62 = arith.constant 0 : index
    %84 = vector.load %arg20[%c1_61, %c0_62] : memref<2x256xf32, #tpu.memory_space<vmem>>, vector<1x256xf32>
    %85 = arith.mulf %74, %74 : vector<64x256xf32>
    %cst_63 = arith.constant dense<0.000000e+00> : vector<256xf32>
    %86 = vector.multi_reduction <add>, %85, %cst_63 [0] : vector<64x256xf32> to vector<256xf32>
    %87 = vector.shape_cast %86 : vector<256xf32> to vector<1x256xf32>
    %88 = arith.addf %84, %87 : vector<1x256xf32>
    %c1_64 = arith.constant 1 : index
    %c0_65 = arith.constant 0 : index
    %89 = vector.load %arg20[%c1_64, %c0_65] : memref<2x256xf32, #tpu.memory_space<vmem>>, vector<1x256xf32>
    tpu.vector_store %arg20[%c1_64, %c0_65], %88 {strides = array<i32>} : memref<2x256xf32, #tpu.memory_space<vmem>>, vector<1x256xf32>,
    %c0_66 = arith.constant 0 : index
    %c0_67 = arith.constant 0 : index
    %c0_68 = arith.constant 0 : index
    %90 = vector.load %arg11[%c0_66, %c0_67, %c0_68] : memref<1x1x256xf32, #tpu.memory_space<vmem>>, vector<1x1x256xf32>
    %91 = vector.shape_cast %90 : vector<1x1x256xf32> to vector<1x256xf32>
    %c0_69 = arith.constant 0 : index
    %c0_70 = arith.constant 0 : index
    %92 = vector.load %arg8[%c0_69, %c0_70] : memref<192x256xbf16, #tpu.memory_space<vmem>>, vector<64x256xbf16>
    %cst_71 = arith.constant dense<0.000000e+00> : vector<64x256xf32>
    %93 = tpu.matmul %31, %92, %cst_71 {dimension_numbers = #tpu.dot_dimension_numbers<[1], [0], [0], [1], [0, 0, 1, 1], [], []>} : vector<64x64xbf16>, vector<64x256xbf16>, vector<64x256xf32> -> vector<64x256xf32>
    %c64_72 = arith.constant 64 : index
    %c0_73 = arith.constant 0 : index
    %94 = vector.load %arg8[%c64_72, %c0_73] : memref<192x256xbf16, #tpu.memory_space<vmem>>, vector<64x256xbf16>
    %cst_74 = arith.constant dense<0.000000e+00> : vector<64x256xf32>
    %95 = tpu.matmul %33, %94, %cst_74 {dimension_numbers = #tpu.dot_dimension_numbers<[1], [0], [0], [1], [0, 0, 1, 1], [], []>} : vector<64x64xbf16>, vector<64x256xbf16>, vector<64x256xf32> -> vector<64x256xf32>
    %96 = arith.addf %93, %95 : vector<64x256xf32>
    %c128_75 = arith.constant 128 : index
    %c0_76 = arith.constant 0 : index
    %97 = vector.load %arg8[%c128_75, %c0_76] : memref<192x256xbf16, #tpu.memory_space<vmem>>, vector<64x256xbf16>
    %cst_77 = arith.constant dense<0.000000e+00> : vector<64x256xf32>
    %98 = tpu.matmul %34, %97, %cst_77 {dimension_numbers = #tpu.dot_dimension_numbers<[1], [0], [0], [1], [0, 0, 1, 1], [], []>} : vector<64x64xbf16>, vector<64x256xbf16>, vector<64x256xf32> -> vector<64x256xf32>
    %99 = arith.addf %96, %98 : vector<64x256xf32>
    %100 = vector.broadcast %91 : vector<1x256xf32> to vector<64x256xf32>
    %101 = arith.addf %99, %100 : vector<64x256xf32>
    %102 = arith.truncf %101 : vector<64x256xf32> to vector<64x256xbf16>
    %c0_78 = arith.constant 0 : index
    %c0_79 = arith.constant 0 : index
    %c0_80 = arith.constant 0 : index
    %103 = vector.load %arg16[%c0_78, %c0_79, %c0_80] : memref<1x64x256xbf16, #tpu.memory_space<vmem>>, vector<1x64x256xbf16>
    %104 = vector.shape_cast %103 : vector<1x64x256xbf16> to vector<64x256xbf16>
    %105 = vector.shape_cast %102 : vector<64x256xbf16> to vector<1x64x256xbf16>
    tpu.vector_store %arg16[%c0_78, %c0_79, %c0_80], %105 {strides = array<i32>} : memref<1x64x256xbf16, #tpu.memory_space<vmem>>, vector<1x64x256xbf16>,
    %c0_81 = arith.constant 0 : index
    %c0_82 = arith.constant 0 : index
    %106 = vector.load %arg21[%c0_81, %c0_82] : memref<2x256xf32, #tpu.memory_space<vmem>>, vector<1x256xf32>
    %cst_83 = arith.constant dense<0.000000e+00> : vector<256xf32>
    %107 = vector.multi_reduction <add>, %101, %cst_83 [0] : vector<64x256xf32> to vector<256xf32>
    %108 = vector.shape_cast %107 : vector<256xf32> to vector<1x256xf32>
    %109 = arith.addf %106, %108 : vector<1x256xf32>
    %c0_84 = arith.constant 0 : index
    %c0_85 = arith.constant 0 : index
    %110 = vector.load %arg21[%c0_84, %c0_85] : memref<2x256xf32, #tpu.memory_space<vmem>>, vector<1x256xf32>
    tpu.vector_store %arg21[%c0_84, %c0_85], %109 {strides = array<i32>} : memref<2x256xf32, #tpu.memory_space<vmem>>, vector<1x256xf32>,
    %c1_86 = arith.constant 1 : index
    %c0_87 = arith.constant 0 : index
    %111 = vector.load %arg21[%c1_86, %c0_87] : memref<2x256xf32, #tpu.memory_space<vmem>>, vector<1x256xf32>
    %112 = arith.mulf %101, %101 : vector<64x256xf32>
    %cst_88 = arith.constant dense<0.000000e+00> : vector<256xf32>
    %113 = vector.multi_reduction <add>, %112, %cst_88 [0] : vector<64x256xf32> to vector<256xf32>
    %114 = vector.shape_cast %113 : vector<256xf32> to vector<1x256xf32>
    %115 = arith.addf %111, %114 : vector<1x256xf32>
    %c1_89 = arith.constant 1 : index
    %c0_90 = arith.constant 0 : index
    %116 = vector.load %arg21[%c1_89, %c0_90] : memref<2x256xf32, #tpu.memory_space<vmem>>, vector<1x256xf32>
    tpu.vector_store %arg21[%c1_89, %c0_90], %115 {strides = array<i32>} : memref<2x256xf32, #tpu.memory_space<vmem>>, vector<1x256xf32>,
    %c0_i32_91 = arith.constant 0 : i32
    %117 = arith.cmpi eq, %arg1, %c0_i32_91 : i32
    %118 = arith.extui %117 : i1 to i32
    %c0_i32_92 = arith.constant 0 : i32
    %119 = arith.cmpi ne, %118, %c0_i32_92 : i32
    scf.if %119 {
      %c0_93 = arith.constant 0 : index
      %c0_94 = arith.constant 0 : index
      %120 = vector.load %arg18[%c0_93, %c0_94] : memref<2x64xf32, #tpu.memory_space<vmem>>, vector<2x64xf32>
      %c0_95 = arith.constant 0 : index
      %c0_96 = arith.constant 0 : index
      %c0_97 = arith.constant 0 : index
      %121 = vector.load %arg12[%c0_95, %c0_96, %c0_97] : memref<1x2x64xf32, #tpu.memory_space<vmem>>, vector<1x2x64xf32>
      %122 = vector.shape_cast %121 : vector<1x2x64xf32> to vector<2x64xf32>
      %123 = vector.shape_cast %120 : vector<2x64xf32> to vector<1x2x64xf32>
      tpu.vector_store %arg12[%c0_95, %c0_96, %c0_97], %123 {strides = array<i32>} : memref<1x2x64xf32, #tpu.memory_space<vmem>>, vector<1x2x64xf32>,
      %c0_98 = arith.constant 0 : index
      %c0_99 = arith.constant 0 : index
      %124 = vector.load %arg19[%c0_98, %c0_99] : memref<1x64xf32, #tpu.memory_space<vmem>>, vector<1x64xf32>
      %c0_100 = arith.constant 0 : index
      %c0_101 = arith.constant 0 : index
      %c0_102 = arith.constant 0 : index
      %125 = vector.load %arg13[%c0_100, %c0_101, %c0_102] : memref<1x1x64xf32, #tpu.memory_space<vmem>>, vector<1x1x64xf32>
      %126 = vector.shape_cast %125 : vector<1x1x64xf32> to vector<1x64xf32>
      %127 = vector.shape_cast %124 : vector<1x64xf32> to vector<1x1x64xf32>
      tpu.vector_store %arg13[%c0_100, %c0_101, %c0_102], %127 {strides = array<i32>} : memref<1x1x64xf32, #tpu.memory_space<vmem>>, vector<1x1x64xf32>,
      %c0_103 = arith.constant 0 : index
      %c0_104 = arith.constant 0 : index
      %128 = vector.load %arg20[%c0_103, %c0_104] : memref<2x256xf32, #tpu.memory_space<vmem>>, vector<2x256xf32>
      %c0_105 = arith.constant 0 : index
      %c0_106 = arith.constant 0 : index
      %c0_107 = arith.constant 0 : index
      %129 = vector.load %arg15[%c0_105, %c0_106, %c0_107] : memref<1x2x256xf32, #tpu.memory_space<vmem>>, vector<1x2x256xf32>
      %130 = vector.shape_cast %129 : vector<1x2x256xf32> to vector<2x256xf32>
      %131 = vector.shape_cast %128 : vector<2x256xf32> to vector<1x2x256xf32>
      tpu.vector_store %arg15[%c0_105, %c0_106, %c0_107], %131 {strides = array<i32>} : memref<1x2x256xf32, #tpu.memory_space<vmem>>, vector<1x2x256xf32>,
      %c0_108 = arith.constant 0 : index
      %c0_109 = arith.constant 0 : index
      %132 = vector.load %arg21[%c0_108, %c0_109] : memref<2x256xf32, #tpu.memory_space<vmem>>, vector<2x256xf32>
      %c0_110 = arith.constant 0 : index
      %c0_111 = arith.constant 0 : index
      %c0_112 = arith.constant 0 : index
      %133 = vector.load %arg17[%c0_110, %c0_111, %c0_112] : memref<1x2x256xf32, #tpu.memory_space<vmem>>, vector<1x2x256xf32>
      %134 = vector.shape_cast %133 : vector<1x2x256xf32> to vector<2x256xf32>
      %135 = vector.shape_cast %132 : vector<2x256xf32> to vector<1x2x256xf32>
      tpu.vector_store %arg17[%c0_110, %c0_111, %c0_112], %135 {strides = array<i32>} : memref<1x2x256xf32, #tpu.memory_space<vmem>>, vector<1x2x256xf32>,
    } else {
    }
    return
  }
  func.func @transform_0(%arg0: i32, %arg1: i32) -> (i32, i32, i32) {
    %c0_i32 = arith.constant 0 : i32
    %c0_i32_0 = arith.constant 0 : i32
    return %arg0, %arg1, %c0_i32 : i32, i32, i32
  }
  func.func @transform_1(%arg0: i32, %arg1: i32) -> (i32, i32, i32) {
    %c0_i32 = arith.constant 0 : i32
    %c0_i32_0 = arith.constant 0 : i32
    return %arg0, %arg1, %c0_i32 : i32, i32, i32
  }
  func.func @transform_2(%arg0: i32, %arg1: i32) -> (i32, i32, i32) {
    %c0_i32 = arith.constant 0 : i32
    %c0_i32_0 = arith.constant 0 : i32
    return %arg0, %arg1, %c0_i32 : i32, i32, i32
  }
  func.func @transform_3(%arg0: i32, %arg1: i32) -> (i32, i32, i32) {
    %c0_i32 = arith.constant 0 : i32
    %c0_i32_0 = arith.constant 0 : i32
    %c0_i32_1 = arith.constant 0 : i32
    return %arg0, %c0_i32, %c0_i32_0 : i32, i32, i32
  }
  func.func @transform_4(%arg0: i32, %arg1: i32) -> (i32, i32) {
    %c0_i32 = arith.constant 0 : i32
    %c0_i32_0 = arith.constant 0 : i32
    %c0_i32_1 = arith.constant 0 : i32
    return %c0_i32, %c0_i32_0 : i32, i32
  }
  func.func @transform_5(%arg0: i32, %arg1: i32) -> (i32, i32) {
    %c0_i32 = arith.constant 0 : i32
    %c0_i32_0 = arith.constant 0 : i32
    %c0_i32_1 = arith.constant 0 : i32
    return %c0_i32, %c0_i32_0 : i32, i32
  }
  func.func @transform_6(%arg0: i32, %arg1: i32) -> (i32, i32) {
    %c0_i32 = arith.constant 0 : i32
    %c0_i32_0 = arith.constant 0 : i32
    %c0_i32_1 = arith.constant 0 : i32
    return %c0_i32, %c0_i32_0 : i32, i32
  }
  func.func @transform_7(%arg0: i32, %arg1: i32) -> (i32, i32, i32) {
    %c0_i32 = arith.constant 0 : i32
    %c0_i32_0 = arith.constant 0 : i32
    %c0_i32_1 = arith.constant 0 : i32
    return %arg0, %c0_i32, %c0_i32_0 : i32, i32, i32
  }
  func.func @transform_8(%arg0: i32, %arg1: i32) -> (i32, i32, i32) {
    %c0_i32 = arith.constant 0 : i32
    %c0_i32_0 = arith.constant 0 : i32
    %c0_i32_1 = arith.constant 0 : i32
    return %arg0, %c0_i32, %c0_i32_0 : i32, i32, i32
  }
  func.func @transform_9(%arg0: i32, %arg1: i32) -> (i32, i32, i32) {
    %c0_i32 = arith.constant 0 : i32
    %c0_i32_0 = arith.constant 0 : i32
    %c0_i32_1 = arith.constant 0 : i32
    return %arg0, %c0_i32, %c0_i32_0 : i32, i32, i32
  }
  func.func @transform_10(%arg0: i32, %arg1: i32) -> (i32, i32, i32) {
    %c0_i32 = arith.constant 0 : i32
    %c0_i32_0 = arith.constant 0 : i32
    %c0_i32_1 = arith.constant 0 : i32
    return %arg0, %c0_i32, %c0_i32_0 : i32, i32, i32
  }
  func.func @transform_11(%arg0: i32, %arg1: i32) -> (i32, i32, i32) {
    %c0_i32 = arith.constant 0 : i32
    %c0_i32_0 = arith.constant 0 : i32
    %c0_i32_1 = arith.constant 0 : i32
    return %arg0, %c0_i32, %c0_i32_0 : i32, i32, i32
  }
  func.func @transform_12(%arg0: i32, %arg1: i32) -> (i32, i32, i32) {
    %c0_i32 = arith.constant 0 : i32
    %c0_i32_0 = arith.constant 0 : i32
    return %arg0, %arg1, %c0_i32 : i32, i32, i32
  }
  func.func @transform_13(%arg0: i32, %arg1: i32) -> (i32, i32, i32) {
    %c0_i32 = arith.constant 0 : i32
    %c0_i32_0 = arith.constant 0 : i32
    %c0_i32_1 = arith.constant 0 : i32
    return %arg0, %c0_i32, %c0_i32_0 : i32, i32, i32
  }
  func.func @transform_14(%arg0: i32, %arg1: i32) -> (i32, i32, i32) {
    %c0_i32 = arith.constant 0 : i32
    %c0_i32_0 = arith.constant 0 : i32
    return %arg0, %arg1, %c0_i32 : i32, i32, i32
  }
  func.func @transform_15(%arg0: i32, %arg1: i32) -> (i32, i32, i32) {
    %c0_i32 = arith.constant 0 : i32
    %c0_i32_0 = arith.constant 0 : i32
    %c0_i32_1 = arith.constant 0 : i32
    return %arg0, %c0_i32, %c0_i32_0 : i32, i32, i32
  }
}

module attributes {stable_mosaic.version = 11 : i64} {
  func.func @_norm_mm_stats_kernel(%arg0: i32, %arg1: i32, %arg2: memref<1x64x256xbf16, #tpu.memory_space<vmem>>, %arg3: memref<1x2x256xf32, #tpu.memory_space<vmem>>, %arg4: memref<1x1x256xf32, #tpu.memory_space<vmem>>, %arg5: memref<256x128xbf16, #tpu.memory_space<vmem>>, %arg6: memref<1x1x128xf32, #tpu.memory_space<vmem>>, %arg7: memref<1x64x128xbf16, #tpu.memory_space<vmem>>, %arg8: memref<1x2x128xf32, #tpu.memory_space<vmem>>, %arg9: memref<2x128xf32, #tpu.memory_space<vmem>>) attributes {dimension_semantics = [#tpu.dimension_semantics<parallel>, #tpu.dimension_semantics<arbitrary>], iteration_bounds = array<i64: 2, 1>, scalar_prefetch = 0 : i64, scratch_operands = 1 : i64, tpu.core_type = #tpu.core_type<tc>, window_params = [{transform_indices = @transform_0, window_bounds = array<i64: 1, 64, 256>}, {transform_indices = @transform_1, window_bounds = array<i64: 1, 2, 256>}, {transform_indices = @transform_2, window_bounds = array<i64: 1, 1, 256>}, {pipeline_mode = #tpu.pipeline_mode<synchronous>, transform_indices = @transform_3, window_bounds = array<i64: 256, 128>}, {transform_indices = @transform_4, window_bounds = array<i64: 1, 1, 128>}, {transform_indices = @transform_5, window_bounds = array<i64: 1, 64, 128>}, {transform_indices = @transform_6, window_bounds = array<i64: 1, 2, 128>}]} {
    %c0_i32 = arith.constant 0 : i32
    %0 = arith.cmpi eq, %arg1, %c0_i32 : i32
    %1 = arith.extui %0 : i1 to i32
    %c0_i32_0 = arith.constant 0 : i32
    %2 = arith.cmpi ne, %1, %c0_i32_0 : i32
    scf.if %2 {
      %cst_34 = arith.constant 0.000000e+00 : f32
      %59 = vector.broadcast %cst_34 : f32 to vector<2x128xf32>
      %c0_35 = arith.constant 0 : index
      %c0_36 = arith.constant 0 : index
      %60 = vector.load %arg9[%c0_35, %c0_36] : memref<2x128xf32, #tpu.memory_space<vmem>>, vector<2x128xf32>
      tpu.vector_store %arg9[%c0_35, %c0_36], %59 {strides = array<i32>} : memref<2x128xf32, #tpu.memory_space<vmem>>, vector<2x128xf32>,
    } else {
    }
    %c0 = arith.constant 0 : index
    %c0_1 = arith.constant 0 : index
    %c0_2 = arith.constant 0 : index
    %3 = vector.load %arg2[%c0, %c0_1, %c0_2] : memref<1x64x256xbf16, #tpu.memory_space<vmem>>, vector<1x64x256xbf16>
    %4 = vector.shape_cast %3 : vector<1x64x256xbf16> to vector<64x256xbf16>
    %5 = arith.extf %4 : vector<64x256xbf16> to vector<64x256xf32>
    %c0_3 = arith.constant 0 : index
    %c0_4 = arith.constant 0 : index
    %c0_5 = arith.constant 0 : index
    %6 = vector.load %arg4[%c0_3, %c0_4, %c0_5] : memref<1x1x256xf32, #tpu.memory_space<vmem>>, vector<1x1x256xf32>
    %7 = vector.shape_cast %6 : vector<1x1x256xf32> to vector<1x256xf32>
    %8 = vector.broadcast %7 : vector<1x256xf32> to vector<64x256xf32>
    %9 = arith.addf %5, %8 : vector<64x256xf32>
    %c0_6 = arith.constant 0 : index
    %c0_7 = arith.constant 0 : index
    %c0_8 = arith.constant 0 : index
    %10 = vector.load %arg3[%c0_6, %c0_7, %c0_8] : memref<1x2x256xf32, #tpu.memory_space<vmem>>, vector<1x2x256xf32>
    %11 = vector.shape_cast %10 : vector<1x2x256xf32> to vector<2x256xf32>
    %12 = vector.extract_strided_slice %11 {offsets = [0, 0], sizes = [1, 256], strides = [1, 1]} : vector<2x256xf32> to vector<1x256xf32>
    %cst = arith.constant 1.562500e-02 : f32
    %13 = vector.broadcast %cst : f32 to vector<1x256xf32>
    %14 = arith.mulf %12, %13 : vector<1x256xf32>
    %15 = vector.extract_strided_slice %11 {offsets = [1, 0], sizes = [1, 256], strides = [1, 1]} : vector<2x256xf32> to vector<1x256xf32>
    %cst_9 = arith.constant 1.562500e-02 : f32
    %16 = vector.broadcast %cst_9 : f32 to vector<1x256xf32>
    %17 = arith.mulf %15, %16 : vector<1x256xf32>
    %18 = arith.mulf %14, %14 : vector<1x256xf32>
    %19 = arith.subf %17, %18 : vector<1x256xf32>
    %cst_10 = arith.constant 0.000000e+00 : f32
    %20 = vector.broadcast %cst_10 : f32 to vector<1x256xf32>
    %21 = arith.maximumf %19, %20 : vector<1x256xf32>
    %cst_11 = arith.constant 9.99999974E-6 : f32
    %22 = vector.broadcast %cst_11 : f32 to vector<1x256xf32>
    %23 = arith.addf %21, %22 : vector<1x256xf32>
    %24 = math.rsqrt %23 : vector<1x256xf32>
    %25 = vector.broadcast %14 : vector<1x256xf32> to vector<64x256xf32>
    %26 = arith.subf %9, %25 : vector<64x256xf32>
    %27 = vector.broadcast %24 : vector<1x256xf32> to vector<64x256xf32>
    %28 = arith.mulf %26, %27 : vector<64x256xf32>
    %cst_12 = arith.constant 0.000000e+00 : f32
    %29 = vector.broadcast %cst_12 : f32 to vector<64x256xf32>
    %30 = arith.cmpf ogt, %28, %29 : vector<64x256xf32>
    %cst_13 = arith.constant 2.000000e-01 : f32
    %31 = vector.broadcast %cst_13 : f32 to vector<64x256xf32>
    %32 = arith.mulf %31, %28 : vector<64x256xf32>
    %33 = arith.select %30, %28, %32 : vector<64x256xi1>, vector<64x256xf32>
    %34 = arith.truncf %33 : vector<64x256xf32> to vector<64x256xbf16>
    %c0_14 = arith.constant 0 : index
    %c0_15 = arith.constant 0 : index
    %35 = vector.load %arg5[%c0_14, %c0_15] : memref<256x128xbf16, #tpu.memory_space<vmem>>, vector<256x128xbf16>
    %cst_16 = arith.constant dense<0.000000e+00> : vector<64x128xf32>
    %36 = tpu.matmul %34, %35, %cst_16 {dimension_numbers = #tpu.dot_dimension_numbers<[1], [0], [0], [1], [0, 0, 1, 1], [], []>} : vector<64x256xbf16>, vector<256x128xbf16>, vector<64x128xf32> -> vector<64x128xf32>
    %c0_17 = arith.constant 0 : index
    %c0_18 = arith.constant 0 : index
    %c0_19 = arith.constant 0 : index
    %37 = vector.load %arg6[%c0_17, %c0_18, %c0_19] : memref<1x1x128xf32, #tpu.memory_space<vmem>>, vector<1x1x128xf32>
    %38 = vector.shape_cast %37 : vector<1x1x128xf32> to vector<1x128xf32>
    %39 = vector.broadcast %38 : vector<1x128xf32> to vector<64x128xf32>
    %40 = arith.addf %36, %39 : vector<64x128xf32>
    %41 = arith.truncf %40 : vector<64x128xf32> to vector<64x128xbf16>
    %c0_20 = arith.constant 0 : index
    %c0_21 = arith.constant 0 : index
    %c0_22 = arith.constant 0 : index
    %42 = vector.load %arg7[%c0_20, %c0_21, %c0_22] : memref<1x64x128xbf16, #tpu.memory_space<vmem>>, vector<1x64x128xbf16>
    %43 = vector.shape_cast %42 : vector<1x64x128xbf16> to vector<64x128xbf16>
    %44 = vector.shape_cast %41 : vector<64x128xbf16> to vector<1x64x128xbf16>
    tpu.vector_store %arg7[%c0_20, %c0_21, %c0_22], %44 {strides = array<i32>} : memref<1x64x128xbf16, #tpu.memory_space<vmem>>, vector<1x64x128xbf16>,
    %c0_23 = arith.constant 0 : index
    %c0_24 = arith.constant 0 : index
    %45 = vector.load %arg9[%c0_23, %c0_24] : memref<2x128xf32, #tpu.memory_space<vmem>>, vector<1x128xf32>
    %cst_25 = arith.constant dense<0.000000e+00> : vector<128xf32>
    %46 = vector.multi_reduction <add>, %40, %cst_25 [0] : vector<64x128xf32> to vector<128xf32>
    %47 = vector.shape_cast %46 : vector<128xf32> to vector<1x128xf32>
    %48 = arith.addf %45, %47 : vector<1x128xf32>
    %c0_26 = arith.constant 0 : index
    %c0_27 = arith.constant 0 : index
    %49 = vector.load %arg9[%c0_26, %c0_27] : memref<2x128xf32, #tpu.memory_space<vmem>>, vector<1x128xf32>
    tpu.vector_store %arg9[%c0_26, %c0_27], %48 {strides = array<i32>} : memref<2x128xf32, #tpu.memory_space<vmem>>, vector<1x128xf32>,
    %c1 = arith.constant 1 : index
    %c0_28 = arith.constant 0 : index
    %50 = vector.load %arg9[%c1, %c0_28] : memref<2x128xf32, #tpu.memory_space<vmem>>, vector<1x128xf32>
    %51 = arith.mulf %40, %40 : vector<64x128xf32>
    %cst_29 = arith.constant dense<0.000000e+00> : vector<128xf32>
    %52 = vector.multi_reduction <add>, %51, %cst_29 [0] : vector<64x128xf32> to vector<128xf32>
    %53 = vector.shape_cast %52 : vector<128xf32> to vector<1x128xf32>
    %54 = arith.addf %50, %53 : vector<1x128xf32>
    %c1_30 = arith.constant 1 : index
    %c0_31 = arith.constant 0 : index
    %55 = vector.load %arg9[%c1_30, %c0_31] : memref<2x128xf32, #tpu.memory_space<vmem>>, vector<1x128xf32>
    tpu.vector_store %arg9[%c1_30, %c0_31], %54 {strides = array<i32>} : memref<2x128xf32, #tpu.memory_space<vmem>>, vector<1x128xf32>,
    %c0_i32_32 = arith.constant 0 : i32
    %56 = arith.cmpi eq, %arg1, %c0_i32_32 : i32
    %57 = arith.extui %56 : i1 to i32
    %c0_i32_33 = arith.constant 0 : i32
    %58 = arith.cmpi ne, %57, %c0_i32_33 : i32
    scf.if %58 {
      %c0_34 = arith.constant 0 : index
      %c0_35 = arith.constant 0 : index
      %59 = vector.load %arg9[%c0_34, %c0_35] : memref<2x128xf32, #tpu.memory_space<vmem>>, vector<2x128xf32>
      %c0_36 = arith.constant 0 : index
      %c0_37 = arith.constant 0 : index
      %c0_38 = arith.constant 0 : index
      %60 = vector.load %arg8[%c0_36, %c0_37, %c0_38] : memref<1x2x128xf32, #tpu.memory_space<vmem>>, vector<1x2x128xf32>
      %61 = vector.shape_cast %60 : vector<1x2x128xf32> to vector<2x128xf32>
      %62 = vector.shape_cast %59 : vector<2x128xf32> to vector<1x2x128xf32>
      tpu.vector_store %arg8[%c0_36, %c0_37, %c0_38], %62 {strides = array<i32>} : memref<1x2x128xf32, #tpu.memory_space<vmem>>, vector<1x2x128xf32>,
    } else {
    }
    return
  }
  func.func @transform_0(%arg0: i32, %arg1: i32) -> (i32, i32, i32) {
    %c0_i32 = arith.constant 0 : i32
    %c0_i32_0 = arith.constant 0 : i32
    return %arg0, %arg1, %c0_i32 : i32, i32, i32
  }
  func.func @transform_1(%arg0: i32, %arg1: i32) -> (i32, i32, i32) {
    %c0_i32 = arith.constant 0 : i32
    %c0_i32_0 = arith.constant 0 : i32
    %c0_i32_1 = arith.constant 0 : i32
    return %arg0, %c0_i32, %c0_i32_0 : i32, i32, i32
  }
  func.func @transform_2(%arg0: i32, %arg1: i32) -> (i32, i32, i32) {
    %c0_i32 = arith.constant 0 : i32
    %c0_i32_0 = arith.constant 0 : i32
    %c0_i32_1 = arith.constant 0 : i32
    return %arg0, %c0_i32, %c0_i32_0 : i32, i32, i32
  }
  func.func @transform_3(%arg0: i32, %arg1: i32) -> (i32, i32) {
    %c0_i32 = arith.constant 0 : i32
    %c0_i32_0 = arith.constant 0 : i32
    %c0_i32_1 = arith.constant 0 : i32
    return %c0_i32, %c0_i32_0 : i32, i32
  }
  func.func @transform_4(%arg0: i32, %arg1: i32) -> (i32, i32, i32) {
    %c0_i32 = arith.constant 0 : i32
    %c0_i32_0 = arith.constant 0 : i32
    %c0_i32_1 = arith.constant 0 : i32
    return %arg0, %c0_i32, %c0_i32_0 : i32, i32, i32
  }
  func.func @transform_5(%arg0: i32, %arg1: i32) -> (i32, i32, i32) {
    %c0_i32 = arith.constant 0 : i32
    %c0_i32_0 = arith.constant 0 : i32
    return %arg0, %arg1, %c0_i32 : i32, i32, i32
  }
  func.func @transform_6(%arg0: i32, %arg1: i32) -> (i32, i32, i32) {
    %c0_i32 = arith.constant 0 : i32
    %c0_i32_0 = arith.constant 0 : i32
    %c0_i32_1 = arith.constant 0 : i32
    return %arg0, %c0_i32, %c0_i32_0 : i32, i32, i32
  }
}

module attributes {stable_mosaic.version = 11 : i64} {
  func.func @_norm_mm_kernel(%arg0: i32, %arg1: i32, %arg2: memref<1x64x128xbf16, #tpu.memory_space<vmem>>, %arg3: memref<1x2x128xf32, #tpu.memory_space<vmem>>, %arg4: memref<128x3xbf16, #tpu.memory_space<vmem>>, %arg5: memref<1x1x3xf32, #tpu.memory_space<vmem>>, %arg6: memref<1x64x3xf32, #tpu.memory_space<vmem>>) attributes {dimension_semantics = [#tpu.dimension_semantics<parallel>, #tpu.dimension_semantics<parallel>], iteration_bounds = array<i64: 2, 1>, scalar_prefetch = 0 : i64, scratch_operands = 0 : i64, tpu.core_type = #tpu.core_type<tc>, window_params = [{transform_indices = @transform_0, window_bounds = array<i64: 1, 64, 128>}, {transform_indices = @transform_1, window_bounds = array<i64: 1, 2, 128>}, {pipeline_mode = #tpu.pipeline_mode<synchronous>, transform_indices = @transform_2, window_bounds = array<i64: 128, 3>}, {transform_indices = @transform_3, window_bounds = array<i64: 1, 1, 3>}, {transform_indices = @transform_4, window_bounds = array<i64: 1, 64, 3>}]} {
    %c0 = arith.constant 0 : index
    %c0_0 = arith.constant 0 : index
    %c0_1 = arith.constant 0 : index
    %0 = vector.load %arg2[%c0, %c0_0, %c0_1] : memref<1x64x128xbf16, #tpu.memory_space<vmem>>, vector<1x64x128xbf16>
    %1 = vector.shape_cast %0 : vector<1x64x128xbf16> to vector<64x128xbf16>
    %2 = arith.extf %1 : vector<64x128xbf16> to vector<64x128xf32>
    %c0_2 = arith.constant 0 : index
    %c0_3 = arith.constant 0 : index
    %c0_4 = arith.constant 0 : index
    %3 = vector.load %arg3[%c0_2, %c0_3, %c0_4] : memref<1x2x128xf32, #tpu.memory_space<vmem>>, vector<1x2x128xf32>
    %4 = vector.shape_cast %3 : vector<1x2x128xf32> to vector<2x128xf32>
    %5 = vector.extract_strided_slice %4 {offsets = [0, 0], sizes = [1, 128], strides = [1, 1]} : vector<2x128xf32> to vector<1x128xf32>
    %cst = arith.constant 1.562500e-02 : f32
    %6 = vector.broadcast %cst : f32 to vector<1x128xf32>
    %7 = arith.mulf %5, %6 : vector<1x128xf32>
    %8 = vector.extract_strided_slice %4 {offsets = [1, 0], sizes = [1, 128], strides = [1, 1]} : vector<2x128xf32> to vector<1x128xf32>
    %cst_5 = arith.constant 1.562500e-02 : f32
    %9 = vector.broadcast %cst_5 : f32 to vector<1x128xf32>
    %10 = arith.mulf %8, %9 : vector<1x128xf32>
    %11 = arith.mulf %7, %7 : vector<1x128xf32>
    %12 = arith.subf %10, %11 : vector<1x128xf32>
    %cst_6 = arith.constant 0.000000e+00 : f32
    %13 = vector.broadcast %cst_6 : f32 to vector<1x128xf32>
    %14 = arith.maximumf %12, %13 : vector<1x128xf32>
    %cst_7 = arith.constant 9.99999974E-6 : f32
    %15 = vector.broadcast %cst_7 : f32 to vector<1x128xf32>
    %16 = arith.addf %14, %15 : vector<1x128xf32>
    %17 = math.rsqrt %16 : vector<1x128xf32>
    %18 = vector.broadcast %7 : vector<1x128xf32> to vector<64x128xf32>
    %19 = arith.subf %2, %18 : vector<64x128xf32>
    %20 = vector.broadcast %17 : vector<1x128xf32> to vector<64x128xf32>
    %21 = arith.mulf %19, %20 : vector<64x128xf32>
    %cst_8 = arith.constant 0.000000e+00 : f32
    %22 = vector.broadcast %cst_8 : f32 to vector<64x128xf32>
    %23 = arith.cmpf ogt, %21, %22 : vector<64x128xf32>
    %cst_9 = arith.constant 2.000000e-01 : f32
    %24 = vector.broadcast %cst_9 : f32 to vector<64x128xf32>
    %25 = arith.mulf %24, %21 : vector<64x128xf32>
    %26 = arith.select %23, %21, %25 : vector<64x128xi1>, vector<64x128xf32>
    %27 = arith.truncf %26 : vector<64x128xf32> to vector<64x128xbf16>
    %c0_10 = arith.constant 0 : index
    %c0_11 = arith.constant 0 : index
    %28 = vector.load %arg4[%c0_10, %c0_11] : memref<128x3xbf16, #tpu.memory_space<vmem>>, vector<128x3xbf16>
    %cst_12 = arith.constant dense<0.000000e+00> : vector<64x3xf32>
    %29 = tpu.matmul %27, %28, %cst_12 {dimension_numbers = #tpu.dot_dimension_numbers<[1], [0], [0], [1], [0, 0, 1, 1], [], []>} : vector<64x128xbf16>, vector<128x3xbf16>, vector<64x3xf32> -> vector<64x3xf32>
    %c0_13 = arith.constant 0 : index
    %c0_14 = arith.constant 0 : index
    %c0_15 = arith.constant 0 : index
    %30 = vector.load %arg5[%c0_13, %c0_14, %c0_15] : memref<1x1x3xf32, #tpu.memory_space<vmem>>, vector<1x1x3xf32>
    %31 = vector.shape_cast %30 : vector<1x1x3xf32> to vector<1x3xf32>
    %32 = vector.broadcast %31 : vector<1x3xf32> to vector<64x3xf32>
    %33 = arith.addf %29, %32 : vector<64x3xf32>
    %c0_16 = arith.constant 0 : index
    %c0_17 = arith.constant 0 : index
    %c0_18 = arith.constant 0 : index
    %34 = vector.load %arg6[%c0_16, %c0_17, %c0_18] : memref<1x64x3xf32, #tpu.memory_space<vmem>>, vector<1x64x3xf32>
    %35 = vector.shape_cast %34 : vector<1x64x3xf32> to vector<64x3xf32>
    %36 = vector.shape_cast %33 : vector<64x3xf32> to vector<1x64x3xf32>
    tpu.vector_store %arg6[%c0_16, %c0_17, %c0_18], %36 {strides = array<i32>} : memref<1x64x3xf32, #tpu.memory_space<vmem>>, vector<1x64x3xf32>,
    return
  }
  func.func @transform_0(%arg0: i32, %arg1: i32) -> (i32, i32, i32) {
    %c0_i32 = arith.constant 0 : i32
    %c0_i32_0 = arith.constant 0 : i32
    return %arg0, %arg1, %c0_i32 : i32, i32, i32
  }
  func.func @transform_1(%arg0: i32, %arg1: i32) -> (i32, i32, i32) {
    %c0_i32 = arith.constant 0 : i32
    %c0_i32_0 = arith.constant 0 : i32
    %c0_i32_1 = arith.constant 0 : i32
    return %arg0, %c0_i32, %c0_i32_0 : i32, i32, i32
  }
  func.func @transform_2(%arg0: i32, %arg1: i32) -> (i32, i32) {
    %c0_i32 = arith.constant 0 : i32
    %c0_i32_0 = arith.constant 0 : i32
    %c0_i32_1 = arith.constant 0 : i32
    return %c0_i32, %c0_i32_0 : i32, i32
  }
  func.func @transform_3(%arg0: i32, %arg1: i32) -> (i32, i32, i32) {
    %c0_i32 = arith.constant 0 : i32
    %c0_i32_0 = arith.constant 0 : i32
    %c0_i32_1 = arith.constant 0 : i32
    return %arg0, %c0_i32, %c0_i32_0 : i32, i32, i32
  }
  func.func @transform_4(%arg0: i32, %arg1: i32) -> (i32, i32, i32) {
    %c0_i32 = arith.constant 0 : i32
    %c0_i32_0 = arith.constant 0 : i32
    return %arg0, %arg1, %c0_i32 : i32, i32, i32
  }
}

module attributes {stable_mosaic.version = 11 : i64} {
  func.func @_norm_project_split_kernel(%arg0: i32, %arg1: i32, %arg2: memref<1x64x256xbf16, #tpu.memory_space<vmem>>, %arg3: memref<1x2x256xf32, #tpu.memory_space<vmem>>, %arg4: memref<1x1x256xf32, #tpu.memory_space<vmem>>, %arg5: memref<256x512xbf16, #tpu.memory_space<vmem>>, %arg6: memref<1x1x512xf32, #tpu.memory_space<vmem>>, %arg7: memref<1x64x256xf32, #tpu.memory_space<vmem>>, %arg8: memref<1x64x256xbf16, #tpu.memory_space<vmem>>) attributes {dimension_semantics = [#tpu.dimension_semantics<parallel>, #tpu.dimension_semantics<parallel>], iteration_bounds = array<i64: 2, 1>, scalar_prefetch = 0 : i64, scratch_operands = 0 : i64, tpu.core_type = #tpu.core_type<tc>, window_params = [{transform_indices = @transform_0, window_bounds = array<i64: 1, 64, 256>}, {transform_indices = @transform_1, window_bounds = array<i64: 1, 2, 256>}, {transform_indices = @transform_2, window_bounds = array<i64: 1, 1, 256>}, {pipeline_mode = #tpu.pipeline_mode<synchronous>, transform_indices = @transform_3, window_bounds = array<i64: 256, 512>}, {transform_indices = @transform_4, window_bounds = array<i64: 1, 1, 512>}, {transform_indices = @transform_5, window_bounds = array<i64: 1, 64, 256>}, {transform_indices = @transform_6, window_bounds = array<i64: 1, 64, 256>}]} {
    %c0 = arith.constant 0 : index
    %c0_0 = arith.constant 0 : index
    %c0_1 = arith.constant 0 : index
    %0 = vector.load %arg2[%c0, %c0_0, %c0_1] : memref<1x64x256xbf16, #tpu.memory_space<vmem>>, vector<1x64x256xbf16>
    %1 = vector.shape_cast %0 : vector<1x64x256xbf16> to vector<64x256xbf16>
    %2 = arith.extf %1 : vector<64x256xbf16> to vector<64x256xf32>
    %c0_2 = arith.constant 0 : index
    %c0_3 = arith.constant 0 : index
    %c0_4 = arith.constant 0 : index
    %3 = vector.load %arg4[%c0_2, %c0_3, %c0_4] : memref<1x1x256xf32, #tpu.memory_space<vmem>>, vector<1x1x256xf32>
    %4 = vector.shape_cast %3 : vector<1x1x256xf32> to vector<1x256xf32>
    %5 = vector.broadcast %4 : vector<1x256xf32> to vector<64x256xf32>
    %6 = arith.addf %2, %5 : vector<64x256xf32>
    %c0_5 = arith.constant 0 : index
    %c0_6 = arith.constant 0 : index
    %c0_7 = arith.constant 0 : index
    %7 = vector.load %arg3[%c0_5, %c0_6, %c0_7] : memref<1x2x256xf32, #tpu.memory_space<vmem>>, vector<1x2x256xf32>
    %8 = vector.shape_cast %7 : vector<1x2x256xf32> to vector<2x256xf32>
    %9 = vector.extract_strided_slice %8 {offsets = [0, 0], sizes = [1, 256], strides = [1, 1]} : vector<2x256xf32> to vector<1x256xf32>
    %cst = arith.constant 1.562500e-02 : f32
    %10 = vector.broadcast %cst : f32 to vector<1x256xf32>
    %11 = arith.mulf %9, %10 : vector<1x256xf32>
    %12 = vector.extract_strided_slice %8 {offsets = [1, 0], sizes = [1, 256], strides = [1, 1]} : vector<2x256xf32> to vector<1x256xf32>
    %cst_8 = arith.constant 1.562500e-02 : f32
    %13 = vector.broadcast %cst_8 : f32 to vector<1x256xf32>
    %14 = arith.mulf %12, %13 : vector<1x256xf32>
    %15 = arith.mulf %11, %11 : vector<1x256xf32>
    %16 = arith.subf %14, %15 : vector<1x256xf32>
    %cst_9 = arith.constant 0.000000e+00 : f32
    %17 = vector.broadcast %cst_9 : f32 to vector<1x256xf32>
    %18 = arith.maximumf %16, %17 : vector<1x256xf32>
    %cst_10 = arith.constant 9.99999974E-6 : f32
    %19 = vector.broadcast %cst_10 : f32 to vector<1x256xf32>
    %20 = arith.addf %18, %19 : vector<1x256xf32>
    %21 = math.rsqrt %20 : vector<1x256xf32>
    %22 = vector.broadcast %11 : vector<1x256xf32> to vector<64x256xf32>
    %23 = arith.subf %6, %22 : vector<64x256xf32>
    %24 = vector.broadcast %21 : vector<1x256xf32> to vector<64x256xf32>
    %25 = arith.mulf %23, %24 : vector<64x256xf32>
    %cst_11 = arith.constant 0.000000e+00 : f32
    %26 = vector.broadcast %cst_11 : f32 to vector<64x256xf32>
    %27 = arith.cmpf ogt, %25, %26 : vector<64x256xf32>
    %cst_12 = arith.constant 2.000000e-01 : f32
    %28 = vector.broadcast %cst_12 : f32 to vector<64x256xf32>
    %29 = arith.mulf %28, %25 : vector<64x256xf32>
    %30 = arith.select %27, %25, %29 : vector<64x256xi1>, vector<64x256xf32>
    %31 = arith.truncf %30 : vector<64x256xf32> to vector<64x256xbf16>
    %c0_13 = arith.constant 0 : index
    %c0_14 = arith.constant 0 : index
    %32 = vector.load %arg5[%c0_13, %c0_14] : memref<256x512xbf16, #tpu.memory_space<vmem>>, vector<256x512xbf16>
    %cst_15 = arith.constant dense<0.000000e+00> : vector<64x512xf32>
    %33 = tpu.matmul %31, %32, %cst_15 {dimension_numbers = #tpu.dot_dimension_numbers<[1], [0], [0], [1], [0, 0, 1, 1], [], []>} : vector<64x256xbf16>, vector<256x512xbf16>, vector<64x512xf32> -> vector<64x512xf32>
    %c0_16 = arith.constant 0 : index
    %c0_17 = arith.constant 0 : index
    %c0_18 = arith.constant 0 : index
    %34 = vector.load %arg6[%c0_16, %c0_17, %c0_18] : memref<1x1x512xf32, #tpu.memory_space<vmem>>, vector<1x1x512xf32>
    %35 = vector.shape_cast %34 : vector<1x1x512xf32> to vector<1x512xf32>
    %36 = vector.broadcast %35 : vector<1x512xf32> to vector<64x512xf32>
    %37 = arith.addf %33, %36 : vector<64x512xf32>
    %38 = vector.extract_strided_slice %37 {offsets = [0, 0], sizes = [64, 256], strides = [1, 1]} : vector<64x512xf32> to vector<64x256xf32>
    %c0_19 = arith.constant 0 : index
    %c0_20 = arith.constant 0 : index
    %c0_21 = arith.constant 0 : index
    %39 = vector.load %arg7[%c0_19, %c0_20, %c0_21] : memref<1x64x256xf32, #tpu.memory_space<vmem>>, vector<1x64x256xf32>
    %40 = vector.shape_cast %39 : vector<1x64x256xf32> to vector<64x256xf32>
    %41 = vector.shape_cast %38 : vector<64x256xf32> to vector<1x64x256xf32>
    tpu.vector_store %arg7[%c0_19, %c0_20, %c0_21], %41 {strides = array<i32>} : memref<1x64x256xf32, #tpu.memory_space<vmem>>, vector<1x64x256xf32>,
    %42 = vector.extract_strided_slice %37 {offsets = [0, 256], sizes = [64, 256], strides = [1, 1]} : vector<64x512xf32> to vector<64x256xf32>
    %43 = arith.truncf %42 : vector<64x256xf32> to vector<64x256xbf16>
    %c0_22 = arith.constant 0 : index
    %c0_23 = arith.constant 0 : index
    %c0_24 = arith.constant 0 : index
    %44 = vector.load %arg8[%c0_22, %c0_23, %c0_24] : memref<1x64x256xbf16, #tpu.memory_space<vmem>>, vector<1x64x256xbf16>
    %45 = vector.shape_cast %44 : vector<1x64x256xbf16> to vector<64x256xbf16>
    %46 = vector.shape_cast %43 : vector<64x256xbf16> to vector<1x64x256xbf16>
    tpu.vector_store %arg8[%c0_22, %c0_23, %c0_24], %46 {strides = array<i32>} : memref<1x64x256xbf16, #tpu.memory_space<vmem>>, vector<1x64x256xbf16>,
    return
  }
  func.func @transform_0(%arg0: i32, %arg1: i32) -> (i32, i32, i32) {
    %c0_i32 = arith.constant 0 : i32
    %c0_i32_0 = arith.constant 0 : i32
    return %arg0, %arg1, %c0_i32 : i32, i32, i32
  }
  func.func @transform_1(%arg0: i32, %arg1: i32) -> (i32, i32, i32) {
    %c0_i32 = arith.constant 0 : i32
    %c0_i32_0 = arith.constant 0 : i32
    %c0_i32_1 = arith.constant 0 : i32
    return %arg0, %c0_i32, %c0_i32_0 : i32, i32, i32
  }
  func.func @transform_2(%arg0: i32, %arg1: i32) -> (i32, i32, i32) {
    %c0_i32 = arith.constant 0 : i32
    %c0_i32_0 = arith.constant 0 : i32
    %c0_i32_1 = arith.constant 0 : i32
    return %arg0, %c0_i32, %c0_i32_0 : i32, i32, i32
  }
  func.func @transform_3(%arg0: i32, %arg1: i32) -> (i32, i32) {
    %c0_i32 = arith.constant 0 : i32
    %c0_i32_0 = arith.constant 0 : i32
    %c0_i32_1 = arith.constant 0 : i32
    return %c0_i32, %c0_i32_0 : i32, i32
  }
  func.func @transform_4(%arg0: i32, %arg1: i32) -> (i32, i32, i32) {
    %c0_i32 = arith.constant 0 : i32
    %c0_i32_0 = arith.constant 0 : i32
    %c0_i32_1 = arith.constant 0 : i32
    return %arg0, %c0_i32, %c0_i32_0 : i32, i32, i32
  }
  func.func @transform_5(%arg0: i32, %arg1: i32) -> (i32, i32, i32) {
    %c0_i32 = arith.constant 0 : i32
    %c0_i32_0 = arith.constant 0 : i32
    return %arg0, %arg1, %c0_i32 : i32, i32, i32
  }
  func.func @transform_6(%arg0: i32, %arg1: i32) -> (i32, i32, i32) {
    %c0_i32 = arith.constant 0 : i32
    %c0_i32_0 = arith.constant 0 : i32
    return %arg0, %arg1, %c0_i32 : i32, i32, i32
  }
}

module attributes {stable_mosaic.version = 11 : i64} {
  func.func @_norm_mm_stats_kernel(%arg0: i32, %arg1: i32, %arg2: memref<1x64x256xbf16, #tpu.memory_space<vmem>>, %arg3: memref<1x2x256xf32, #tpu.memory_space<vmem>>, %arg4: memref<1x1x256xf32, #tpu.memory_space<vmem>>, %arg5: memref<256x256xbf16, #tpu.memory_space<vmem>>, %arg6: memref<1x1x256xf32, #tpu.memory_space<vmem>>, %arg7: memref<1x64x256xbf16, #tpu.memory_space<vmem>>, %arg8: memref<1x2x256xf32, #tpu.memory_space<vmem>>, %arg9: memref<2x256xf32, #tpu.memory_space<vmem>>) attributes {dimension_semantics = [#tpu.dimension_semantics<parallel>, #tpu.dimension_semantics<arbitrary>], iteration_bounds = array<i64: 2, 1>, scalar_prefetch = 0 : i64, scratch_operands = 1 : i64, tpu.core_type = #tpu.core_type<tc>, window_params = [{transform_indices = @transform_0, window_bounds = array<i64: 1, 64, 256>}, {transform_indices = @transform_1, window_bounds = array<i64: 1, 2, 256>}, {transform_indices = @transform_2, window_bounds = array<i64: 1, 1, 256>}, {pipeline_mode = #tpu.pipeline_mode<synchronous>, transform_indices = @transform_3, window_bounds = array<i64: 256, 256>}, {transform_indices = @transform_4, window_bounds = array<i64: 1, 1, 256>}, {transform_indices = @transform_5, window_bounds = array<i64: 1, 64, 256>}, {transform_indices = @transform_6, window_bounds = array<i64: 1, 2, 256>}]} {
    %c0_i32 = arith.constant 0 : i32
    %0 = arith.cmpi eq, %arg1, %c0_i32 : i32
    %1 = arith.extui %0 : i1 to i32
    %c0_i32_0 = arith.constant 0 : i32
    %2 = arith.cmpi ne, %1, %c0_i32_0 : i32
    scf.if %2 {
      %cst_34 = arith.constant 0.000000e+00 : f32
      %59 = vector.broadcast %cst_34 : f32 to vector<2x256xf32>
      %c0_35 = arith.constant 0 : index
      %c0_36 = arith.constant 0 : index
      %60 = vector.load %arg9[%c0_35, %c0_36] : memref<2x256xf32, #tpu.memory_space<vmem>>, vector<2x256xf32>
      tpu.vector_store %arg9[%c0_35, %c0_36], %59 {strides = array<i32>} : memref<2x256xf32, #tpu.memory_space<vmem>>, vector<2x256xf32>,
    } else {
    }
    %c0 = arith.constant 0 : index
    %c0_1 = arith.constant 0 : index
    %c0_2 = arith.constant 0 : index
    %3 = vector.load %arg2[%c0, %c0_1, %c0_2] : memref<1x64x256xbf16, #tpu.memory_space<vmem>>, vector<1x64x256xbf16>
    %4 = vector.shape_cast %3 : vector<1x64x256xbf16> to vector<64x256xbf16>
    %5 = arith.extf %4 : vector<64x256xbf16> to vector<64x256xf32>
    %c0_3 = arith.constant 0 : index
    %c0_4 = arith.constant 0 : index
    %c0_5 = arith.constant 0 : index
    %6 = vector.load %arg4[%c0_3, %c0_4, %c0_5] : memref<1x1x256xf32, #tpu.memory_space<vmem>>, vector<1x1x256xf32>
    %7 = vector.shape_cast %6 : vector<1x1x256xf32> to vector<1x256xf32>
    %8 = vector.broadcast %7 : vector<1x256xf32> to vector<64x256xf32>
    %9 = arith.addf %5, %8 : vector<64x256xf32>
    %c0_6 = arith.constant 0 : index
    %c0_7 = arith.constant 0 : index
    %c0_8 = arith.constant 0 : index
    %10 = vector.load %arg3[%c0_6, %c0_7, %c0_8] : memref<1x2x256xf32, #tpu.memory_space<vmem>>, vector<1x2x256xf32>
    %11 = vector.shape_cast %10 : vector<1x2x256xf32> to vector<2x256xf32>
    %12 = vector.extract_strided_slice %11 {offsets = [0, 0], sizes = [1, 256], strides = [1, 1]} : vector<2x256xf32> to vector<1x256xf32>
    %cst = arith.constant 0.001953125 : f32
    %13 = vector.broadcast %cst : f32 to vector<1x256xf32>
    %14 = arith.mulf %12, %13 : vector<1x256xf32>
    %15 = vector.extract_strided_slice %11 {offsets = [1, 0], sizes = [1, 256], strides = [1, 1]} : vector<2x256xf32> to vector<1x256xf32>
    %cst_9 = arith.constant 0.001953125 : f32
    %16 = vector.broadcast %cst_9 : f32 to vector<1x256xf32>
    %17 = arith.mulf %15, %16 : vector<1x256xf32>
    %18 = arith.mulf %14, %14 : vector<1x256xf32>
    %19 = arith.subf %17, %18 : vector<1x256xf32>
    %cst_10 = arith.constant 0.000000e+00 : f32
    %20 = vector.broadcast %cst_10 : f32 to vector<1x256xf32>
    %21 = arith.maximumf %19, %20 : vector<1x256xf32>
    %cst_11 = arith.constant 9.99999974E-6 : f32
    %22 = vector.broadcast %cst_11 : f32 to vector<1x256xf32>
    %23 = arith.addf %21, %22 : vector<1x256xf32>
    %24 = math.rsqrt %23 : vector<1x256xf32>
    %25 = vector.broadcast %14 : vector<1x256xf32> to vector<64x256xf32>
    %26 = arith.subf %9, %25 : vector<64x256xf32>
    %27 = vector.broadcast %24 : vector<1x256xf32> to vector<64x256xf32>
    %28 = arith.mulf %26, %27 : vector<64x256xf32>
    %cst_12 = arith.constant 0.000000e+00 : f32
    %29 = vector.broadcast %cst_12 : f32 to vector<64x256xf32>
    %30 = arith.cmpf ogt, %28, %29 : vector<64x256xf32>
    %cst_13 = arith.constant 2.000000e-01 : f32
    %31 = vector.broadcast %cst_13 : f32 to vector<64x256xf32>
    %32 = arith.mulf %31, %28 : vector<64x256xf32>
    %33 = arith.select %30, %28, %32 : vector<64x256xi1>, vector<64x256xf32>
    %34 = arith.truncf %33 : vector<64x256xf32> to vector<64x256xbf16>
    %c0_14 = arith.constant 0 : index
    %c0_15 = arith.constant 0 : index
    %35 = vector.load %arg5[%c0_14, %c0_15] : memref<256x256xbf16, #tpu.memory_space<vmem>>, vector<256x256xbf16>
    %cst_16 = arith.constant dense<0.000000e+00> : vector<64x256xf32>
    %36 = tpu.matmul %34, %35, %cst_16 {dimension_numbers = #tpu.dot_dimension_numbers<[1], [0], [0], [1], [0, 0, 1, 1], [], []>} : vector<64x256xbf16>, vector<256x256xbf16>, vector<64x256xf32> -> vector<64x256xf32>
    %c0_17 = arith.constant 0 : index
    %c0_18 = arith.constant 0 : index
    %c0_19 = arith.constant 0 : index
    %37 = vector.load %arg6[%c0_17, %c0_18, %c0_19] : memref<1x1x256xf32, #tpu.memory_space<vmem>>, vector<1x1x256xf32>
    %38 = vector.shape_cast %37 : vector<1x1x256xf32> to vector<1x256xf32>
    %39 = vector.broadcast %38 : vector<1x256xf32> to vector<64x256xf32>
    %40 = arith.addf %36, %39 : vector<64x256xf32>
    %41 = arith.truncf %40 : vector<64x256xf32> to vector<64x256xbf16>
    %c0_20 = arith.constant 0 : index
    %c0_21 = arith.constant 0 : index
    %c0_22 = arith.constant 0 : index
    %42 = vector.load %arg7[%c0_20, %c0_21, %c0_22] : memref<1x64x256xbf16, #tpu.memory_space<vmem>>, vector<1x64x256xbf16>
    %43 = vector.shape_cast %42 : vector<1x64x256xbf16> to vector<64x256xbf16>
    %44 = vector.shape_cast %41 : vector<64x256xbf16> to vector<1x64x256xbf16>
    tpu.vector_store %arg7[%c0_20, %c0_21, %c0_22], %44 {strides = array<i32>} : memref<1x64x256xbf16, #tpu.memory_space<vmem>>, vector<1x64x256xbf16>,
    %c0_23 = arith.constant 0 : index
    %c0_24 = arith.constant 0 : index
    %45 = vector.load %arg9[%c0_23, %c0_24] : memref<2x256xf32, #tpu.memory_space<vmem>>, vector<1x256xf32>
    %cst_25 = arith.constant dense<0.000000e+00> : vector<256xf32>
    %46 = vector.multi_reduction <add>, %40, %cst_25 [0] : vector<64x256xf32> to vector<256xf32>
    %47 = vector.shape_cast %46 : vector<256xf32> to vector<1x256xf32>
    %48 = arith.addf %45, %47 : vector<1x256xf32>
    %c0_26 = arith.constant 0 : index
    %c0_27 = arith.constant 0 : index
    %49 = vector.load %arg9[%c0_26, %c0_27] : memref<2x256xf32, #tpu.memory_space<vmem>>, vector<1x256xf32>
    tpu.vector_store %arg9[%c0_26, %c0_27], %48 {strides = array<i32>} : memref<2x256xf32, #tpu.memory_space<vmem>>, vector<1x256xf32>,
    %c1 = arith.constant 1 : index
    %c0_28 = arith.constant 0 : index
    %50 = vector.load %arg9[%c1, %c0_28] : memref<2x256xf32, #tpu.memory_space<vmem>>, vector<1x256xf32>
    %51 = arith.mulf %40, %40 : vector<64x256xf32>
    %cst_29 = arith.constant dense<0.000000e+00> : vector<256xf32>
    %52 = vector.multi_reduction <add>, %51, %cst_29 [0] : vector<64x256xf32> to vector<256xf32>
    %53 = vector.shape_cast %52 : vector<256xf32> to vector<1x256xf32>
    %54 = arith.addf %50, %53 : vector<1x256xf32>
    %c1_30 = arith.constant 1 : index
    %c0_31 = arith.constant 0 : index
    %55 = vector.load %arg9[%c1_30, %c0_31] : memref<2x256xf32, #tpu.memory_space<vmem>>, vector<1x256xf32>
    tpu.vector_store %arg9[%c1_30, %c0_31], %54 {strides = array<i32>} : memref<2x256xf32, #tpu.memory_space<vmem>>, vector<1x256xf32>,
    %c0_i32_32 = arith.constant 0 : i32
    %56 = arith.cmpi eq, %arg1, %c0_i32_32 : i32
    %57 = arith.extui %56 : i1 to i32
    %c0_i32_33 = arith.constant 0 : i32
    %58 = arith.cmpi ne, %57, %c0_i32_33 : i32
    scf.if %58 {
      %c0_34 = arith.constant 0 : index
      %c0_35 = arith.constant 0 : index
      %59 = vector.load %arg9[%c0_34, %c0_35] : memref<2x256xf32, #tpu.memory_space<vmem>>, vector<2x256xf32>
      %c0_36 = arith.constant 0 : index
      %c0_37 = arith.constant 0 : index
      %c0_38 = arith.constant 0 : index
      %60 = vector.load %arg8[%c0_36, %c0_37, %c0_38] : memref<1x2x256xf32, #tpu.memory_space<vmem>>, vector<1x2x256xf32>
      %61 = vector.shape_cast %60 : vector<1x2x256xf32> to vector<2x256xf32>
      %62 = vector.shape_cast %59 : vector<2x256xf32> to vector<1x2x256xf32>
      tpu.vector_store %arg8[%c0_36, %c0_37, %c0_38], %62 {strides = array<i32>} : memref<1x2x256xf32, #tpu.memory_space<vmem>>, vector<1x2x256xf32>,
    } else {
    }
    return
  }
  func.func @transform_0(%arg0: i32, %arg1: i32) -> (i32, i32, i32) {
    %c0_i32 = arith.constant 0 : i32
    %c0_i32_0 = arith.constant 0 : i32
    return %arg0, %arg1, %c0_i32 : i32, i32, i32
  }
  func.func @transform_1(%arg0: i32, %arg1: i32) -> (i32, i32, i32) {
    %c0_i32 = arith.constant 0 : i32
    %c0_i32_0 = arith.constant 0 : i32
    %c0_i32_1 = arith.constant 0 : i32
    return %arg0, %c0_i32, %c0_i32_0 : i32, i32, i32
  }
  func.func @transform_2(%arg0: i32, %arg1: i32) -> (i32, i32, i32) {
    %c0_i32 = arith.constant 0 : i32
    %c0_i32_0 = arith.constant 0 : i32
    %c0_i32_1 = arith.constant 0 : i32
    return %arg0, %c0_i32, %c0_i32_0 : i32, i32, i32
  }
  func.func @transform_3(%arg0: i32, %arg1: i32) -> (i32, i32) {
    %c0_i32 = arith.constant 0 : i32
    %c0_i32_0 = arith.constant 0 : i32
    %c0_i32_1 = arith.constant 0 : i32
    return %c0_i32, %c0_i32_0 : i32, i32
  }
  func.func @transform_4(%arg0: i32, %arg1: i32) -> (i32, i32, i32) {
    %c0_i32 = arith.constant 0 : i32
    %c0_i32_0 = arith.constant 0 : i32
    %c0_i32_1 = arith.constant 0 : i32
    return %arg0, %c0_i32, %c0_i32_0 : i32, i32, i32
  }
  func.func @transform_5(%arg0: i32, %arg1: i32) -> (i32, i32, i32) {
    %c0_i32 = arith.constant 0 : i32
    %c0_i32_0 = arith.constant 0 : i32
    return %arg0, %arg1, %c0_i32 : i32, i32, i32
  }
  func.func @transform_6(%arg0: i32, %arg1: i32) -> (i32, i32, i32) {
    %c0_i32 = arith.constant 0 : i32
    %c0_i32_0 = arith.constant 0 : i32
    %c0_i32_1 = arith.constant 0 : i32
    return %arg0, %c0_i32, %c0_i32_0 : i32, i32, i32
  }
}

module attributes {stable_mosaic.version = 11 : i64} {
  func.func @_norm_mm_kernel(%arg0: i32, %arg1: i32, %arg2: memref<1x64x128xbf16, #tpu.memory_space<vmem>>, %arg3: memref<1x2x128xf32, #tpu.memory_space<vmem>>, %arg4: memref<128x8xbf16, #tpu.memory_space<vmem>>, %arg5: memref<1x1x8xf32, #tpu.memory_space<vmem>>, %arg6: memref<1x64x8xf32, #tpu.memory_space<vmem>>) attributes {dimension_semantics = [#tpu.dimension_semantics<parallel>, #tpu.dimension_semantics<parallel>], iteration_bounds = array<i64: 2, 1>, scalar_prefetch = 0 : i64, scratch_operands = 0 : i64, tpu.core_type = #tpu.core_type<tc>, window_params = [{transform_indices = @transform_0, window_bounds = array<i64: 1, 64, 128>}, {transform_indices = @transform_1, window_bounds = array<i64: 1, 2, 128>}, {pipeline_mode = #tpu.pipeline_mode<synchronous>, transform_indices = @transform_2, window_bounds = array<i64: 128, 8>}, {transform_indices = @transform_3, window_bounds = array<i64: 1, 1, 8>}, {transform_indices = @transform_4, window_bounds = array<i64: 1, 64, 8>}]} {
    %c0 = arith.constant 0 : index
    %c0_0 = arith.constant 0 : index
    %c0_1 = arith.constant 0 : index
    %0 = vector.load %arg2[%c0, %c0_0, %c0_1] : memref<1x64x128xbf16, #tpu.memory_space<vmem>>, vector<1x64x128xbf16>
    %1 = vector.shape_cast %0 : vector<1x64x128xbf16> to vector<64x128xbf16>
    %2 = arith.extf %1 : vector<64x128xbf16> to vector<64x128xf32>
    %c0_2 = arith.constant 0 : index
    %c0_3 = arith.constant 0 : index
    %c0_4 = arith.constant 0 : index
    %3 = vector.load %arg3[%c0_2, %c0_3, %c0_4] : memref<1x2x128xf32, #tpu.memory_space<vmem>>, vector<1x2x128xf32>
    %4 = vector.shape_cast %3 : vector<1x2x128xf32> to vector<2x128xf32>
    %5 = vector.extract_strided_slice %4 {offsets = [0, 0], sizes = [1, 128], strides = [1, 1]} : vector<2x128xf32> to vector<1x128xf32>
    %cst = arith.constant 1.562500e-02 : f32
    %6 = vector.broadcast %cst : f32 to vector<1x128xf32>
    %7 = arith.mulf %5, %6 : vector<1x128xf32>
    %8 = vector.extract_strided_slice %4 {offsets = [1, 0], sizes = [1, 128], strides = [1, 1]} : vector<2x128xf32> to vector<1x128xf32>
    %cst_5 = arith.constant 1.562500e-02 : f32
    %9 = vector.broadcast %cst_5 : f32 to vector<1x128xf32>
    %10 = arith.mulf %8, %9 : vector<1x128xf32>
    %11 = arith.mulf %7, %7 : vector<1x128xf32>
    %12 = arith.subf %10, %11 : vector<1x128xf32>
    %cst_6 = arith.constant 0.000000e+00 : f32
    %13 = vector.broadcast %cst_6 : f32 to vector<1x128xf32>
    %14 = arith.maximumf %12, %13 : vector<1x128xf32>
    %cst_7 = arith.constant 9.99999974E-6 : f32
    %15 = vector.broadcast %cst_7 : f32 to vector<1x128xf32>
    %16 = arith.addf %14, %15 : vector<1x128xf32>
    %17 = math.rsqrt %16 : vector<1x128xf32>
    %18 = vector.broadcast %7 : vector<1x128xf32> to vector<64x128xf32>
    %19 = arith.subf %2, %18 : vector<64x128xf32>
    %20 = vector.broadcast %17 : vector<1x128xf32> to vector<64x128xf32>
    %21 = arith.mulf %19, %20 : vector<64x128xf32>
    %cst_8 = arith.constant 0.000000e+00 : f32
    %22 = vector.broadcast %cst_8 : f32 to vector<64x128xf32>
    %23 = arith.cmpf ogt, %21, %22 : vector<64x128xf32>
    %cst_9 = arith.constant 2.000000e-01 : f32
    %24 = vector.broadcast %cst_9 : f32 to vector<64x128xf32>
    %25 = arith.mulf %24, %21 : vector<64x128xf32>
    %26 = arith.select %23, %21, %25 : vector<64x128xi1>, vector<64x128xf32>
    %27 = arith.truncf %26 : vector<64x128xf32> to vector<64x128xbf16>
    %c0_10 = arith.constant 0 : index
    %c0_11 = arith.constant 0 : index
    %28 = vector.load %arg4[%c0_10, %c0_11] : memref<128x8xbf16, #tpu.memory_space<vmem>>, vector<128x8xbf16>
    %cst_12 = arith.constant dense<0.000000e+00> : vector<64x8xf32>
    %29 = tpu.matmul %27, %28, %cst_12 {dimension_numbers = #tpu.dot_dimension_numbers<[1], [0], [0], [1], [0, 0, 1, 1], [], []>} : vector<64x128xbf16>, vector<128x8xbf16>, vector<64x8xf32> -> vector<64x8xf32>
    %c0_13 = arith.constant 0 : index
    %c0_14 = arith.constant 0 : index
    %c0_15 = arith.constant 0 : index
    %30 = vector.load %arg5[%c0_13, %c0_14, %c0_15] : memref<1x1x8xf32, #tpu.memory_space<vmem>>, vector<1x1x8xf32>
    %31 = vector.shape_cast %30 : vector<1x1x8xf32> to vector<1x8xf32>
    %32 = vector.broadcast %31 : vector<1x8xf32> to vector<64x8xf32>
    %33 = arith.addf %29, %32 : vector<64x8xf32>
    %c0_16 = arith.constant 0 : index
    %c0_17 = arith.constant 0 : index
    %c0_18 = arith.constant 0 : index
    %34 = vector.load %arg6[%c0_16, %c0_17, %c0_18] : memref<1x64x8xf32, #tpu.memory_space<vmem>>, vector<1x64x8xf32>
    %35 = vector.shape_cast %34 : vector<1x64x8xf32> to vector<64x8xf32>
    %36 = vector.shape_cast %33 : vector<64x8xf32> to vector<1x64x8xf32>
    tpu.vector_store %arg6[%c0_16, %c0_17, %c0_18], %36 {strides = array<i32>} : memref<1x64x8xf32, #tpu.memory_space<vmem>>, vector<1x64x8xf32>,
    return
  }
  func.func @transform_0(%arg0: i32, %arg1: i32) -> (i32, i32, i32) {
    %c0_i32 = arith.constant 0 : i32
    %c0_i32_0 = arith.constant 0 : i32
    return %arg0, %arg1, %c0_i32 : i32, i32, i32
  }
  func.func @transform_1(%arg0: i32, %arg1: i32) -> (i32, i32, i32) {
    %c0_i32 = arith.constant 0 : i32
    %c0_i32_0 = arith.constant 0 : i32
    %c0_i32_1 = arith.constant 0 : i32
    return %arg0, %c0_i32, %c0_i32_0 : i32, i32, i32
  }
  func.func @transform_2(%arg0: i32, %arg1: i32) -> (i32, i32) {
    %c0_i32 = arith.constant 0 : i32
    %c0_i32_0 = arith.constant 0 : i32
    %c0_i32_1 = arith.constant 0 : i32
    return %c0_i32, %c0_i32_0 : i32, i32
  }
  func.func @transform_3(%arg0: i32, %arg1: i32) -> (i32, i32, i32) {
    %c0_i32 = arith.constant 0 : i32
    %c0_i32_0 = arith.constant 0 : i32
    %c0_i32_1 = arith.constant 0 : i32
    return %arg0, %c0_i32, %c0_i32_0 : i32, i32, i32
  }
  func.func @transform_4(%arg0: i32, %arg1: i32) -> (i32, i32, i32) {
    %c0_i32 = arith.constant 0 : i32
    %c0_i32_0 = arith.constant 0 : i32
    return %arg0, %arg1, %c0_i32 : i32, i32, i32
  }
}

</mosaic_0001>

<bundles_post_ra>
// kernel: teethgnn_forward.10
= control target key start
LH: loop header
LB: loop body
LE: loop exit
PB: predicated region body
PF: predicated region fallthrough
CT: control target
= control target key end

     0   :  { %s539_s12 = smov 0   ;;  %s541_s13 = smov 0   ;;  %s578_s0 = inlined_call_operand.vmem [shape: f32[2,64,16], index: 0, kind: input, shape index: {}]   ;;  %s579_s1 = inlined_call_operand.vmem [shape: bf16[16,128], index: 1, kind: input, shape index: {}]   ;;  %s580_s2 = inlined_call_operand.vmem [shape: f32[2,1,128], index: 2, kind: input, shape index: {}]   ;;  %s581_s3 = inlined_call_operand.vmem [shape: f32[2,64,128], index: 3, kind: output, shape index: {}]  }
   0x1   :  { %s543_s14 = smov 0  }
   0x2 LB: > { %s25_s15 = sadd.s32 1, %s513_s13  ;;  %p438_p0 = scmp.ge.s32.totalorder %s517_s14, 1  ;;  %s517_s14 = sphi %s543_s14, %s13_s14   ;;  %s513_s13 = sphi %s541_s13, %s583_s13   ;;  %s509_s12 = sphi %s539_s12, %s582_s12  }
   0x3   : > { %p27_p1 = scmp.ge.s32.totalorder %s25_s15, 2  ;;  %p166_p2 = scmp.lt.s32.totalorder %s517_s14, 3 }
   0x5   : > { %s585_s15 = smov (%p27_p1, %s25_s15), 0  ;;  %p167_p3 = pnand %p438_p0, %p166_p2 }
   0x6   : > { %p202_p4 = scmp.lt.s32.totalorder (!%p167_p3), %s509_s12, 1 }
   0x7   : > { %170 = sbr.rel (%p167_p3) target bundleno = 222 (0xde), region = 32 }
   0xc   : > { %v494_v0 = vld [vmem:[%s579_s1] sm:$0xff]   ;;  %s587_s12 = smov (!%p202_p4, %s509_s12), 1  ;;  %vm252_vm0 = vcmask 130048  }
   0xd   : > { %458 = vmatprep.subr.bf16.mxu0 %v494_v0  ;;  %468 = vmatprep.subr.bf16.mxu1 %v494_v0  ;;  %s451_s18 = sshll.u32 %s587_s12, 6  ;;  %s213_s24 = scalar_lea.vmem %s580_s2, %s587_s12 }
   0xe   : > { %459 = vmatpush3.bf16.msra.mxu0 %v494_v0  ;;  %469 = vmatpush3.bf16.msra.mxu1 %v494_v0  ;;  %s209_s21 = scalar_lea.vmem %s578_s0, %s451_s18  ;;  %v443_v13 = vld [vmem:[%s213_s24] ss:$0 sm:$0xff]  ;;  %s222_s27 = scalar_lea.vmem %s581_s3, %s451_s18 }
   0xf   : > { %v225_v1 = vld [vmem:[%s209_s21] sm:$0xff]  ;;  %v226_v2 = vld [vmem:[%s209_s21 + $0x8] sm:$0xff]  ;;  %v227_v6 = vld [vmem:[%s209_s21 + $0x10] sm:$0xff] }
  0x10   : > { %v229_v3 = vld [vmem:[%s209_s21 + $0x20] sm:$0xff]  ;;  %v233_v4 = vpack.c.bf16 %v226_v2, %v225_v1  ;;  %v230_v5 = vld [vmem:[%s209_s21 + $0x28] sm:$0xff]  ;;  %v228_v7 = vld [vmem:[%s209_s21 + $0x18] sm:$0xff] }
  0x11   : > { %v235_v8 = vpack.c.bf16 %v230_v5, %v229_v3  ;;  %v234_v9 = vpack.c.bf16 %v228_v7, %v227_v6  ;;  %v231_v10 = vld [vmem:[%s209_s21 + $0x30] sm:$0xff]  ;;  %v232_v11 = vld [vmem:[%s209_s21 + $0x38] sm:$0xff] }
  0x12   : > { %460 = vmatprep.mubr.msk.bf16.mxu0 %vm252_vm0, %v233_v4  ;;  %v236_v12 = vpack.c.bf16 %v232_v11, %v231_v10 }
  0x13   : > { %464 = vmatprep.mubr.msk.bf16.mxu1 %vm252_vm0, %v235_v8  ;;  %461 = vmatmul.mubr.msk.bf16.vlgmr.msra.gmra.mxu0 %vm252_vm0, %v234_v9 }
  0x14   : > { %465 = vmatmul.mubr.msk.bf16.vlgmr.msra.gmra.mxu1 %vm252_vm0, %v236_v12 }
  0xd3   : > { %v462_v14 = vpop.f32.mrf.mxu0 }
  0xd4   : > { %v308_v15 = vadd.f32 %v462_v14, %v443_v13  ;;  %v466_v16 = vpop.f32.mrf.mxu1 }
  0xd5   : > { %v324_v17 = vadd.f32 %v466_v16, %v443_v13  ;;  %v299_v18 = vpop.f32.mrf.mxu0 }
  0xd6   : > { %332 = vst [vmem:[%s222_s27 + $0x10] sm:$0xff] %v308_v15  ;;  %v300_v19 = vadd.f32 %v443_v13, %v299_v18  ;;  %v315_v20 = vpop.f32.mrf.mxu1 }
  0xd7   : > { %336 = vst [vmem:[%s222_s27 + $0x30] sm:$0xff] %v324_v17  ;;  %v316_v21 = vadd.f32 %v443_v13, %v315_v20  ;;  %v463_v22 = vpop.f32.mrf.mxu0 }
  0xd8   : > { %330 = vst [vmem:[%s222_s27] sm:$0xff] %v300_v19  ;;  %v311_v23 = vadd.f32 %v463_v22, %v443_v13  ;;  %v467_v24 = vpop.f32.mrf.mxu1 }
  0xd9   : > { %334 = vst [vmem:[%s222_s27 + $0x20] sm:$0xff] %v316_v21  ;;  %v327_v25 = vadd.f32 %v467_v24, %v443_v13  ;;  %v302_v26 = vpop.f32.mrf.mxu0 }
  0xda   : > { %333 = vst [vmem:[%s222_s27 + $0x18] sm:$0xff] %v311_v23  ;;  %v303_v27 = vadd.f32 %v443_v13, %v302_v26  ;;  %v318_v28 = vpop.f32.mrf.mxu1 }
  0xdb   : > { %337 = vst [vmem:[%s222_s27 + $0x38] sm:$0xff] %v327_v25  ;;  %v319_v29 = vadd.f32 %v443_v13, %v318_v28 }
  0xdc   : > { %331 = vst [vmem:[%s222_s27 + $0x8] sm:$0xff] %v303_v27 }
  0xdd   : > { %335 = vst [vmem:[%s222_s27 + $0x28] sm:$0xff] %v319_v29 }
  0xde PF: > { %s13_s14 = sadd.s32 1, %s517_s14   ;;  %s582_s12 = smov %s513_s13 }
  0xdf   : > { %p10_p5 = scmp.ge.s32.totalorder %s13_s14, 4   ;;  %s583_s13 = smov %s585_s15 }
  0xe1   :  { %12 = sbr.rel (!%p10_p5) target bundleno = 2 (0x2), region = 65 }

// kernel: teethgnn_forward.11
= control target key start
LH: loop header
LB: loop body
LE: loop exit
PB: predicated region body
PF: predicated region fallthrough
CT: control target
= control target key end

     0   :  { %s895_s18 = smov 0   ;;  %s897_s19 = smov 0   ;;  %s983_s0 = inlined_call_operand.vmem [shape: bf16[2,64,64], index: 0, kind: input, shape index: {}]   ;;  %s984_s1 = inlined_call_operand.vmem [shape: f32[2,2,64], index: 1, kind: input, shape index: {}]   ;;  %s985_s2 = inlined_call_operand.vmem [shape: bf16[64,128], index: 2, kind: input, shape index: {}]   ;;  %s986_s3 = inlined_call_operand.vmem [shape: f32[2,1,128], index: 3, kind: input, shape index: {}]   ;;  %s987_s4 = inlined_call_operand.vmem [shape: bf16[2,64,64], index: 4, kind: output, shape index: {0}]   ;;  %s988_s5 = inlined_call_operand.vmem [shape: f32[2,64,128], index: 5, kind: output, shape index: {1}]  }
   0x1   :  { %s899_s20 = smov 0  }
   0x2 LB: > { %s28_s21 = sadd.s32 1, %s859_s19  ;;  %p722_p0 = scmp.ge.s32.totalorder %s863_s20, 1  ;;  %s863_s20 = sphi %s899_s20, %s16_s20   ;;  %s859_s19 = sphi %s897_s19, %s990_s19   ;;  %s855_s18 = sphi %s895_s18, %s989_s18  }
   0x3   : > { %p30_p1 = scmp.ge.s32.totalorder %s28_s21, 2  ;;  %p230_p2 = scmp.lt.s32.totalorder %s863_s20, 3 }
   0x5   : > { %s992_s21 = smov (%p30_p1, %s28_s21), 0  ;;  %p231_p3 = pnand %p722_p0, %p230_p2 }
   0x6   : > { %p283_p4 = scmp.lt.s32.totalorder (!%p231_p3), %s855_s18, 1 }
   0x7   : > { %234 = sbr.rel (%p231_p3) target bundleno = 259 (0x103), region = 36 }
   0xc   : > { %v835_v0 = vld [vmem:[%s985_s2 + $0x18] sm:$0xff]   ;;  %v836_v1 = vld [vmem:[%s985_s2 + $0x10] sm:$0xff]   ;;  %s994_s18 = smov (!%p283_p4, %s855_s18), 1  ;;  %v837_v2 = vld [vmem:[%s985_s2 + $0x8] sm:$0xff]   ;;  %v346_v10 = vlaneseq  ;;  %vm426_vm0 = vcmask 519168   ;;  %vm474_vm1 = vcmask 523264  }
   0xd   : > { %787 = vmatprep.subr.bf16.mxu0 %v835_v0  ;;  %803 = vmatprep.subr.bf16.mxu1 %v835_v0  ;;  %s725_s28 = sshll.u32 %s994_s18, 1  ;;  %v838_v5 = vld [vmem:[%s985_s2] sm:$0xff]   ;;  %s749_s9 = sshll.u32 %s994_s18, 5 }
   0xe   : > { %788 = vmatpush3.bf16.msra.mxu0 %v835_v0  ;;  %807 = vmatpush3.bf16.msra.mxu1 %v835_v0  ;;  %s295_s6 = scalar_lea.vmem %s984_s1, %s725_s28  ;;  %v347_v12 = vshrl.u32 %v346_v10, 7  ;;  %s290_s12 = scalar_lea.vmem %s983_s0, %s749_s9 }
   0xf   : > { %789 = vmatprep.subr.bf16.mxu0 %v836_v1  ;;  %804 = vmatprep.subr.bf16.mxu1 %v836_v1  ;;  %v336_v3 = vld [vmem:[%s295_s6] sm:$0x3]  ;;  %v777_v15 = vld [vmem:[%s290_s12 + $0x10] sm:$0xff]   ;;  %v776_v16 = vld [vmem:[%s290_s12 + $0x8] sm:$0xff]   ;;  %s942_s15 = scalar_lea.vmem %s987_s4, %s749_s9  ;;  %s298_s22 = scalar_lea.vmem %s986_s3, %s994_s18 }
  0x10   : > { %v337_v4 = vmul.f32 0.001953125, %v336_v3  ;;  %v761_v13 = vld [vmem:[%s290_s12] sm:$0xff]   ;;  %v348_v14 = vsub.s32 0, %v347_v12  ;;  %v778_v17 = vld [vmem:[%s290_s12 + $0x18] sm:$0xff]   ;;  %v770_v21 = vunpack.c.l.bf16 %v777_v15  ;;  %v771_v22 = vunpack.c.h.bf16 %v777_v15  ;;  %s751_s23 = sshll.u32 %s994_s18, 6 }
  0x11   : > { %v762_v18 = vunpack.c.l.bf16 %v761_v13  ;;  %v763_v19 = vunpack.c.h.bf16 %v761_v13  ;;  %v766_v23 = vunpack.c.l.bf16 %v776_v16  ;;  %v767_v24 = vunpack.c.h.bf16 %v776_v16  ;;  %v738_v10 = vld [vmem:[%s298_s22] ss:$0 sm:$0xff]  ;;  %s317_s26 = scalar_lea.vmem %s988_s5, %s751_s23 }
  0x12   : > { %790 = vmatpush3.bf16.msra.mxu0 %v836_v1  ;;  %808 = vmatpush3.bf16.msra.mxu1 %v836_v1  ;;  %v338_v6 = vmul.f32 %v337_v4, %v337_v4  ;;  %v349_v20 = vrot.slane %v337_v4, %v348_v14  ;;  %v774_v25 = vunpack.c.l.bf16 %v778_v17  ;;  %v775_v26 = vunpack.c.h.bf16 %v778_v17 }
  0x13   : > { %791 = vmatprep.subr.bf16.mxu0 %v837_v2  ;;  %805 = vmatprep.subr.bf16.mxu1 %v837_v2  ;;  %v360_v27 = vsub.s32 1, %v347_v12 }
  0x14   : > { %v340_v7 = vrot.slane %v338_v6, 7  ;;  %v350_v28 = vsub.f32 %v762_v18, %v349_v20  ;;  %v351_v29 = vsub.f32 %v763_v19, %v349_v20  ;;  %v354_v30 = vsub.f32 %v770_v21, %v349_v20 }
  0x15   : > { %v355_v31 = vsub.f32 %v771_v22, %v349_v20  ;;  %v352_v33 = vsub.f32 %v766_v23, %v349_v20  ;;  %v353_v34 = vsub.f32 %v767_v24, %v349_v20  ;;  %v356_v35 = vsub.f32 %v774_v25, %v349_v20 }
  0x16   : > { %792 = vmatpush3.bf16.msra.mxu0 %v837_v2  ;;  %809 = vmatpush3.bf16.msra.mxu1 %v837_v2  ;;  %v342_v8 = vsub.f32 %v337_v4, %v340_v7  ;;  %v357_v36 = vsub.f32 %v775_v26, %v349_v20 }
  0x17   : > { %793 = vmatprep.subr.bf16.mxu0 %v838_v5  ;;  %806 = vmatprep.subr.bf16.mxu1 %v838_v5 }
  0x18   : > { %v343_v9 = vmax.f32 %v342_v8, 0.0 }
  0x1a   : > { %794 = vmatpush3.bf16.msra.mxu0 %v838_v5  ;;  %810 = vmatpush3.bf16.msra.mxu1 %v838_v5  ;;  %v344_v11 = vadd.f32 1e-05, %v343_v9 }
  0x1c   : > { %839 = vrsqrt.f32 %v344_v11 }
  0x29   : > { %v840_v32 = vpop.eup %839 }
  0x2a   : > { %v361_v37 = vrot.slane %v840_v32, %v360_v27 }
  0x2c   : > { %v362_v38 = vmul.f32 %v361_v37, %v350_v28  ;;  %v363_v39 = vmul.f32 %v361_v37, %v351_v29  ;;  %v366_v40 = vmul.f32 %v361_v37, %v354_v30  ;;  %v367_v41 = vmul.f32 %v361_v37, %v355_v31 }
  0x2d   : > { %v364_v42 = vmul.f32 %v361_v37, %v352_v33  ;;  %v365_v43 = vmul.f32 %v361_v37, %v353_v34  ;;  %v368_v44 = vmul.f32 %v361_v37, %v356_v35  ;;  %v369_v45 = vmul.f32 %v361_v37, %v357_v36 }
  0x2e   : > { %vm370_vm2 = vcmp.gt.f32.partialorder %v362_v38, 0.0  ;;  %vm371_vm3 = vcmp.gt.f32.partialorder %v363_v39, 0.0  ;;  %v378_v46 = vmul.f32 0.2, %v362_v38  ;;  %v379_v47 = vmul.f32 0.2, %v363_v39 }
  0x2f   : > { %vm374_vm4 = vcmp.gt.f32.partialorder %v366_v40, 0.0  ;;  %vm375_vm5 = vcmp.gt.f32.partialorder %v367_v41, 0.0  ;;  %v382_v48 = vmul.f32 0.2, %v366_v40  ;;  %v383_v49 = vmul.f32 0.2, %v367_v41 }
  0x30   : > { %v386_v50 = vsel %vm370_vm2, %v362_v38, %v378_v46  ;;  %v387_v51 = vsel %vm371_vm3, %v363_v39, %v379_v47  ;;  %vm372_vm6 = vcmp.gt.f32.partialorder %v364_v42, 0.0  ;;  %vm373_vm7 = vcmp.gt.f32.partialorder %v365_v43, 0.0 }
  0x31   : > { %v394_v52 = vpack.c.bf16 %v387_v51, %v386_v50  ;;  %v752_v53 = vpack.c.bf16 %v386_v50, %v386_v50  ;;  %v753_v54 = vpack.c.bf16 %v387_v51, %v387_v51  ;;  %v390_v55 = vsel %vm374_vm4, %v366_v40, %v382_v48 }
  0x32   : > { %v391_v56 = vsel %vm375_vm5, %v367_v41, %v383_v49  ;;  %v756_v57 = vpack.c.bf16 %v390_v55, %v390_v55  ;;  %v380_v58 = vmul.f32 0.2, %v364_v42  ;;  %v381_v59 = vmul.f32 0.2, %v365_v43 }
  0x33   : > { %427 = vst.msk [vmem:[%s942_s15] sm:$0xf] %vm426_vm0, %v752_v53  ;;  %428 = vst.msk [vmem:[%s942_s15 + $0x4] sm:$0xf] %vm426_vm0, %v753_v54  ;;  %795 = vmatprep.mubr.msk.bf16.mxu0 %vm474_vm1, %v394_v52  ;;  %v396_v60 = vpack.c.bf16 %v391_v56, %v390_v55  ;;  %v757_v61 = vpack.c.bf16 %v391_v56, %v391_v56  ;;  %vm376_vm8 = vcmp.gt.f32.partialorder %v368_v44, 0.0  ;;  %vm377_vm9 = vcmp.gt.f32.partialorder %v369_v45, 0.0 }
  0x34   : > { %431 = vst.msk [vmem:[%s942_s15 + $0x10] sm:$0xf] %vm426_vm0, %v756_v57  ;;  %v388_v62 = vsel %vm372_vm6, %v364_v42, %v380_v58  ;;  %v389_v63 = vsel %vm373_vm7, %v365_v43, %v381_v59  ;;  %v384_v0 = vmul.f32 0.2, %v368_v44  ;;  %v385_v1 = vmul.f32 0.2, %v369_v45 }
  0x35   : > { %432 = vst.msk [vmem:[%s942_s15 + $0x14] sm:$0xf] %vm426_vm0, %v757_v61  ;;  %799 = vmatprep.mubr.msk.bf16.mxu1 %vm474_vm1, %v396_v60  ;;  %v395_v2 = vpack.c.bf16 %v389_v63, %v388_v62  ;;  %v754_v3 = vpack.c.bf16 %v388_v62, %v388_v62  ;;  %v755_v4 = vpack.c.bf16 %v389_v63, %v389_v63 }
  0x36   : > { %v392_v5 = vsel %vm376_vm8, %v368_v44, %v384_v0  ;;  %v393_v6 = vsel %vm377_vm9, %v369_v45, %v385_v1 }
  0x37   : > { %429 = vst.msk [vmem:[%s942_s15 + $0x8] sm:$0xf] %vm426_vm0, %v754_v3  ;;  %430 = vst.msk [vmem:[%s942_s15 + $0xc] sm:$0xf] %vm426_vm0, %v755_v4  ;;  %796 = vmatmul.mubr.msk.bf16.vlgmr.msra.gmra.mxu0 %vm474_vm1, %v395_v2  ;;  %v397_v7 = vpack.c.bf16 %v393_v6, %v392_v5  ;;  %v758_v8 = vpack.c.bf16 %v392_v5, %v392_v5  ;;  %v759_v9 = vpack.c.bf16 %v393_v6, %v393_v6 }
  0x39   : > { %433 = vst.msk [vmem:[%s942_s15 + $0x18] sm:$0xf] %vm426_vm0, %v758_v8  ;;  %434 = vst.msk [vmem:[%s942_s15 + $0x1c] sm:$0xf] %vm426_vm0, %v759_v9  ;;  %800 = vmatmul.mubr.msk.bf16.vlgmr.msra.gmra.mxu1 %vm474_vm1, %v397_v7 }
  0xf7   : > { %v797_v11 = vpop.f32.mrf.mxu0 }
  0xf8   : > { %v530_v12 = vadd.f32 %v797_v11, %v738_v10 }
  0xf9   : > { %v801_v13 = vpop.f32.mrf.mxu1  ;;  %v521_v14 = vpop.f32.mrf.mxu0 }
  0xfa   : > { %554 = vst [vmem:[%s317_s26 + $0x10] sm:$0xff] %v530_v12  ;;  %v546_v15 = vadd.f32 %v801_v13, %v738_v10  ;;  %v522_v16 = vadd.f32 %v738_v10, %v521_v14 }
  0xfb   : > { %v537_v17 = vpop.f32.mrf.mxu1  ;;  %v798_v18 = vpop.f32.mrf.mxu0 }
  0xfc   : > { %558 = vst [vmem:[%s317_s26 + $0x30] sm:$0xff] %v546_v15  ;;  %552 = vst [vmem:[%s317_s26] sm:$0xff] %v522_v16  ;;  %v538_v19 = vadd.f32 %v738_v10, %v537_v17  ;;  %v533_v20 = vadd.f32 %v798_v18, %v738_v10 }
  0xfd   : > { %v802_v21 = vpop.f32.mrf.mxu1  ;;  %v524_v22 = vpop.f32.mrf.mxu0 }
  0xfe   : > { %556 = vst [vmem:[%s317_s26 + $0x20] sm:$0xff] %v538_v19  ;;  %555 = vst [vmem:[%s317_s26 + $0x18] sm:$0xff] %v533_v20  ;;  %v549_v23 = vadd.f32 %v802_v21, %v738_v10  ;;  %v525_v24 = vadd.f32 %v738_v10, %v524_v22 }
  0xff   : > { %v540_v25 = vpop.f32.mrf.mxu1 }
 0x100   : > { %559 = vst [vmem:[%s317_s26 + $0x38] sm:$0xff] %v549_v23  ;;  %553 = vst [vmem:[%s317_s26 + $0x8] sm:$0xff] %v525_v24  ;;  %v541_v26 = vadd.f32 %v738_v10, %v540_v25 }
 0x102   : > { %557 = vst [vmem:[%s317_s26 + $0x28] sm:$0xff] %v541_v26 }
 0x103 PF: > { %s16_s20 = sadd.s32 1, %s863_s20   ;;  %s989_s18 = smov %s859_s19 }
 0x104   : > { %p13_p5 = scmp.ge.s32.totalorder %s16_s20, 4   ;;  %s990_s19 = smov %s992_s21 }
 0x106   :  { %15 = sbr.rel (!%p13_p5) target bundleno = 2 (0x2), region = 84 }

// kernel: teethgnn_forward.14
= control target key start
LH: loop header
LB: loop body
LE: loop exit
PB: predicated region body
PF: predicated region fallthrough
CT: control target
= control target key end

     0   :  { %s1222_s21 = smov 0   ;;  %s1224_s22 = smov 0   ;;  %s1416_s0 = inlined_call_operand.vmem [shape: bf16[2,64,256], index: 0, kind: input, shape index: {}]   ;;  %s1417_s1 = inlined_call_operand.vmem [shape: f32[2,2,256], index: 1, kind: input, shape index: {}]   ;;  %s1418_s2 = inlined_call_operand.vmem [shape: f32[2,1,256], index: 2, kind: input, shape index: {}]   ;;  %s1419_s3 = inlined_call_operand.vmem [shape: bf16[256,128], index: 3, kind: input, shape index: {}]   ;;  %s1420_s4 = inlined_call_operand.vmem [shape: f32[2,1,128], index: 4, kind: input, shape index: {}]   ;;  %s1421_s5 = inlined_call_operand.vmem [shape: bf16[2,64,128], index: 5, kind: output, shape index: {0}]   ;;  %s1422_s6 = inlined_call_operand.vmem [shape: f32[2,2,128], index: 6, kind: output, shape index: {1}]  }
   0x1   :  { %s1226_s23 = smov 0  }
   0x2 LB: > { %s29_s24 = sadd.s32 1, %s1180_s22  ;;  %p993_p0 = scmp.ge.s32.totalorder %s1184_s23, 1  ;;  %s1184_s23 = sphi %s1226_s23, %s17_s23   ;;  %s1180_s22 = sphi %s1224_s22, %s1424_s22   ;;  %s1176_s21 = sphi %s1222_s21, %s1423_s21  }
   0x3   : > { %p31_p1 = scmp.ge.s32.totalorder %s29_s24, 2  ;;  %p264_p2 = scmp.lt.s32.totalorder %s1184_s23, 3 }
   0x5   : > { %s1426_s24 = smov (%p31_p1, %s29_s24), 0  ;;  %p265_p3 = pnand %p993_p0, %p264_p2 }
   0x6   : > { %p320_p4 = scmp.lt.s32.totalorder (!%p265_p3), %s1176_s21, 1 }
   0x7   : > { %268 = sbr.rel (%p265_p3) target bundleno = 301 (0x12d), region = 40 }
   0xc   : > { %v1144_v0 = vld [vmem:[%s1419_s3 + $0x78] sm:$0xff]   ;;  %v1146_v2 = vld [vmem:[%s1419_s3 + $0x70] sm:$0xff]   ;;  %v1148_v4 = vld [vmem:[%s1419_s3 + $0x68] sm:$0xff]   ;;  %s1428_s21 = smov (!%p320_p4, %s1176_s21), 1  ;;  %v388_v15 = vlaneseq }
   0xd   : > { %v1145_v1 = vld [vmem:[%s1419_s3 + $0x38] sm:$0xff]   ;;  %1063 = vmatprep.subr.bf16.mxu0 %v1144_v0  ;;  %1103 = vmatprep.subr.bf16.mxu1 %v1144_v0  ;;  %v1147_v3 = vld [vmem:[%s1419_s3 + $0x30] sm:$0xff]   ;;  %v1149_v5 = vld [vmem:[%s1419_s3 + $0x28] sm:$0xff]   ;;  %s1030_s17 = sshll.u32 %s1428_s21, 2  ;;  %s1029_s13 = sshll.u32 %s1428_s21, 6 }
   0xe   : > { %1064 = vmatpush3.bf16.msra.mxu0 %v1145_v1  ;;  %1111 = vmatpush3.bf16.msra.mxu1 %v1145_v1  ;;  %v1150_v6 = vld [vmem:[%s1419_s3 + $0x60] sm:$0xff]   ;;  %v1152_v8 = vld [vmem:[%s1419_s3 + $0x58] sm:$0xff]   ;;  %s334_s26 = scalar_lea.vmem %s1417_s1, %s1030_s17  ;;  %v1154_v10 = vld [vmem:[%s1419_s3 + $0x50] sm:$0xff]   ;;  %s998_s14 = sshll.u32 %s1428_s21, 1  ;;  %v1297_v20 = vshrl.u32 %v388_v15, 7 }
   0xf   : > { %1065 = vmatprep.subr.bf16.mxu0 %v1146_v2  ;;  %1104 = vmatprep.subr.bf16.mxu1 %v1146_v2  ;;  %v1151_v7 = vld [vmem:[%s1419_s3 + $0x20] sm:$0xff]   ;;  %v1153_v9 = vld [vmem:[%s1419_s3 + $0x18] sm:$0xff]   ;;  %v1155_v13 = vld [vmem:[%s1419_s3 + $0x10] sm:$0xff]   ;;  %s1303_s19 = scalar_lea.vmem %s1416_s0, %s1029_s13  ;;  %s341_s7 = scalar_lea.vmem %s1420_s4, %s1428_s21 }
  0x10   : > { %v414_v11 = vld [vmem:[%s334_s26] sm:$0xf]  ;;  %v1156_v14 = vld [vmem:[%s1419_s3 + $0x48] sm:$0xff]   ;;  %s338_s26 = scalar_lea.vmem %s1418_s2, %s998_s14  ;;  %v1314_v24 = vsub.s32 1, %v1297_v20  ;;  %v390_v28 = vsub.s32 0, %v1297_v20  ;;  %v431_v29 = vsub.s32 2, %v1297_v20  ;;  %s355_s15 = scalar_lea.vmem %s1422_s6, %s998_s14 }
  0x11   : > { %v1279_v12 = vmul.f32 0.015625, %v414_v11  ;;  %v1157_v18 = vld [vmem:[%s1419_s3 + $0x8] sm:$0xff]   ;;  %v1158_v19 = vld [vmem:[%s1419_s3 + $0x40] sm:$0xff]   ;;  %v364_v39 = vld [vmem:[%s1303_s19 + $0x10] sm:$0xff]  ;;  %v466_v43 = vsub.s32 3, %v1297_v20  ;;  %s1031_s8 = sshll.u32 %s1428_s21, 5 }
  0x12   : > { %1066 = vmatpush3.bf16.msra.mxu0 %v1147_v3  ;;  %1112 = vmatpush3.bf16.msra.mxu1 %v1147_v3  ;;  %v1159_v23 = vld [vmem:[%s1419_s3] sm:$0xff]   ;;  %v363_v30 = vld [vmem:[%s1303_s19 + $0x8] sm:$0xff]  ;;  %v365_v42 = vld [vmem:[%s1303_s19 + $0x18] sm:$0xff]  ;;  %v375_v49 = vunpack.c.h.bf16 %v364_v39  ;;  %v374_v58 = vunpack.c.l.bf16 %v364_v39  ;;  %s1396_s11 = scalar_lea.vmem %s1421_s5, %s1031_s8 }
  0x13   : > { %1067 = vmatprep.subr.bf16.mxu0 %v1148_v4  ;;  %1105 = vmatprep.subr.bf16.mxu1 %v1148_v4  ;;  %v416_v16 = vmul.f32 %v1279_v12, %v1279_v12  ;;  %v362_v26 = vld [vmem:[%s1303_s19] sm:$0xff]  ;;  %v373_v35 = vunpack.c.h.bf16 %v363_v30  ;;  %v432_v37 = vrot.slane %v1279_v12, %v431_v29  ;;  %v367_v38 = vld [vmem:[%s1303_s19 + $0x28] sm:$0xff]  ;;  %v372_v40 = vunpack.c.l.bf16 %v363_v30  ;;  %v368_v50 = vld [vmem:[%s1303_s19 + $0x30] sm:$0xff] }
  0x14   : > { %v386_v27 = vld [vmem:[%s338_s26] sm:$0x3]  ;;  %v371_v31 = vunpack.c.h.bf16 %v362_v26  ;;  %v370_v34 = vunpack.c.l.bf16 %v362_v26  ;;  %v428_v41 = vrot.slane %v1279_v12, %v390_v28  ;;  %v380_v47 = vunpack.c.l.bf16 %v367_v38  ;;  %v369_v51 = vld [vmem:[%s1303_s19 + $0x38] sm:$0xff] }
  0x15   : > { %v418_v17 = vrot.slane %v416_v16, 7  ;;  %v395_v32 = vrot.slane %v386_v27, %v1314_v24  ;;  %v366_v33 = vld [vmem:[%s1303_s19 + $0x20] sm:$0xff]  ;;  %v391_v36 = vrot.slane %v386_v27, %v390_v28  ;;  %v381_v48 = vunpack.c.h.bf16 %v367_v38 }
  0x16   : > { %1068 = vmatpush3.bf16.msra.mxu0 %v1149_v5  ;;  %1113 = vmatpush3.bf16.msra.mxu1 %v1149_v5  ;;  %v378_v44 = vunpack.c.l.bf16 %v366_v33  ;;  %v379_v45 = vunpack.c.h.bf16 %v366_v33  ;;  %v1330_v53 = vrot.slane %v432_v37, %v390_v28  ;;  %v377_v55 = vunpack.c.h.bf16 %v365_v42 }
  0x17   : > { %1069 = vmatprep.subr.bf16.mxu0 %v1150_v6  ;;  %1106 = vmatprep.subr.bf16.mxu1 %v1150_v6  ;;  %v420_v21 = vsub.f32 %v1279_v12, %v418_v17  ;;  %v399_v46 = vadd.f32 %v395_v32, %v371_v31  ;;  %v401_v52 = vadd.f32 %v395_v32, %v373_v35  ;;  %v376_v59 = vunpack.c.l.bf16 %v365_v42 }
  0x18   : > { %v398_v54 = vadd.f32 %v391_v36, %v370_v34  ;;  %v400_v56 = vadd.f32 %v391_v36, %v372_v40  ;;  %v1332_v57 = vrot.slane %v428_v41, %v390_v28  ;;  %v383_v60 = vunpack.c.h.bf16 %v368_v50 }
  0x19   : > { %v421_v22 = vmax.f32 %v420_v21, 0.0  ;;  %v385_v61 = vunpack.c.h.bf16 %v369_v51  ;;  %v382_v62 = vunpack.c.l.bf16 %v368_v50  ;;  %v384_v63 = vunpack.c.l.bf16 %v369_v51 }
  0x1a   : > { %1070 = vmatpush3.bf16.msra.mxu0 %v1151_v7  ;;  %1114 = vmatpush3.bf16.msra.mxu1 %v1151_v7  ;;  %v407_v0 = vadd.f32 %v395_v32, %v379_v45  ;;  %v409_v1 = vadd.f32 %v395_v32, %v381_v48  ;;  %v406_v2 = vadd.f32 %v391_v36, %v378_v44 }
  0x1b   : > { %1071 = vmatprep.subr.bf16.mxu0 %v1152_v8  ;;  %1107 = vmatprep.subr.bf16.mxu1 %v1152_v8  ;;  %v422_v25 = vadd.f32 1e-05, %v421_v22  ;;  %v408_v3 = vadd.f32 %v391_v36, %v380_v47  ;;  %v444_v4 = vsub.f32 %v399_v46, %v1330_v53  ;;  %v446_v5 = vsub.f32 %v401_v52, %v1330_v53 }
  0x1c   : > { %v403_v6 = vadd.f32 %v395_v32, %v375_v49  ;;  %v405_v7 = vadd.f32 %v395_v32, %v377_v55  ;;  %v443_v8 = vsub.f32 %v398_v54, %v1332_v57  ;;  %v404_v11 = vadd.f32 %v391_v36, %v376_v59 }
  0x1d   : > { %1160 = vrsqrt.f32 %v422_v25  ;;  %v1342_v15 = vadd.f32 %v391_v36, %v382_v62  ;;  %v1344_v16 = vadd.f32 %v391_v36, %v384_v63  ;;  %v454_v20 = vsub.f32 %v409_v1, %v1330_v53 }
  0x1e   : > { %1072 = vmatpush3.bf16.msra.mxu0 %v1153_v9  ;;  %1115 = vmatpush3.bf16.msra.mxu1 %v1153_v9  ;;  %v445_v9 = vsub.f32 %v400_v56, %v1332_v57  ;;  %v451_v21 = vsub.f32 %v406_v2, %v1332_v57  ;;  %v453_v22 = vsub.f32 %v408_v3, %v1332_v57 }
  0x1f   : > { %1073 = vmatprep.subr.bf16.mxu0 %v1154_v10  ;;  %1108 = vmatprep.subr.bf16.mxu1 %v1154_v10  ;;  %v402_v10 = vadd.f32 %v391_v36, %v374_v58  ;;  %v450_v25 = vsub.f32 %v405_v7, %v1330_v53  ;;  %v449_v29 = vsub.f32 %v404_v11, %v1332_v57 }
  0x20   : > { %v457_v33 = vsub.f32 %v1344_v16, %v1332_v57 }
  0x21   : > { %v447_v28 = vsub.f32 %v402_v10, %v1332_v57 }
  0x22   : > { %1074 = vmatpush3.bf16.msra.mxu0 %v1155_v13  ;;  %1116 = vmatpush3.bf16.msra.mxu1 %v1155_v13  ;;  %v1338_v13 = vadd.f32 %v395_v32, %v383_v60 }
  0x23   : > { %1075 = vmatprep.subr.bf16.mxu0 %v1156_v14  ;;  %1109 = vmatprep.subr.bf16.mxu1 %v1156_v14  ;;  %v1340_v14 = vadd.f32 %v395_v32, %v385_v61  ;;  %v455_v32 = vsub.f32 %v1342_v15, %v1332_v57 }
  0x24   : > { %v456_v30 = vsub.f32 %v1338_v13, %v1330_v53 }
  0x25   : > { %v458_v31 = vsub.f32 %v1340_v14, %v1330_v53 }
  0x26   : > { %1076 = vmatpush3.bf16.msra.mxu0 %v1157_v18  ;;  %1117 = vmatpush3.bf16.msra.mxu1 %v1157_v18 }
  0x27   : > { %1077 = vmatprep.subr.bf16.mxu0 %v1158_v19  ;;  %1110 = vmatprep.subr.bf16.mxu1 %v1158_v19  ;;  %v452_v19 = vsub.f32 %v407_v0, %v1330_v53 }
  0x2a   : > { %1078 = vmatpush3.bf16.msra.mxu0 %v1159_v23  ;;  %1118 = vmatpush3.bf16.msra.mxu1 %v1159_v23  ;;  %v1161_v12 = vpop.eup %1160  ;;  %v448_v23 = vsub.f32 %v403_v6, %v1330_v53 }
  0x2b   : > { %v467_v17 = vrot.slane %v1161_v12, %v466_v43  ;;  %v463_v18 = vrot.slane %v1161_v12, %v1314_v24 }
  0x2d   : > { %v1354_v26 = vrot.slane %v467_v17, %v1314_v24  ;;  %v1357_v27 = vrot.slane %v463_v18, %v1314_v24 }
  0x2f   : > { %v479_v34 = vmul.f32 %v1354_v26, %v444_v4  ;;  %v481_v24 = vmul.f32 %v1354_v26, %v446_v5  ;;  %v478_v35 = vmul.f32 %v1357_v27, %v443_v8  ;;  %v480_v36 = vmul.f32 %v1357_v27, %v445_v9 }
  0x30   : > { %v487_v37 = vmul.f32 %v1354_v26, %v452_v19  ;;  %v489_v38 = vmul.f32 %v1354_v26, %v454_v20  ;;  %v486_v39 = vmul.f32 %v1357_v27, %v451_v21  ;;  %v488_v40 = vmul.f32 %v1357_v27, %v453_v22 }
  0x31   : > { %vm495_vm0 = vcmp.gt.f32.partialorder %v479_v34, 0.0  ;;  %vm497_vm1 = vcmp.gt.f32.partialorder %v481_v24, 0.0  ;;  %v511_v41 = vmul.f32 0.2, %v479_v34  ;;  %v513_v42 = vmul.f32 0.2, %v481_v24 }
  0x32   : > { %vm494_vm2 = vcmp.gt.f32.partialorder %v478_v35, 0.0  ;;  %vm496_vm3 = vcmp.gt.f32.partialorder %v480_v36, 0.0  ;;  %v510_v43 = vmul.f32 0.2, %v478_v35  ;;  %v512_v44 = vmul.f32 0.2, %v480_v36 }
  0x33   : > { %v527_v45 = vsel %vm495_vm0, %v479_v34, %v511_v41  ;;  %v529_v46 = vsel %vm497_vm1, %v481_v24, %v513_v42  ;;  %vm503_vm4 = vcmp.gt.f32.partialorder %v487_v37, 0.0  ;;  %vm505_vm5 = vcmp.gt.f32.partialorder %v489_v38, 0.0 }
  0x34   : > { %v543_v47 = vpack.c.bf16 %v529_v46, %v527_v45  ;;  %v526_v48 = vsel %vm494_vm2, %v478_v35, %v510_v43  ;;  %v528_v49 = vsel %vm496_vm3, %v480_v36, %v512_v44  ;;  %v519_v50 = vmul.f32 0.2, %v487_v37 }
  0x35   : > { %v542_v51 = vpack.c.bf16 %v528_v49, %v526_v48  ;;  %v521_v52 = vmul.f32 0.2, %v489_v38  ;;  %vm502_vm6 = vcmp.gt.f32.partialorder %v486_v39, 0.0  ;;  %vm504_vm7 = vcmp.gt.f32.partialorder %v488_v40, 0.0 }
  0x36   : > { %717 = vmatprep.mubr.bf16.mxu0 %v543_v47  ;;  %v535_v53 = vsel %vm503_vm4, %v487_v37, %v519_v50  ;;  %v518_v54 = vmul.f32 0.2, %v486_v39  ;;  %v520_v55 = vmul.f32 0.2, %v488_v40  ;;  %v483_v56 = vmul.f32 %v1354_v26, %v448_v23 }
  0x37   : > { %718 = vmatmul.mubr.bf16.vlgmr.msra.gmra.mxu0 %v542_v51  ;;  %v537_v58 = vsel %vm505_vm5, %v489_v38, %v521_v52  ;;  %v485_v59 = vmul.f32 %v1354_v26, %v450_v25  ;;  %v482_v60 = vmul.f32 %v1357_v27, %v447_v28  ;;  %v484_v61 = vmul.f32 %v1357_v27, %v449_v29 }
  0x38   : > { %v547_v62 = vpack.c.bf16 %v537_v58, %v535_v53  ;;  %v534_v63 = vsel %vm502_vm6, %v486_v39, %v518_v54  ;;  %v536_v0 = vsel %vm504_vm7, %v488_v40, %v520_v55  ;;  %vm499_vm8 = vcmp.gt.f32.partialorder %v483_v56, 0.0 }
  0x39   : > { %v546_v1 = vpack.c.bf16 %v536_v0, %v534_v63  ;;  %vm501_vm9 = vcmp.gt.f32.partialorder %v485_v59, 0.0  ;;  %v515_v2 = vmul.f32 0.2, %v483_v56  ;;  %v517_v3 = vmul.f32 0.2, %v485_v59 }
  0x3a   : > { %733 = vmatprep.mubr.bf16.mxu1 %v547_v62  ;;  %vm498_vm10 = vcmp.gt.f32.partialorder %v482_v60, 0.0  ;;  %vm500_vm11 = vcmp.gt.f32.partialorder %v484_v61, 0.0  ;;  %v514_v4 = vmul.f32 0.2, %v482_v60  ;;  %v516_v5 = vmul.f32 0.2, %v484_v61 }
  0x3b   : > { %734 = vmatmul.mubr.bf16.vlgmr.msra.gmra.mxu1 %v546_v1  ;;  %v531_v6 = vsel %vm499_vm8, %v483_v56, %v515_v2  ;;  %v533_v7 = vsel %vm501_vm9, %v485_v59, %v517_v3  ;;  %v491_v8 = vmul.f32 %v1354_v26, %v456_v30  ;;  %v493_v9 = vmul.f32 %v1354_v26, %v458_v31 }
  0x3c   : > { %v545_v10 = vpack.c.bf16 %v533_v7, %v531_v6  ;;  %v530_v11 = vsel %vm498_vm10, %v482_v60, %v514_v4  ;;  %v532_v12 = vsel %vm500_vm11, %v484_v61, %v516_v5  ;;  %v490_v13 = vmul.f32 %v1357_v27, %v455_v32  ;;  %v1002_v32 = vld [vmem:[%s341_s7] ss:$0 sm:$0xff] }
  0x3d   : > { %v544_v14 = vpack.c.bf16 %v532_v12, %v530_v11  ;;  %vm507_vm12 = vcmp.gt.f32.partialorder %v491_v8, 0.0  ;;  %vm509_vm13 = vcmp.gt.f32.partialorder %v493_v9, 0.0  ;;  %v523_v15 = vmul.f32 0.2, %v491_v8 }
  0x3e   : > { %725 = vmatprep.mubr.bf16.mxu0 %v545_v10  ;;  %v525_v17 = vmul.f32 0.2, %v493_v9  ;;  %v492_v18 = vmul.f32 %v1357_v27, %v457_v33  ;;  %vm506_vm14 = vcmp.gt.f32.partialorder %v490_v13, 0.0  ;;  %v522_v19 = vmul.f32 0.2, %v490_v13 }
  0x3f   : > { %726 = vmatmul.mubr.bf16.gmra.mxu0 %v544_v14  ;;  %v539_v20 = vsel %vm507_vm12, %v491_v8, %v523_v15  ;;  %v1186_v29 = vmov 0.0  }
  0x40   : > { %v541_v21 = vsel %vm509_vm13, %v493_v9, %v525_v17  ;;  %vm508_vm15 = vcmp.gt.f32.partialorder %v492_v18, 0.0  ;;  %v524_v22 = vmul.f32 0.2, %v492_v18  ;;  %v538_v23 = vsel %vm506_vm14, %v490_v13, %v522_v19  ;;  %361 = vst [vmem:[#allocation2] sm:$0x3] %v1186_v29 }
  0x41   : > { %v549_v25 = vpack.c.bf16 %v541_v21, %v539_v20 }
  0x42   : > { %v540_v26 = vsel %vm508_vm15, %v492_v18, %v524_v22 }
  0x43   : > { %741 = vmatprep.mubr.bf16.mxu1 %v549_v25  ;;  %v548_v28 = vpack.c.bf16 %v540_v26, %v538_v23 }
  0x45   : > { %742 = vmatmul.mubr.bf16.gmra.mxu1 %v548_v28 }
  0xf7   : > { %v1079_v57 = vpop.f32.mrf.mxu0 }
  0xf9   : > { %v1080_v16 = vpop.f32.mrf.mxu0 }
  0xfa   : > { %v1081_v31 = vadd.f32 %v1080_v16, %v1079_v57 }
  0xfb   : > { %v1091_v27 = vpop.f32.mrf.mxu1  ;;  %v1082_v30 = vpop.f32.mrf.mxu0 }
  0xfc   : > { %v720_v38 = vadd.f32 %v1081_v31, %v1002_v32  ;;  %v790_v31 = vld [vmem:[#allocation2] sm:$0x1] }
  0xfd   : > { %v1092_v33 = vpop.f32.mrf.mxu1  ;;  %v1083_v34 = vpop.f32.mrf.mxu0 }
  0xfe   : > { %v1084_v24 = vadd.f32 %v1083_v34, %v1082_v30  ;;  %v1093_v35 = vadd.f32 %v1092_v33, %v1091_v27  ;;  %v807_v52 = vmul.f32 %v720_v38, %v720_v38  ;;  %v806_v34 = vld [vmem:[#allocation2 + $0x1] sm:$0x1] }
  0xff   : > { %v1094_v36 = vpop.f32.mrf.mxu1  ;;  %v1085_v37 = vpop.f32.mrf.mxu0 }
 0x100   : > { %v723_v39 = vadd.f32 %v1084_v24, %v1002_v32  ;;  %v736_v43 = vadd.f32 %v1093_v35, %v1002_v32 }
 0x101   : > { %v1095_v40 = vpop.f32.mrf.mxu1  ;;  %v1086_v41 = vpop.f32.mrf.mxu0 }
 0x102   : > { %v1043_v42 = vpack.c.bf16 %v723_v39, %v720_v38  ;;  %v1096_v44 = vadd.f32 %v1095_v40, %v1094_v36  ;;  %v1087_v45 = vadd.f32 %v1086_v41, %v1085_v37  ;;  %v808_v47 = vmul.f32 %v723_v39, %v723_v39 }
 0x103   : > { %v1088_v46 = vpop.f32.mrf.mxu0  ;;  %v791_v53 = vadd.f32 %v723_v39, %v720_v38  ;;  %v811_v4 = vmul.f32 %v736_v43, %v736_v43 }
 0x104   : > { %1044 = vst [vmem:[%s1396_s11] sm:$0xff] %v1043_v42   ;;  %v739_v48 = vadd.f32 %v1096_v44, %v1002_v32  ;;  %v728_v49 = vadd.f32 %v1087_v45, %v1002_v32  ;;  %v815_v59 = vadd.f32 %v808_v47, %v807_v52 }
 0x105   : > { %v1097_v50 = vpop.f32.mrf.mxu1  ;;  %v1089_v51 = vpop.f32.mrf.mxu0 }
 0x106   : > { %v1090_v54 = vadd.f32 %v1089_v51, %v1088_v46  ;;  %v1053_v55 = vpack.c.bf16 %v739_v48, %v736_v43  ;;  %v809_v56 = vmul.f32 %v728_v49, %v728_v49  ;;  %v792_v60 = vadd.f32 %v791_v53, %v728_v49 }
 0x107   : > { %v1098_v58 = vpop.f32.mrf.mxu1  ;;  %v812_v10 = vmul.f32 %v739_v48, %v739_v48 }
 0x108   : > { %v1099_v61 = vadd.f32 %v1098_v58, %v1097_v50  ;;  %v731_v62 = vadd.f32 %v1090_v54, %v1002_v32  ;;  %1061 = vst [vmem:[%s1396_s11 + $0x10] sm:$0xff] %v1053_v55   ;;  %v816_v0 = vadd.f32 %v815_v59, %v809_v56 }
 0x109   : > { %v1100_v63 = vpop.f32.mrf.mxu1 }
 0x10a   : > { %v1048_v1 = vpack.c.bf16 %v731_v62, %v728_v49  ;;  %v793_v2 = vadd.f32 %v792_v60, %v731_v62  ;;  %v810_v3 = vmul.f32 %v731_v62, %v731_v62  ;;  %v744_v6 = vadd.f32 %v1099_v61, %v1002_v32 }
 0x10b   : > { %v1101_v5 = vpop.f32.mrf.mxu1 }
 0x10c   : > { %1060 = vst [vmem:[%s1396_s11 + $0x8] sm:$0xff] %v1048_v1   ;;  %v794_v7 = vadd.f32 %v793_v2, %v736_v43  ;;  %v817_v8 = vadd.f32 %v816_v0, %v810_v3  ;;  %v1102_v9 = vadd.f32 %v1101_v5, %v1100_v63  ;;  %v813_v14 = vmul.f32 %v744_v6, %v744_v6 }
 0x10e   : > { %v818_v11 = vadd.f32 %v817_v8, %v811_v4  ;;  %v747_v12 = vadd.f32 %v1102_v9, %v1002_v32  ;;  %v795_v13 = vadd.f32 %v794_v7, %v739_v48 }
 0x110   : > { %v1058_v15 = vpack.c.bf16 %v747_v12, %v744_v6  ;;  %v796_v17 = vadd.f32 %v795_v13, %v744_v6  ;;  %v819_v18 = vadd.f32 %v818_v11, %v812_v10  ;;  %v814_v20 = vmul.f32 %v747_v12, %v747_v12 }
 0x112   : > { %1062 = vst [vmem:[%s1396_s11 + $0x18] sm:$0xff] %v1058_v15   ;;  %v797_v19 = vadd.f32 %v796_v17, %v747_v12  ;;  %v820_v21 = vadd.f32 %v819_v18, %v813_v14 }
 0x114   : > { %v798_v22 = vrot.slane %v797_v19, 4  ;;  %v821_v23 = vadd.f32 %v820_v21, %v814_v20 }
 0x116   : > { %v799_v25 = vadd.f32 %v798_v22, %v797_v19  ;;  %v822_v26 = vrot.slane %v821_v23, 4 }
 0x118   : > { %v800_v28 = vrot.slane %v799_v25, 2  ;;  %v823_v29 = vadd.f32 %v822_v26, %v821_v23 }
 0x11a   : > { %v801_v57 = vadd.f32 %v800_v28, %v799_v25  ;;  %v824_v16 = vrot.slane %v823_v29, 2 }
 0x11c   : > { %v802_v27 = vrot.slane %v801_v57, 1  ;;  %v825_v30 = vadd.f32 %v824_v16, %v823_v29 }
 0x11e   : > { %v803_v32 = vadd.f32 %v802_v27, %v801_v57  ;;  %v826_v33 = vrot.slane %v825_v30, 1 }
 0x120   : > { %v804_v24 = vadd.f32 %v803_v32, %v790_v31  ;;  %v827_v35 = vadd.f32 %v826_v33, %v825_v30 }
 0x122   : > { %805 = vst [vmem:[#allocation2] sm:$0x1] %v804_v24  ;;  %v828_v36 = vadd.f32 %v827_v35, %v806_v34 }
 0x124   : > { %829 = vst [vmem:[#allocation2 + $0x1] sm:$0x1] %v828_v36 }
 0x12b   : > { %v833_v37 = vld [vmem:[#allocation2] sm:$0x3] }
 0x12c   : > { %834 = vst [vmem:[%s355_s15] sm:$0x3] %v833_v37 }
 0x12d PF: > { %s17_s23 = sadd.s32 1, %s1184_s23   ;;  %s1423_s21 = smov %s1180_s22 }
 0x12e   : > { %p14_p5 = scmp.ge.s32.totalorder %s17_s23, 4   ;;  %s1424_s22 = smov %s1426_s24 }
 0x130   :  { %16 = sbr.rel (!%p14_p5) target bundleno = 2 (0x2), region = 99 }

// kernel: teethgnn_forward.13
= control target key start
LH: loop header
LB: loop body
LE: loop exit
PB: predicated region body
PF: predicated region fallthrough
CT: control target
= control target key end

     0   :  { %s3332_s18 = smov 0   ;;  %s3334_s19 = smov 0   ;;  %s4076_s0 = inlined_call_operand.vmem [shape: bf16[2,64,64], index: 0, kind: input, shape index: {}]   ;;  %s4077_s1 = inlined_call_operand.vmem [shape: bf16[2,64,64], index: 1, kind: input, shape index: {}]   ;;  %s4078_s2 = inlined_call_operand.vmem [shape: bf16[2,64,64], index: 2, kind: input, shape index: {}]   ;;  %s4079_s3 = inlined_call_operand.vmem [shape: f32[2,2,64], index: 3, kind: input, shape index: {}]   ;;  %s4080_s4 = inlined_call_operand.vmem [shape: bf16[192,64], index: 4, kind: input, shape index: {}]   ;;  %s4081_s5 = inlined_call_operand.vmem [shape: bf16[192,256], index: 5, kind: input, shape index: {}]   ;;  %s4082_s6 = inlined_call_operand.vmem [shape: bf16[192,256], index: 6, kind: input, shape index: {}]   ;;  %s4083_s7 = inlined_call_operand.vmem [shape: f32[2,1,64], index: 7, kind: input, shape index: {}]   ;;  %s4084_s8 = inlined_call_operand.vmem [shape: f32[2,1,256], index: 8, kind: input, shape index: {}]   ;;  %s4085_s9 = inlined_call_operand.vmem [shape: f32[2,1,256], index: 9, kind: input, shape index: {}]   ;;  %s4086_s10 = inlined_call_operand.vmem [shape: f32[2,2,64], index: 10, kind: output, shape index: {0}]   ;;  %s4087_s11 = inlined_call_operand.vmem [shape: f32[2,1,64], index: 11, kind: output, shape index: {1}]   ;;  %s4088_s12 = inlined_call_operand.vmem [shape: bf16[2,64,256], index: 12, kind: output, shape index: {2}]   ;;  %s4089_s13 = inlined_call_operand.vmem [shape: f32[2,2,256], index: 13, kind: output, shape index: {3}]   ;;  %s4090_s14 = inlined_call_operand.vmem [shape: bf16[2,64,256], index: 14, kind: output, shape index: {4}]   ;;  %s4091_s15 = inlined_call_operand.vmem [shape: f32[2,2,256], index: 15, kind: output, shape index: {5}]  }
   0x1   :  { %4092 = sst [smem:[#allocation6_spill]] %s4076_s0  ;;  %s3336_s20 = smov 0  }
   0x2 LB: > { %s38_s21 = sadd.s32 1, %s3242_s19  ;;  %p2838_p0 = scmp.ge.s32.totalorder %s3246_s20, 1  ;;  %s3246_s20 = sphi %s3336_s20, %s26_s20   ;;  %s3242_s19 = sphi %s3334_s19, %s4097_s19   ;;  %s3238_s18 = sphi %s3332_s18, %s4096_s18  }
   0x3   : > { %p40_p1 = scmp.ge.s32.totalorder %s38_s21, 2  ;;  %p540_p2 = scmp.lt.s32.totalorder %s3246_s20, 3 }
   0x5   : > { %s4099_s21 = smov (%p40_p1, %s38_s21), 0  ;;  %p541_p3 = pnand %p2838_p0, %p540_p2 }
   0x6   : > { %p658_p4 = scmp.lt.s32.totalorder (!%p541_p3), %s3238_s18, 1  ;;  %s4093_s0 = sld [smem:[#allocation6_spill]] (!%p541_p3) }
   0x7   : > { %544 = sbr.rel (%p541_p3) target bundleno = 393 (0x189), region = 60 }
   0xc   : > { %v3130_v0 = vld [vmem:[%s4080_s4 + $0x18] sm:$0xff]   ;;  %v3132_v2 = vld [vmem:[%s4080_s4 + $0x10] sm:$0xff]   ;;  %s4101_s18 = smov (!%p658_p4, %s3238_s18), 1  ;;  %v3134_v4 = vld [vmem:[%s4080_s4 + $0x8] sm:$0xff]   ;;  %vm907_vm0 = vcmask 523264   ;;  %v3248_v30 = vmov 0   ;;  %v778_v39 = vlaneseq }
   0xd   : > { %v3131_v1 = vld [vmem:[%s4080_s4 + $0x38] sm:$0xff]   ;;  %3062 = vmatprep.subr.bf16.mxu1 %v3130_v0  ;;  %v3133_v3 = vld [vmem:[%s4080_s4 + $0x30] sm:$0xff]   ;;  %s3368_s17 = sshll.u32 %s4101_s18, 5  ;;  %v3135_v5 = vld [vmem:[%s4080_s4 + $0x28] sm:$0xff]   ;;  %s3433_s27 = sshll.u32 %s4101_s18, 1  ;;  %vm746_vm9 = vcmask 517120  }
   0xe   : > { %3063 = vmatpush3.bf16.msra.mxu1 %v3130_v0  ;;  %3046 = vmatprep.subr.bf16.mxu0 %v3131_v1  ;;  %s3377_s26 = scalar_lea.vmem %s4093_s0, %s3368_s17  ;;  %v3136_v6 = vld [vmem:[%s4080_s4] sm:$0xff]   ;;  %s3392_s23 = scalar_lea.vmem %s4077_s1, %s3368_s17  ;;  %v3142_v9 = vld [vmem:[%s4081_s5 + $0x74] ss:$8 sps:$4 sm:$0xff]   ;;  %v3140_v12 = vld [vmem:[%s4081_s5 + $0x70] ss:$8 sps:$4 sm:$0xff]   ;;  %v3501_v43 = vshrl.u32 %v778_v39, 7 }
   0xf   : > { %3047 = vmatpush3.bf16.msra.mxu0 %v3131_v1  ;;  %3064 = vmatprep.subr.bf16.mxu1 %v3132_v2  ;;  %v3383_v7 = vld [vmem:[%s3377_s26] sm:$0xff]   ;;  %v3400_v10 = vld [vmem:[%s3377_s26 + $0x8] sm:$0xff]   ;;  %v3417_v15 = vld [vmem:[%s3377_s26 + $0x10] sm:$0xff]   ;;  %s690_s30 = scalar_lea.vmem %s4079_s3, %s3433_s27  ;;  %vm748_vm10 = vcmask 516096   ;;  %s697_s25 = scalar_lea.vmem %s4084_s8, %s3433_s27  ;;  %vm3953_vm11 = vcmp.lt.s32.totalorder %v778_v39, 256 }
  0x10   : > { %3048 = vmatprep.subr.bf16.mxu0 %v3133_v3  ;;  %v3137_v8 = vld [vmem:[%s4080_s4 + $0x20] sm:$0xff]   ;;  %3070 = vmatprep.mubr.msk.bf16.mxu1 %vm907_vm0, %v3383_v7  ;;  %v3411_v13 = vld [vmem:[%s3392_s23 + $0x8] sm:$0xff]   ;;  %v3149_v16 = vld [vmem:[%s4080_s4 + $0x58] sm:$0xff]   ;;  %v3512_v47 = vsub.s32 0, %v3501_v43  ;;  %v3523_v62 = vsub.s32 1, %v3501_v43  ;;  %s2983_s28 = sshll.u32 %s4101_s18, 6  ;;  %s705_s0 = scalar_lea.vmem %s4086_s10, %s3433_s27 }
  0x11   : > { %v3403_v11 = vld [vmem:[%s3392_s23] sm:$0xff]   ;;  %v3430_v18 = vld [vmem:[%s3392_s23 + $0x10] sm:$0xff]   ;;  %v3438_v19 = vld [vmem:[%s3377_s26 + $0x18] sm:$0xff]   ;;  %s3827_s16 = scalar_lea.vmem %s4088_s12, %s2983_s28  ;;  %s3987_s24 = scalar_lea.vmem %s4090_s14, %s2983_s28 }
  0x12   : > { %3065 = vmatpush3.bf16.msra.mxu1 %v3132_v2  ;;  %3054 = vmatprep.mubr.msk.bf16.mxu0 %vm907_vm0, %v3403_v11  ;;  %v3147_v14 = vld [vmem:[%s4081_s5 + $0x64] ss:$8 sps:$4 sm:$0xff]   ;;  %v3145_v17 = vld [vmem:[%s4081_s5 + $0x60] ss:$8 sps:$4 sm:$0xff]   ;;  %v3153_v20 = vld [vmem:[%s4081_s5 + $0x54] ss:$8 sps:$4 sm:$0xff]  }
  0x13   : > { %3049 = vmatpush3.bf16.msra.mxu0 %v3133_v3  ;;  %3066 = vmatprep.subr.bf16.mxu1 %v3134_v4  ;;  %v3151_v21 = vld [vmem:[%s4081_s5 + $0x50] ss:$8 sps:$4 sm:$0xff]   ;;  %v3159_v24 = vld [vmem:[%s4081_s5 + $0x44] ss:$8 sps:$4 sm:$0xff]   ;;  %v768_v27 = vld [vmem:[%s690_s30] sm:$0x3]  ;;  %s685_s30 = scalar_lea.vmem %s4078_s2, %s3368_s17  ;;  %s693_s17 = scalar_lea.vmem %s4083_s7, %s4101_s18 }
  0x14   : > { %3050 = vmatprep.subr.bf16.mxu0 %v3135_v5  ;;  %v3156_v22 = vld [vmem:[%s4080_s4 + $0x50] sm:$0xff]   ;;  %v3452_v23 = vld [vmem:[%s3392_s23 + $0x18] sm:$0xff]   ;;  %v3160_v25 = vld [vmem:[%s4080_s4 + $0x48] sm:$0xff]   ;;  %v769_v29 = vmul.f32 0.001953125, %v768_v27  ;;  %s708_s23 = scalar_lea.vmem %s4087_s11, %s4101_s18 }
  0x15   : > { %v3161_v26 = vld [vmem:[%s4080_s4 + $0x40] sm:$0xff]   ;;  %v3164_v32 = vld [vmem:[%s4081_s5 + $0x34] ss:$8 sps:$4 sm:$0xff]   ;;  %v3168_v35 = vld [vmem:[%s4081_s5 + $0xb0] ss:$8 sps:$4 sm:$0xff]  }
  0x16   : > { %3067 = vmatpush3.bf16.msra.mxu1 %v3134_v4  ;;  %v3157_v28 = vld [vmem:[%s4081_s5 + $0x40] ss:$8 sps:$4 sm:$0xff]   ;;  %v770_v31 = vmul.f32 %v769_v29, %v769_v29  ;;  %v3170_v33 = vld [vmem:[%s4081_s5 + $0xb4] ss:$8 sps:$4 sm:$0xff]   ;;  %v3179_v37 = vld [vmem:[%s4081_s5 + $0xa4] ss:$8 sps:$4 sm:$0xff]   ;;  %v781_v55 = vrot.slane %v769_v29, %v3512_v47 }
  0x17   : > { %3051 = vmatpush3.bf16.msra.mxu0 %v3135_v5  ;;  %3068 = vmatprep.subr.bf16.mxu1 %v3136_v6  ;;  %v3177_v40 = vld [vmem:[%s4081_s5 + $0xa0] ss:$8 sps:$4 sm:$0xff]   ;;  %v3185_v42 = vld [vmem:[%s4081_s5 + $0x94] ss:$8 sps:$4 sm:$0xff]   ;;  %v3183_v44 = vld [vmem:[%s4081_s5 + $0x90] ss:$8 sps:$4 sm:$0xff]  }
  0x18   : > { %3052 = vmatprep.subr.bf16.mxu0 %v3137_v8  ;;  %v772_v34 = vrot.slane %v770_v31, 7  ;;  %v3188_v45 = vld [vmem:[%s4081_s5 + $0x84] ss:$8 sps:$4 sm:$0xff]   ;;  %v3186_v48 = vld [vmem:[%s4081_s5 + $0x80] ss:$8 sps:$4 sm:$0xff]   ;;  %v3020_v51 = vld [vmem:[%s685_s30 + $0x10] sm:$0xff]  }
  0x19   : > { %v3004_v46 = vld [vmem:[%s685_s30] sm:$0xff]   ;;  %v3019_v49 = vld [vmem:[%s685_s30 + $0x8] sm:$0xff]   ;;  %v3197_v50 = vld [vmem:[%s4082_s6 + $0x34] ss:$8 sps:$4 sm:$0xff]   ;;  %v3013_v58 = vunpack.c.l.bf16 %v3020_v51  ;;  %v3014_v59 = vunpack.c.h.bf16 %v3020_v51 }
  0x1a   : > { %3069 = vmatpush3.bf16.msra.mxu1 %v3136_v6  ;;  %v774_v36 = vsub.f32 %v769_v29, %v772_v34  ;;  %v3021_v52 = vld [vmem:[%s685_s30 + $0x18] sm:$0xff]   ;;  %v3005_v53 = vunpack.c.l.bf16 %v3004_v46  ;;  %v3006_v54 = vunpack.c.h.bf16 %v3004_v46  ;;  %v3009_v56 = vunpack.c.l.bf16 %v3019_v49  ;;  %s701_s30 = scalar_lea.vmem %s4085_s9, %s3433_s27  ;;  %s2984_s27 = sshll.u32 %s4101_s18, 2 }
  0x1b   : > { %3053 = vmatpush3.bf16.msra.mxu0 %v3137_v8  ;;  %1383 = vmatprep.subr.bf16.mxu1 %v3142_v9  ;;  %v3010_v57 = vunpack.c.h.bf16 %v3019_v49  ;;  %v3017_v60 = vunpack.c.l.bf16 %v3021_v52  ;;  %v3018_v61 = vunpack.c.h.bf16 %v3021_v52  ;;  %v786_v4 = vsub.f32 %v3013_v58, %v781_v55  ;;  %v3195_v46 = vld [vmem:[%s4082_s6 + $0x30] ss:$8 sps:$4 sm:$0xff]   ;;  %v3203_v52 = vld [vmem:[%s4082_s6 + $0x24] ss:$8 sps:$4 sm:$0xff]   ;;  %v3209_v58 = vld [vmem:[%s4082_s6 + $0x14] ss:$8 sps:$4 sm:$0xff]   ;;  %s724_s26 = scalar_lea.vmem %s4089_s13, %s2984_s27 }
  0x1c   : > { %3078 = vmatprep.subr.bf16.mxu0 %v3149_v16  ;;  %v775_v38 = vmax.f32 %v774_v36, 0.0  ;;  %v782_v63 = vsub.f32 %v3005_v53, %v781_v55  ;;  %v783_v0 = vsub.f32 %v3006_v54, %v781_v55  ;;  %v784_v1 = vsub.f32 %v3009_v56, %v781_v55  ;;  %v3173_v53 = vld [vmem:[%s4081_s5 + $0x14] ss:$8 sps:$4 sm:$0xff]   ;;  %v3171_v56 = vld [vmem:[%s4081_s5 + $0x10] ss:$8 sps:$4 sm:$0xff]  }
  0x1d   : > { %3071 = vmatmul.mubr.msk.bf16.vlgmr.msra.gmra.mxu1 %vm907_vm0, %v3400_v10  ;;  %v785_v2 = vsub.f32 %v3010_v57, %v781_v55  ;;  %v787_v5 = vsub.f32 %v3014_v59, %v781_v55  ;;  %v788_v6 = vsub.f32 %v3017_v60, %v781_v55  ;;  %v789_v8 = vsub.f32 %v3018_v61, %v781_v55  ;;  %v3201_v55 = vld [vmem:[%s4082_s6 + $0x20] ss:$8 sps:$4 sm:$0xff]   ;;  %v3176_v57 = vld [vmem:[%s4081_s5 + $0x4] ss:$8 sps:$4 sm:$0xff]   ;;  %v3207_v59 = vld [vmem:[%s4082_s6 + $0x10] ss:$8 sps:$4 sm:$0xff]  }
  0x1e   : > { %1384 = vmatpush1.bf16.msra.mxu1 %v3140_v12  ;;  %3055 = vmatmul.mubr.msk.bf16.vlgmr.msra.gmra.mxu0 %vm907_vm0, %v3411_v13  ;;  %v776_v41 = vadd.f32 1e-05, %v775_v38  ;;  %v3167_v38 = vld [vmem:[%s4081_s5 + $0x24] ss:$8 sps:$4 sm:$0xff]   ;;  %v3174_v60 = vld [vmem:[%s4081_s5] ss:$8 sps:$4 sm:$0xff]  }
  0x1f   : > { %1385 = vmatprep.subr.bf16.mxu1 %v3147_v14  ;;  %3074 = vmatprep.mubr.msk.bf16.mxu1 %vm907_vm0, %v3417_v15  ;;  %v3212_v61 = vld [vmem:[%s4082_s6 + $0x4] ss:$8 sps:$4 sm:$0xff]  }
  0x20   : > { %3079 = vmatpush3.bf16.msra.mxu0 %v3149_v16  ;;  %3058 = vmatprep.mubr.msk.bf16.mxu0 %vm907_vm0, %v3430_v18  ;;  %3222 = vrsqrt.f32 %v776_v41 }
  0x21   : > { %3080 = vmatprep.subr.bf16.mxu0 %v3156_v22 }
  0x22   : > { %1386 = vmatpush1.bf16.msra.mxu1 %v3145_v17 }
  0x23   : > { %1387 = vmatprep.subr.bf16.mxu1 %v3153_v20 }
  0x24   : > { %3081 = vmatpush3.bf16.msra.mxu0 %v3156_v22 }
  0x25   : > { %3075 = vmatmul.mubr.msk.bf16.gmra.mxu1 %vm907_vm0, %v3438_v19  ;;  %3082 = vmatprep.subr.bf16.mxu0 %v3160_v25 }
  0x26   : > { %1388 = vmatpush1.bf16.msra.mxu1 %v3151_v21  ;;  %3059 = vmatmul.mubr.msk.bf16.gmra.mxu0 %vm907_vm0, %v3452_v23 }
  0x27   : > { %1389 = vmatprep.subr.bf16.mxu1 %v3159_v24  ;;  %1407 = vmatprep.mubr.bf16.mxu1 %v3248_v30 }
  0x28   : > { %3083 = vmatpush3.bf16.msra.mxu0 %v3160_v25 }
  0x29   : > { %3084 = vmatprep.subr.bf16.mxu0 %v3161_v26 }
  0x2a   : > { %1390 = vmatpush1.bf16.msra.mxu1 %v3157_v28 }
  0x2b   : > { %1617 = vmatprep.subr.bf16.mxu1 %v3170_v33  ;;  %v3162_v33 = vld [vmem:[%s4081_s5 + $0x30] ss:$8 sps:$4 sm:$0xff]  }
  0x2c   : > { %3085 = vmatpush3.bf16.msra.mxu0 %v3161_v26 }
  0x2d   : > { %2898 = vmatmul.mubr.msk.bf16.vlgmr.msra.gmra.mxu1 %vm907_vm0, %v3403_v11  ;;  %1496 = vmatprep.subr.bf16.mxu0 %v3164_v32  ;;  %v3223_v3 = vpop.eup %3222 }
  0x2e   : > { %1417 = vmatprep.mubr.bf16.mxu1 %v3248_v30  ;;  %1618 = vmatpush1.bf16.msra.mxu1 %v3168_v35  ;;  %v793_v9 = vrot.slane %v3223_v3, %v3523_v62  ;;  %v3206_v3 = vld [vmem:[%s4082_s6 + $0xb4] ss:$8 sps:$4 sm:$0xff]  }
  0x2f   : > { %1619 = vmatprep.subr.bf16.mxu1 %v3179_v37 }
  0x30   : > { %v794_v12 = vmul.f32 %v793_v9, %v782_v63  ;;  %v795_v14 = vmul.f32 %v793_v9, %v783_v0  ;;  %v796_v16 = vmul.f32 %v793_v9, %v784_v1  ;;  %v797_v17 = vmul.f32 %v793_v9, %v785_v2  ;;  %v3182_v63 = vld [vmem:[%s4082_s6 + $0x74] ss:$8 sps:$4 sm:$0xff]   ;;  %v3210_v0 = vld [vmem:[%s4082_s6] ss:$8 sps:$4 sm:$0xff]   ;;  %v3180_v1 = vld [vmem:[%s4082_s6 + $0x70] ss:$8 sps:$4 sm:$0xff]  }
  0x31   : > { %v798_v20 = vmul.f32 %v793_v9, %v786_v4  ;;  %v799_v21 = vmul.f32 %v793_v9, %v787_v5  ;;  %v800_v22 = vmul.f32 %v793_v9, %v788_v6  ;;  %v801_v24 = vmul.f32 %v793_v9, %v789_v8  ;;  %v3191_v2 = vld [vmem:[%s4082_s6 + $0x64] ss:$8 sps:$4 sm:$0xff]   ;;  %v3189_v4 = vld [vmem:[%s4082_s6 + $0x60] ss:$8 sps:$4 sm:$0xff]   ;;  %v3194_v5 = vld [vmem:[%s4082_s6 + $0x54] ss:$8 sps:$4 sm:$0xff]  }
  0x32   : > { %1620 = vmatpush1.bf16.msra.mxu1 %v3177_v40  ;;  %vm802_vm1 = vcmp.gt.f32.partialorder %v794_v12, 0.0  ;;  %vm803_vm2 = vcmp.gt.f32.partialorder %v795_v14, 0.0  ;;  %v810_v25 = vmul.f32 0.2, %v794_v12  ;;  %v811_v26 = vmul.f32 0.2, %v795_v14 }
  0x33   : > { %1621 = vmatprep.subr.bf16.mxu1 %v3185_v42  ;;  %vm804_vm3 = vcmp.gt.f32.partialorder %v796_v16, 0.0  ;;  %vm805_vm4 = vcmp.gt.f32.partialorder %v797_v17, 0.0  ;;  %v812_v27 = vmul.f32 0.2, %v796_v16  ;;  %v813_v28 = vmul.f32 0.2, %v797_v17 }
  0x34   : > { %v818_v29 = vsel %vm802_vm1, %v794_v12, %v810_v25  ;;  %v819_v31 = vsel %vm803_vm2, %v795_v14, %v811_v26  ;;  %vm806_vm5 = vcmp.gt.f32.partialorder %v798_v20, 0.0  ;;  %vm807_vm6 = vcmp.gt.f32.partialorder %v799_v21, 0.0  ;;  %v3192_v6 = vld [vmem:[%s4082_s6 + $0x50] ss:$8 sps:$4 sm:$0xff]   ;;  %v3200_v8 = vld [vmem:[%s4082_s6 + $0x44] ss:$8 sps:$4 sm:$0xff]  }
  0x35   : > { %2899 = vmatmul.mubr.msk.bf16.gmra.mxu1 %vm907_vm0, %v3411_v13  ;;  %v3532_v32 = vpack.c.bf16 %v819_v31, %v818_v29  ;;  %v820_v34 = vsel %vm804_vm3, %v796_v16, %v812_v27  ;;  %v821_v35 = vsel %vm805_vm4, %v797_v17, %v813_v28  ;;  %v814_v36 = vmul.f32 0.2, %v798_v20  ;;  %v3198_v9 = vld [vmem:[%s4082_s6 + $0x40] ss:$8 sps:$4 sm:$0xff]   ;;  %v3204_v12 = vld [vmem:[%s4082_s6 + $0xb0] ss:$8 sps:$4 sm:$0xff]  }
  0x36   : > { %1427 = vmatprep.mubr.bf16.mxu1 %v3248_v30  ;;  %1622 = vmatpush1.bf16.msra.mxu1 %v3183_v44  ;;  %v3537_v37 = vpack.c.bf16 %v821_v35, %v820_v34  ;;  %v815_v40 = vmul.f32 0.2, %v799_v21  ;;  %vm808_vm7 = vcmp.gt.f32.partialorder %v800_v22, 0.0  ;;  %vm809_vm8 = vcmp.gt.f32.partialorder %v801_v24, 0.0  ;;  %v3215_v14 = vld [vmem:[%s4082_s6 + $0xa4] ss:$8 sps:$4 sm:$0xff]  }
  0x37   : > { %1623 = vmatprep.subr.bf16.mxu1 %v3188_v45  ;;  %3086 = vmatprep.mubr.msk.bf16.mxu0 %vm907_vm0, %v3532_v32  ;;  %v822_v41 = vsel %vm806_vm5, %v798_v20, %v814_v36  ;;  %v816_v42 = vmul.f32 0.2, %v800_v22  ;;  %v817_v44 = vmul.f32 0.2, %v801_v24  ;;  %v3213_v16 = vld [vmem:[%s4082_s6 + $0xa0] ss:$8 sps:$4 sm:$0xff]  }
  0x38   : > { %3087 = vmatmul.mubr.msk.bf16.vlgmr.msra.gmra.mxu0 %vm907_vm0, %v3537_v37  ;;  %v823_v45 = vsel %vm807_vm6, %v799_v21, %v815_v40  ;;  %v3218_v17 = vld [vmem:[%s4082_s6 + $0x94] ss:$8 sps:$4 sm:$0xff]   ;;  %v3221_v20 = vld [vmem:[%s4082_s6 + $0x84] ss:$8 sps:$4 sm:$0xff]   ;;  %v3219_v21 = vld [vmem:[%s4082_s6 + $0x80] ss:$8 sps:$4 sm:$0xff]  }
  0x39   : > { %1497 = vmatpush1.bf16.msra.mxu0 %v3162_v33  ;;  %v3553_v49 = vpack.c.bf16 %v823_v45, %v822_v41  ;;  %v825_v51 = vsel %vm809_vm8, %v801_v24, %v817_v44 }
  0x3a   : > { %1624 = vmatpush1.bf16.msra.mxu1 %v3186_v48  ;;  %v3165_v48 = vld [vmem:[%s4081_s5 + $0x20] ss:$8 sps:$4 sm:$0xff]   ;;  %1498 = vmatprep.subr.bf16.mxu0 %v3167_v38 }
  0x3b   : > { %2074 = vmatprep.subr.bf16.mxu1 %v3197_v50  ;;  %v824_v50 = vsel %vm808_vm7, %v800_v22, %v816_v42  ;;  %3090 = vmatprep.mubr.msk.bf16.mxu0 %vm907_vm0, %v3553_v49 }
  0x3c   : > { %v3565_v54 = vpack.c.bf16 %v825_v51, %v824_v50 }
  0x3d   : > { %2900 = vmatmul.mubr.msk.bf16.gmra.mxu1 %vm907_vm0, %v3430_v18  ;;  %1499 = vmatpush1.bf16.msra.mxu0 %v3165_v48 }
  0x3e   : > { %1437 = vmatprep.mubr.bf16.mxu1 %v3248_v30  ;;  %1500 = vmatprep.subr.bf16.mxu0 %v3173_v53  ;;  %v3734_v53 = vld [vmem:[%s693_s17] ss:$0 sm:$0xff] }
  0x40   : > { %3091 = vmatmul.mubr.msk.bf16.gmra.mxu0 %vm907_vm0, %v3565_v54 }
  0x41   : > { %1501 = vmatpush1.bf16.msra.mxu0 %v3171_v56  ;;  %1520 = vmatprep.mubr.bf16.mxu0 %v3248_v30 }
  0x42   : > { %1502 = vmatprep.subr.bf16.mxu0 %v3176_v57 }
  0x45   : > { %2901 = vmatmul.mubr.msk.bf16.gmra.mxu1 %vm907_vm0, %v3452_v23  ;;  %1503 = vmatpush1.bf16.msra.mxu0 %v3174_v60 }
  0x46   : > { %1641 = vmatprep.mubr.bf16.mxu1 %v3248_v30  ;;  %1961 = vmatprep.subr.bf16.mxu0 %v3182_v63 }
  0x48   : > { %2910 = vmatmul.mubr.msk.bf16.vlgmr.msra.gmra.mxu0 %vm907_vm0, %v3383_v7 }
  0x49   : > { %1962 = vmatpush1.bf16.msra.mxu0 %v3180_v1  ;;  %1530 = vmatprep.mubr.bf16.mxu0 %v3248_v30  ;;  %v1318_v1 = vld [vmem:[%s697_s25] sm:$0x3]  ;;  %s740_s25 = scalar_lea.vmem %s4091_s15, %s2984_s27 }
  0x4a   : > { %1963 = vmatprep.subr.bf16.mxu0 %v3191_v2 }
  0x4d   : > { %2922 = vmatmul.mubr.msk.bf16.vlgmr.msra.gmra.mxu1 %vm907_vm0, %v3532_v32  ;;  %1964 = vmatpush1.bf16.msra.mxu0 %v3189_v4 }
  0x4e   : > { %1651 = vmatprep.mubr.bf16.mxu1 %v3248_v30  ;;  %2075 = vmatpush1.bf16.msra.mxu1 %v3195_v46 }
  0x4f   : > { %2076 = vmatprep.subr.bf16.mxu1 %v3203_v52  ;;  %1965 = vmatprep.subr.bf16.mxu0 %v3194_v5 }
  0x50   : > { %2911 = vmatmul.mubr.msk.bf16.gmra.mxu0 %vm907_vm0, %v3400_v10 }
  0x51   : > { %1540 = vmatprep.mubr.bf16.mxu0 %v3248_v30  ;;  %1966 = vmatpush1.bf16.msra.mxu0 %v3192_v6 }
  0x52   : > { %2077 = vmatpush1.bf16.msra.mxu1 %v3201_v55  ;;  %1967 = vmatprep.subr.bf16.mxu0 %v3200_v8 }
  0x53   : > { %2078 = vmatprep.subr.bf16.mxu1 %v3209_v58 }
  0x55   : > { %2923 = vmatmul.mubr.msk.bf16.gmra.mxu1 %vm907_vm0, %v3537_v37  ;;  %1968 = vmatpush1.bf16.msra.mxu0 %v3198_v9 }
  0x56   : > { %1661 = vmatprep.mubr.bf16.mxu1 %v3248_v30  ;;  %2079 = vmatpush1.bf16.msra.mxu1 %v3207_v59 }
  0x57   : > { %2080 = vmatprep.subr.bf16.mxu1 %v3212_v61  ;;  %2195 = vmatprep.subr.bf16.mxu0 %v3206_v3 }
  0x58   : > { %2912 = vmatmul.mubr.msk.bf16.gmra.mxu0 %vm907_vm0, %v3417_v15 }
  0x59   : > { %1550 = vmatprep.mubr.bf16.mxu0 %v3248_v30 }
  0x5a   : > { %2081 = vmatpush1.bf16.msra.mxu1 %v3210_v0 }
  0x5b   : > { %3094 = vmatprep.subr.bf16.mxu1 %v3206_v3 }
  0x5d   : > { %2924 = vmatmul.mubr.msk.bf16.gmra.mxu1 %vm907_vm0, %v3553_v49 }
  0x5e   : > { %1671 = vmatprep.mubr.bf16.mxu1 %v3248_v30 }
  0x60   : > { %2913 = vmatmul.mubr.msk.bf16.gmra.mxu0 %vm907_vm0, %v3438_v19 }
  0x61   : > { %1985 = vmatprep.mubr.bf16.mxu0 %v3248_v30 }
  0x65   : > { %2925 = vmatmul.mubr.msk.bf16.gmra.mxu1 %vm907_vm0, %v3565_v54 }
  0x66   : > { %2098 = vmatprep.mubr.bf16.mxu1 %v3248_v30 }
  0x68   : > { %2942 = vmatmul.mubr.msk.bf16.vlgmr.msra.gmra.mxu0 %vm907_vm0, %v3403_v11  ;;  %v3250_v11 = vmov -inf  }
  0x69   : > { %2196 = vmatpush1.bf16.msra.mxu0 %v3204_v12  ;;  %1995 = vmatprep.mubr.bf16.mxu0 %v3248_v30  ;;  %749 = vst.msk [vmem:[#allocation3] sm:$0x1] %vm748_vm10, %v3250_v11 }
  0x6a   : > { %2197 = vmatprep.subr.bf16.mxu0 %v3215_v14 }
  0x6d   : > { %2954 = vmatmul.mubr.msk.bf16.vlgmr.msra.gmra.mxu1 %vm907_vm0, %v3383_v7  ;;  %v3216_v7 = vld [vmem:[%s4082_s6 + $0x90] ss:$8 sps:$4 sm:$0xff]   ;;  %2198 = vmatpush1.bf16.msra.mxu0 %v3213_v16 }
  0x6e   : > { %2108 = vmatprep.mubr.bf16.mxu1 %v3248_v30  ;;  %3098 = vmatpush1.bf16.msra.mxu1 %v3204_v12  ;;  %v3749_v12 = vrot.slane %v1318_v1, %v3512_v47 }
  0x6f   : > { %3095 = vmatprep.subr.bf16.mxu1 %v3215_v14  ;;  %2199 = vmatprep.subr.bf16.mxu0 %v3218_v17  ;;  %v3752_v14 = vrot.slane %v1318_v1, %v3523_v62 }
  0x70   : > { %2943 = vmatmul.mubr.msk.bf16.gmra.mxu0 %vm907_vm0, %v3411_v13 }
  0x71   : > { %2005 = vmatprep.mubr.bf16.mxu0 %v3248_v30  ;;  %2200 = vmatpush1.bf16.msra.mxu0 %v3216_v7 }
  0x72   : > { %3099 = vmatpush1.bf16.msra.mxu1 %v3213_v16  ;;  %2201 = vmatprep.subr.bf16.mxu0 %v3221_v20 }
  0x73   : > { %3096 = vmatprep.subr.bf16.mxu1 %v3218_v17 }
  0x75   : > { %2955 = vmatmul.mubr.msk.bf16.gmra.mxu1 %vm907_vm0, %v3400_v10  ;;  %2202 = vmatpush1.bf16.msra.mxu0 %v3219_v21  ;;  %v3249_v10 = vmov 0.0  }
  0x76   : > { %2118 = vmatprep.mubr.bf16.mxu1 %v3248_v30  ;;  %3100 = vmatpush1.bf16.msra.mxu1 %v3216_v7  ;;  %747 = vst.msk [vmem:[#allocation2] sm:$0x3] %vm746_vm9, %v3249_v10  ;;  %751 = vst [vmem:[#allocation5] sm:$0xf] %v3249_v10 }
  0x77   : > { %3097 = vmatprep.subr.bf16.mxu1 %v3221_v20  ;;  %750 = vst [vmem:[#allocation4] sm:$0xf] %v3249_v10 }
  0x78   : > { %2944 = vmatmul.mubr.msk.bf16.gmra.mxu0 %vm907_vm0, %v3430_v18 }
  0x79   : > { %2015 = vmatprep.mubr.bf16.mxu0 %v3248_v30 }
  0x7a   : > { %3101 = vmatpush1.bf16.msra.mxu1 %v3219_v21 }
  0x7d   : > { %2956 = vmatmul.mubr.msk.bf16.gmra.mxu1 %vm907_vm0, %v3417_v15 }
  0x7e   : > { %2128 = vmatprep.mubr.bf16.mxu1 %v3248_v30 }
  0x80   : > { %2945 = vmatmul.mubr.msk.bf16.gmra.mxu0 %vm907_vm0, %v3452_v23 }
  0x81   : > { %2219 = vmatprep.mubr.bf16.mxu0 %v3248_v30 }
  0x85   : > { %2957 = vmatmul.mubr.msk.bf16.gmra.mxu1 %vm907_vm0, %v3438_v19 }
  0x86   : > { %2249 = vmatprep.mubr.bf16.mxu1 %v3248_v30 }
  0x88   : > { %2966 = vmatmul.mubr.msk.bf16.vlgmr.msra.gmra.mxu0 %vm907_vm0, %v3532_v32 }
  0x89   : > { %2229 = vmatprep.mubr.bf16.mxu0 %v3248_v30 }
  0x8d   : > { %2969 = vmatmul.mubr.msk.bf16.vlgmr.msra.gmra.mxu1 %vm907_vm0, %v3565_v54 }
  0x90   : > { %2967 = vmatmul.mubr.msk.bf16.gmra.mxu0 %vm907_vm0, %v3537_v37 }
  0x91   : > { %2239 = vmatprep.mubr.bf16.mxu0 %v3248_v30 }
  0x98   : > { %2968 = vmatmul.mubr.msk.bf16.gmra.mxu0 %vm907_vm0, %v3553_v49 }
  0xdd   : > { %v3072_v13 = vpop.f32.mrf.mxu1 }
  0xde   : > { %v3056_v26 = vpop.f32.mrf.mxu0 }
  0xdf   : > { %v1075_v15 = vpop.f32.mrf.mxu1  ;;  %v1084_v51 = vadd.f32 %v3072_v13, %v3056_v26 }
  0xe0   : > { %v954_v29 = vpop.f32.mrf.mxu0 }
  0xe1   : > { %v3073_v18 = vpop.f32.mrf.mxu1  ;;  %v1076_v55 = vadd.f32 %v1075_v15, %v954_v29 }
  0xe2   : > { %v3057_v32 = vpop.f32.mrf.mxu0 }
  0xe3   : > { %v1078_v19 = vpop.f32.mrf.mxu1  ;;  %v1087_v63 = vadd.f32 %v3073_v18, %v3057_v32 }
  0xe4   : > { %v957_v35 = vpop.f32.mrf.mxu0 }
  0xe5   : > { %v3076_v23 = vpop.f32.mrf.mxu1  ;;  %v1079_v4 = vadd.f32 %v1078_v19, %v957_v35 }
  0xe6   : > { %v3060_v38 = vpop.f32.mrf.mxu0 }
  0xe7   : > { %v1091_v22 = vpop.f32.mrf.mxu1  ;;  %v1100_v9 = vadd.f32 %v3076_v23, %v3060_v38 }
  0xe8   : > { %v970_v42 = vpop.f32.mrf.mxu0 }
  0xe9   : > { %v3077_v24 = vpop.f32.mrf.mxu1  ;;  %v1092_v17 = vadd.f32 %v1091_v22, %v970_v42 }
  0xea   : > { %v3061_v46 = vpop.f32.mrf.mxu0 }
  0xeb   : > { %v1094_v25 = vpop.f32.mrf.mxu1  ;;  %v1103_v11 = vadd.f32 %v3077_v24, %v3061_v46 }
  0xec   : > { %v973_v50 = vpop.f32.mrf.mxu0 }
  0xed   : > { %v3700_v27 = vpop.f32.mrf.mxu1  ;;  %v1095_v13 = vadd.f32 %v1094_v25, %v973_v50 }
  0xef   : > { %v3702_v28 = vpop.f32.mrf.mxu1 }
  0xf1   : > { %v3704_v31 = vpop.f32.mrf.mxu1 }
  0xf3   : > { %v3706_v30 = vpop.f32.mrf.mxu1 }
  0xf5   : > { %v3708_v33 = vpop.f32.mrf.mxu1 }
  0xf7   : > { %v3710_v34 = vpop.f32.mrf.mxu1 }
  0xf8   : > { %v3088_v54 = vpop.f32.mrf.mxu0 }
  0xf9   : > { %v3712_v36 = vpop.f32.mrf.mxu1  ;;  %v1217_v56 = vadd.f32 %v3088_v54, %v1084_v51 }
  0xfa   : > { %v1184_v58 = vpop.f32.mrf.mxu0 }
  0xfb   : > { %v3714_v37 = vpop.f32.mrf.mxu1  ;;  %v1231_v59 = vadd.f32 %v3734_v53, %v1217_v56  ;;  %v1215_v60 = vadd.f32 %v1184_v58, %v1076_v55 }
  0xfc   : > { %v3089_v0 = vpop.f32.mrf.mxu0 }
  0xfd   : > { %v3716_v40 = vpop.f32.mrf.mxu1  ;;  %v1229_v2 = vadd.f32 %v3734_v53, %v1215_v60  ;;  %v1265_v5 = vmul.f32 %v1231_v59, %v1231_v59  ;;  %v1218_v6 = vadd.f32 %v3089_v0, %v1087_v63  ;;  %v1241_v15 = vsel %vm907_vm0, %v1231_v59, 0.0 }
  0xfe   : > { %v1187_v8 = vpop.f32.mrf.mxu0  ;;  %v3762_v26 = vsel %vm907_vm0, %v1231_v59, -inf }
  0xff   : > { %v3718_v41 = vpop.f32.mrf.mxu1  ;;  %v1263_v7 = vmul.f32 %v1229_v2, %v1229_v2  ;;  %v1232_v20 = vadd.f32 %v3734_v53, %v1218_v6  ;;  %v1216_v21 = vadd.f32 %v1187_v8, %v1079_v4  ;;  %v1274_v23 = vsel %vm907_vm0, %v1265_v5, 0.0 }
 0x100   : > { %v3092_v10 = vpop.f32.mrf.mxu0  ;;  %v1238_v35 = vsel %vm907_vm0, %v1229_v2, 0.0  ;;  %v3767_v38 = vsel %vm907_vm0, %v1229_v2, -inf }
 0x101   : > { %v3720_v44 = vpop.f32.mrf.mxu1  ;;  %v1221_v18 = vadd.f32 %v3092_v10, %v1100_v9  ;;  %v1266_v29 = vmul.f32 %v1232_v20, %v1232_v20  ;;  %v1230_v22 = vadd.f32 %v3734_v53, %v1216_v21  ;;  %v1271_v46 = vsel %vm907_vm0, %v1263_v7, 0.0 }
 0x102   : > { %v1200_v32 = vpop.f32.mrf.mxu0  ;;  %v1243_v50 = vsel %vm907_vm0, %v1232_v20, 0.0  ;;  %v1298_v58 = vsel %vm907_vm0, %v1232_v20, -inf }
 0x103   : > { %v3722_v45 = vpop.f32.mrf.mxu1  ;;  %v1235_v24 = vadd.f32 %v3734_v53, %v1221_v18  ;;  %v1219_v25 = vadd.f32 %v1200_v32, %v1092_v17  ;;  %v1239_v51 = vsel %vm907_vm0, %v1230_v22, 0.0  ;;  %v1264_v54 = vmul.f32 %v1230_v22, %v1230_v22 }
 0x104   : > { %v3093_v55 = vpop.f32.mrf.mxu0  ;;  %v1276_v56 = vsel %vm907_vm0, %v1266_v29, 0.0  ;;  %v1240_v59 = vadd.f32 %v1239_v51, %v1238_v35  ;;  %v1296_v9 = vsel %vm907_vm0, %v1230_v22, -inf }
 0x105   : > { %v3724_v48 = vpop.f32.mrf.mxu1  ;;  %v1269_v60 = vmul.f32 %v1235_v24, %v1235_v24  ;;  %v1272_v0 = vsel %vm907_vm0, %v1264_v54, 0.0  ;;  %v1303_v1 = vsel %vm907_vm0, %v1235_v24, -inf  ;;  %v1233_v2 = vadd.f32 %v3734_v53, %v1219_v25 }
 0x106   : > { %v1222_v4 = vadd.f32 %v3093_v55, %v1103_v11  ;;  %v1203_v5 = vpop.f32.mrf.mxu0  ;;  %v1242_v6 = vadd.f32 %v1241_v15, %v1240_v59  ;;  %v1273_v8 = vadd.f32 %v1272_v0, %v1271_v46  ;;  %v1249_v20 = vsel %vm907_vm0, %v1235_v24, 0.0 }
 0x107   : > { %v3730_v49 = vpop.f32.mrf.mxu1  ;;  %v1220_v17 = vadd.f32 %v1203_v5, %v1095_v13  ;;  %v1267_v21 = vmul.f32 %v1233_v2, %v1233_v2  ;;  %v1299_v10 = vsel %vm907_vm0, %v1233_v2, -inf  ;;  %v1304_v35 = vmax.f32 %v3762_v26, %v1303_v1 }
 0x108   : > { %v1236_v18 = vadd.f32 %v3734_v53, %v1222_v4  ;;  %v1522_v29 = vpop.f32.mrf.mxu0  ;;  %v1275_v32 = vadd.f32 %v1274_v23, %v1273_v8  ;;  %v1244_v11 = vadd.f32 %v1243_v50, %v1242_v6  ;;  %v1282_v13 = vsel %vm907_vm0, %v1269_v60, 0.0 }
 0x109   : > { %v3732_v52 = vpop.f32.mrf.mxu1  ;;  %v1234_v15 = vadd.f32 %v3734_v53, %v1220_v17  ;;  %v1245_v22 = vsel %vm907_vm0, %v1233_v2, 0.0  ;;  %v1300_v24 = vmax.f32 %v3767_v38, %v1299_v10  ;;  %v1278_v53 = vsel %vm907_vm0, %v1267_v21, 0.0 }
 0x10a   : > { %v1305_v46 = vsel %vm907_vm0, %v1236_v18, -inf  ;;  %v1524_v51 = vpop.f32.mrf.mxu0  ;;  %v1246_v54 = vadd.f32 %v1245_v22, %v1244_v11  ;;  %v1277_v55 = vadd.f32 %v1276_v56, %v1275_v32  ;;  %v1523_v60 = vadd.f32 %v1522_v29, %v3700_v27 }
 0x10b   : > { %v3736_v57 = vpop.f32.mrf.mxu1  ;;  %v1306_v59 = vmax.f32 %v1298_v58, %v1305_v46  ;;  %v1247_v23 = vsel %vm907_vm0, %v1234_v15, 0.0  ;;  %v1268_v50 = vmul.f32 %v1234_v15, %v1234_v15  ;;  %v1301_v0 = vsel %vm907_vm0, %v1234_v15, -inf }
 0x10c   : > { %v1526_v1 = vpop.f32.mrf.mxu0  ;;  %v1279_v2 = vadd.f32 %v1278_v53, %v1277_v55  ;;  %v1270_v38 = vmul.f32 %v1236_v18, %v1236_v18  ;;  %v1248_v4 = vadd.f32 %v1247_v23, %v1246_v54  ;;  %v1302_v5 = vmax.f32 %v1296_v9, %v1301_v0 }
 0x10d   : > { %v3743_v61 = vpop.f32.mrf.mxu1  ;;  %v1280_v56 = vsel %vm907_vm0, %v1268_v50, 0.0  ;;  %v1525_v58 = vadd.f32 %v1524_v51, %v3702_v28  ;;  %v1527_v8 = vadd.f32 %v1526_v1, %v3704_v31  ;;  %v1308_v10 = vmax.f32 %v1304_v35, %v1306_v59 }
 0x10e   : > { %v1528_v17 = vpop.f32.mrf.mxu0  ;;  %v1682_v21 = vadd.f32 %v3743_v61, %v1523_v60  ;;  %v1250_v32 = vadd.f32 %v1249_v20, %v1248_v4  ;;  %v1281_v27 = vadd.f32 %v1280_v56, %v1279_v2  ;;  %v1307_v29 = vmax.f32 %v1300_v24, %v1302_v5 }
 0x10f   : > { %v3746_v3 = vpop.f32.mrf.mxu1  ;;  %v1251_v15 = vsel %vm907_vm0, %v1236_v18, 0.0  ;;  %v1529_v9 = vadd.f32 %v1528_v17, %v3706_v30  ;;  %v1284_v46 = vsel %vm907_vm0, %v1270_v38, 0.0 }
 0x110   : > { %v1532_v22 = vpop.f32.mrf.mxu0  ;;  %v1683_v28 = vadd.f32 %v3746_v3, %v1525_v58  ;;  %v1252_v61 = vadd.f32 %v1251_v15, %v1250_v32  ;;  %v1283_v35 = vadd.f32 %v1282_v13, %v1281_v27  ;;  %v1309_v20 = vmax.f32 %v1307_v29, %v1308_v10 }
 0x111   : > { %v3754_v16 = vpop.f32.mrf.mxu1  ;;  %v1709_v24 = vadd.f32 %v3749_v12, %v1682_v21  ;;  %v1533_v13 = vadd.f32 %v1532_v22, %v3708_v33 }
 0x112   : > { %v1684_v31 = vadd.f32 %v3754_v16, %v1527_v8  ;;  %v1534_v54 = vpop.f32.mrf.mxu0  ;;  %v1710_v18 = vadd.f32 %v3752_v14, %v1683_v28  ;;  %v1253_v59 = vrot.slane %v1252_v61, 4  ;;  %v1285_v3 = vadd.f32 %v1284_v46, %v1283_v35 }
 0x113   : > { %v3758_v19 = vpop.f32.mrf.mxu1  ;;  %v1310_v23 = vrot.slane %v1309_v20, 4  ;;  %v1535_v53 = vadd.f32 %v1534_v54, %v3710_v34  ;;  %v1834_v17 = vmul.f32 %v1709_v24, %v1709_v24 }
 0x114   : > { %v1711_v30 = vadd.f32 %v3749_v12, %v1684_v31  ;;  %v1685_v55 = vadd.f32 %v3758_v19, %v1529_v9  ;;  %v2987_v50 = vpack.c.bf16 %v1710_v18, %v1709_v24  ;;  %v1536_v0 = vpop.f32.mrf.mxu0  ;;  %v1254_v60 = vadd.f32 %v1253_v59, %v1252_v61 }
 0x115   : > { %v3770_v42 = vpop.f32.mrf.mxu1  ;;  %v1286_v19 = vrot.slane %v1285_v3, 4  ;;  %v1311_v1 = vmax.f32 %v1309_v20, %v1310_v23  ;;  %v1835_v10 = vmul.f32 %v1710_v18, %v1710_v18  ;;  %v1294_v23 = vld [vmem:[#allocation3] sm:$0x1] }
 0x116   : > { %1773 = vst [vmem:[%s3827_s16] sm:$0xff] %v2987_v50  ;;  %v1836_v38 = vmul.f32 %v1711_v30, %v1711_v30  ;;  %v1538_v4 = vpop.f32.mrf.mxu0  ;;  %v1712_v5 = vadd.f32 %v3752_v14, %v1685_v55  ;;  %v1686_v56 = vadd.f32 %v3770_v42, %v1533_v13  ;;  %v1255_v8 = vrot.slane %v1254_v60, 2 }
 0x117   : > { %v3777_v63 = vpop.f32.mrf.mxu1  ;;  %v1287_v33 = vadd.f32 %v1286_v19, %v1285_v3  ;;  %v1312_v34 = vrot.slane %v1311_v1, 2  ;;  %v1782_v32 = vadd.f32 %v1711_v30, %v1709_v24  ;;  %v1537_v42 = vadd.f32 %v1536_v0, %v3712_v36  ;;  %v1237_v3 = vld [vmem:[#allocation2] sm:$0x1] }
 0x118   : > { %v1687_v58 = vadd.f32 %v3777_v63, %v1535_v53  ;;  %v2988_v27 = vpack.c.bf16 %v1712_v5, %v1711_v30  ;;  %v1542_v29 = vpop.f32.mrf.mxu0  ;;  %v1713_v15 = vadd.f32 %v3749_v12, %v1686_v56  ;;  %v1256_v9 = vadd.f32 %v1255_v8, %v1254_v60 }
 0x119   : > { %v3783_v7 = vpop.f32.mrf.mxu1  ;;  %v1288_v22 = vrot.slane %v1287_v33, 2  ;;  %v1313_v28 = vmax.f32 %v1311_v1, %v1312_v34  ;;  %v1850_v63 = vadd.f32 %v1836_v38, %v1834_v17  ;;  %v1539_v46 = vadd.f32 %v1538_v4, %v3714_v37  ;;  %v1262_v38 = vld [vmem:[#allocation2 + $0x1] sm:$0x1] }
 0x11a   : > { %1774 = vst [vmem:[%s3827_s16 + $0x8] sm:$0xff] %v2988_v27  ;;  %v1795_v61 = vadd.f32 %v1712_v5, %v1710_v18  ;;  %v1544_v35 = vpop.f32.mrf.mxu0  ;;  %v1714_v20 = vadd.f32 %v3752_v14, %v1687_v58  ;;  %v1257_v24 = vrot.slane %v1256_v9, 1  ;;  %v1837_v55 = vmul.f32 %v1712_v5, %v1712_v5 }
 0x11b   : > { %v3790_v25 = vpop.f32.mrf.mxu1  ;;  %v1289_v54 = vadd.f32 %v1288_v22, %v1287_v33  ;;  %v1314_v30 = vrot.slane %v1313_v28, 1  ;;  %v1543_v36 = vadd.f32 %v1542_v29, %v3716_v40  ;;  %v1838_v13 = vmul.f32 %v1713_v15, %v1713_v15 }
 0x11c   : > { %v1545_v53 = vadd.f32 %v1544_v35, %v3718_v41  ;;  %v2989_v37 = vpack.c.bf16 %v1714_v20, %v1713_v15  ;;  %v1546_v50 = vpop.f32.mrf.mxu0  ;;  %v1258_v18 = vadd.f32 %v1257_v24, %v1256_v9  ;;  %v1839_v19 = vmul.f32 %v1714_v20, %v1714_v20 }
 0x11d   : > { %v3797_v26 = vpop.f32.mrf.mxu1  ;;  %v1290_v0 = vrot.slane %v1289_v54, 1  ;;  %v1315_v60 = vmax.f32 %v1313_v28, %v1314_v30  ;;  %v1547_v4 = vadd.f32 %v1546_v50, %v3720_v44  ;;  %v1688_v5 = vadd.f32 %v3783_v7, %v1537_v42 }
 0x11e   : > { %1775 = vst [vmem:[%s3827_s16 + $0x10] sm:$0xff] %v2989_v37  ;;  %v1548_v56 = vpop.f32.mrf.mxu0  ;;  %v1689_v40 = vadd.f32 %v3790_v25, %v1539_v46  ;;  %v1690_v58 = vadd.f32 %v3797_v26, %v1543_v36  ;;  %v1259_v41 = vadd.f32 %v1258_v18, %v1237_v3  ;;  %v1863_v27 = vadd.f32 %v1837_v55, %v1835_v10 }
 0x11f   : > { %v3802_v6 = vpop.f32.mrf.mxu1  ;;  %v1291_v8 = vadd.f32 %v1290_v0, %v1289_v54  ;;  %v1316_v33 = vmax.f32 %v1294_v23, %v1315_v60  ;;  %v1549_v34 = vadd.f32 %v1548_v56, %v3722_v45  ;;  %v1715_v29 = vadd.f32 %v3749_v12, %v1688_v5 }
 0x120   : > { %v1716_v9 = vadd.f32 %v3752_v14, %v1689_v40  ;;  %v1552_v44 = vpop.f32.mrf.mxu0  ;;  %v1691_v7 = vadd.f32 %v3802_v6, %v1545_v53  ;;  %1261 = vst.msk [vmem:[#allocation2] sm:$0x1] %vm748_vm10, %v1259_v41  ;;  %v1717_v26 = vadd.f32 %v3749_v12, %v1690_v58  ;;  %v1783_v28 = vadd.f32 %v1782_v32, %v1713_v15 }
 0x121   : > { %v3808_v11 = vpop.f32.mrf.mxu1  ;;  %v1292_v25 = vadd.f32 %v1291_v8, %v1262_v38  ;;  %1317 = vst.msk [vmem:[#allocation3] sm:$0x1] %vm748_vm10, %v1316_v33  ;;  %v1851_v42 = vadd.f32 %v1850_v63, %v1838_v13  ;;  %v1840_v46 = vmul.f32 %v1715_v29, %v1715_v29  ;;  %v1796_v6 = vadd.f32 %v1795_v61, %v1714_v20 }
 0x122   : > { %v1692_v45 = vadd.f32 %v3808_v11, %v1547_v4  ;;  %v2990_v35 = vpack.c.bf16 %v1716_v9, %v1715_v29  ;;  %v1554_v24 = vpop.f32.mrf.mxu0  ;;  %v1864_v54 = vadd.f32 %v1863_v27, %v1839_v19  ;;  %v1841_v30 = vmul.f32 %v1716_v9, %v1716_v9 }
 0x123   : > { %v3816_v51 = vpop.f32.mrf.mxu1  ;;  %1293 = vst.msk [vmem:[#allocation2 + $0x1] sm:$0x1] %vm748_vm10, %v1292_v25  ;;  %v1718_v55 = vadd.f32 %v3752_v14, %v1691_v7  ;;  %v1784_v11 = vadd.f32 %v1783_v28, %v1715_v29  ;;  %v1797_v23 = vadd.f32 %v1796_v6, %v1716_v9  ;;  %v1842_v36 = vmul.f32 %v1717_v26, %v1717_v26 }
 0x124   : > { %v1693_v22 = vadd.f32 %v3816_v51, %v1549_v34  ;;  %1776 = vst [vmem:[%s3827_s16 + $0x18] sm:$0xff] %v2990_v35  ;;  %v1553_v51 = vadd.f32 %v1552_v44, %v3724_v48  ;;  %v1556_v32 = vpop.f32.mrf.mxu0  ;;  %v1719_v15 = vadd.f32 %v3749_v12, %v1692_v45  ;;  %v1852_v53 = vadd.f32 %v1851_v42, %v1840_v46 }
 0x125   : > { %v3829_v16 = vpop.f32.mrf.mxu1  ;;  %v2991_v61 = vpack.c.bf16 %v1718_v55, %v1717_v26  ;;  %v1843_v20 = vmul.f32 %v1718_v55, %v1718_v55  ;;  %v1865_v37 = vadd.f32 %v1864_v54, %v1841_v30  ;;  %v1785_v50 = vadd.f32 %v1784_v11, %v1717_v26 }
 0x126   : > { %v1720_v63 = vadd.f32 %v3752_v14, %v1693_v22  ;;  %v1555_v48 = vadd.f32 %v1554_v24, %v3730_v49  ;;  %v1558_v18 = vpop.f32.mrf.mxu0  ;;  %v1557_v0 = vadd.f32 %v1556_v32, %v3732_v52  ;;  %v1844_v60 = vmul.f32 %v1719_v15, %v1719_v15 }
 0x127   : > { %v3833_v2 = vpop.f32.mrf.mxu1  ;;  %1777 = vst [vmem:[%s3827_s16 + $0x20] sm:$0xff] %v2991_v61  ;;  %v1559_v19 = vadd.f32 %v1558_v18, %v3736_v57  ;;  %v1798_v56 = vadd.f32 %v1797_v23, %v1718_v55  ;;  %v1694_v49 = vadd.f32 %v3829_v16, %v1553_v51  ;;  %v1853_v52 = vadd.f32 %v1852_v53, %v1842_v36 }
 0x128   : > { %v2992_v38 = vpack.c.bf16 %v1720_v63, %v1719_v15  ;;  %v2476_v5 = vld [vmem:[#allocation3] sm:$0x1]  ;;  %v1845_v40 = vmul.f32 %v1720_v63, %v1720_v63  ;;  %v3897_v58 = vpop.f32.mrf.mxu0  ;;  %v1695_v41 = vadd.f32 %v3833_v2, %v1555_v48  ;;  %v1866_v57 = vadd.f32 %v1865_v37, %v1843_v20 }
 0x129   : > { %v3839_v21 = vpop.f32.mrf.mxu1  ;;  %2477 = vst.msk [vmem:[%s708_s23] sm:$0x1] %vm748_vm10, %v2476_v5  ;;  %v1786_v29 = vadd.f32 %v1785_v50, %v1719_v15  ;;  %v1799_v9 = vadd.f32 %v1798_v56, %v1720_v63  ;;  %v1721_v16 = vadd.f32 %v3749_v12, %v1694_v49  ;;  %v1854_v2 = vadd.f32 %v1853_v52, %v1844_v60 }
 0x12a   : > { %1778 = vst [vmem:[%s3827_s16 + $0x28] sm:$0xff] %v2992_v38  ;;  %v1696_v8 = vadd.f32 %v3839_v21, %v1557_v0  ;;  %v2473_v27 = vld [vmem:[#allocation2] sm:$0x3]  ;;  %v1722_v44 = vadd.f32 %v3752_v14, %v1695_v41  ;;  %v3908_v7 = vpop.f32.mrf.mxu0  ;;  %v1867_v25 = vadd.f32 %v1866_v57, %v1845_v40  ;;  %v3251_v48 = vmov 1966171168  }
 0x12b   : > { %v3843_v31 = vpop.f32.mrf.mxu1  ;;  %2475 = vst.msk [vmem:[%s705_s0] sm:$0x3] %vm746_vm9, %v2473_v27  ;;  %v1787_v45 = vadd.f32 %v1786_v29, %v1721_v16  ;;  %v1846_v22 = vmul.f32 %v1721_v16, %v1721_v16  ;;  %v1812_v18 = vunpack.c.l.s4 %v3251_v48 }
 0x12c   : > { %v1697_v33 = vadd.f32 %v3843_v31, %v1559_v19  ;;  %v1723_v21 = vadd.f32 %v3749_v12, %v1696_v8  ;;  %v2993_v28 = vpack.c.bf16 %v1722_v44, %v1721_v16  ;;  %v1800_v42 = vadd.f32 %v1799_v9, %v1722_v44  ;;  %v3915_v46 = vpop.f32.mrf.mxu0 }
 0x12d   : > { %v3848_v59 = vpop.f32.mrf.mxu1  ;;  %v1847_v35 = vmul.f32 %v1722_v44, %v1722_v44  ;;  %v1855_v55 = vadd.f32 %v1854_v2, %v1846_v22 }
 0x12e   : > { %v1724_v31 = vadd.f32 %v3752_v14, %v1697_v33  ;;  %v1848_v24 = vmul.f32 %v1723_v21, %v1723_v21  ;;  %1779 = vst [vmem:[%s3827_s16 + $0x30] sm:$0xff] %v2993_v28  ;;  %v1788_v12 = vadd.f32 %v1787_v45, %v1723_v21  ;;  %v3920_v14 = vpop.f32.mrf.mxu0  ;;  %v1813_v33 = vunpack.c.0.s8 %v1812_v18 }
 0x12f   : > { %v3852_v1 = vpop.f32.mrf.mxu1  ;;  %v1868_v51 = vadd.f32 %v1867_v25, %v1847_v35 }
 0x130   : > { %v2994_v6 = vpack.c.bf16 %v1724_v31, %v1723_v21  ;;  %v1849_v54 = vmul.f32 %v1724_v31, %v1724_v31  ;;  %v1801_v11 = vadd.f32 %v1800_v42, %v1724_v31  ;;  %v1789_v15 = vrot.slane %v1788_v12, 4  ;;  %v3925_v36 = vpop.f32.mrf.mxu0 }
 0x131   : > { %v3860_v17 = vpop.f32.mrf.mxu1  ;;  %v1856_v63 = vadd.f32 %v1855_v55, %v1848_v24  ;;  %v3938_v42 = vsub.s32 %v1813_v33, %v3501_v43 }
 0x132   : > { %1780 = vst [vmem:[%s3827_s16 + $0x38] sm:$0xff] %v2994_v6  ;;  %v1802_v23 = vrot.slane %v1801_v11, 4  ;;  %v1869_v61 = vadd.f32 %v1868_v51, %v1849_v54  ;;  %v1790_v53 = vadd.f32 %v1789_v15, %v1788_v12  ;;  %v3929_v0 = vpop.f32.mrf.mxu0 }
 0x133   : > { %v3870_v10 = vpop.f32.mrf.mxu1  ;;  %v1857_v37 = vrot.slane %v1856_v63, 4 }
 0x134   : > { %v1803_v50 = vadd.f32 %v1802_v23, %v1801_v11  ;;  %v1870_v60 = vrot.slane %v1869_v61, 4  ;;  %v1791_v38 = vrot.slane %v1790_v53, 2  ;;  %v3931_v40 = vpop.f32.mrf.mxu0 }
 0x135   : > { %v3874_v3 = vpop.f32.mrf.mxu1  ;;  %v1858_v5 = vadd.f32 %v1857_v37, %v1856_v63  ;;  %v1781_v63 = vld [vmem:[#allocation4] ss:$2 sm:$0x3] }
 0x136   : > { %v1804_v56 = vrot.slane %v1803_v50, 2  ;;  %v1871_v49 = vadd.f32 %v1870_v60, %v1869_v61  ;;  %v1792_v52 = vadd.f32 %v1791_v38, %v1790_v53  ;;  %v3933_v27 = vpop.f32.mrf.mxu0  ;;  %v1833_v60 = vld [vmem:[#allocation4 + $0x1] ss:$2 sm:$0x3] }
 0x137   : > { %v3880_v13 = vpop.f32.mrf.mxu1  ;;  %v1859_v57 = vrot.slane %v1858_v5, 2 }
 0x138   : > { %v1805_v8 = vadd.f32 %v1804_v56, %v1803_v50  ;;  %v1872_v29 = vrot.slane %v1871_v49, 2  ;;  %v1793_v16 = vrot.slane %v1792_v52, 1  ;;  %v3935_v25 = vpop.f32.mrf.mxu0 }
 0x139   : > { %v3890_v4 = vpop.f32.mrf.mxu1  ;;  %v1860_v44 = vadd.f32 %v1859_v57, %v1858_v5  ;;  %v1896_v5 = vld [vmem:[%s701_s30] sm:$0x3] }
 0x13a   : > { %v1806_v2 = vrot.slane %v1805_v8, 1  ;;  %v1873_v21 = vadd.f32 %v1872_v29, %v1871_v49  ;;  %v1794_v45 = vadd.f32 %v1793_v16, %v1792_v52  ;;  %v3940_v35 = vpop.f32.mrf.mxu0  ;;  %v3962_v33 = vrot.slane %v1896_v5, %v3512_v47 }
 0x13b   : > { %v3904_v34 = vpop.f32.mrf.mxu1  ;;  %v1861_v22 = vrot.slane %v1860_v44, 1 }
 0x13c   : > { %v1807_v28 = vadd.f32 %v1806_v2, %v1805_v8  ;;  %v1874_v24 = vrot.slane %v1873_v21, 1  ;;  %v3942_v55 = vpop.f32.mrf.mxu0 }
 0x13d   : > { %v3913_v26 = vpop.f32.mrf.mxu1  ;;  %v1862_v12 = vadd.f32 %v1861_v22, %v1860_v44 }
 0x13e   : > { %v1810_v54 = vcombine.low %v1794_v45, %v1807_v28  ;;  %v1875_v11 = vadd.f32 %v1874_v24, %v1873_v21  ;;  %v3945_v15 = vpop.f32.mrf.mxu0 }
 0x13f   : > { %v3917_v30 = vpop.f32.mrf.mxu1 }
 0x140   : > { %v1817_v51 = vrot.slane %v1810_v54, %v3938_v42  ;;  %v1878_v23 = vcombine.low %v1862_v12, %v1875_v11  ;;  %v2017_v53 = vpop.f32.mrf.mxu0  ;;  %v2107_v12 = vadd.f32 %v3870_v10, %v3920_v14 }
 0x141   : > { %v3923_v32 = vpop.f32.mrf.mxu1 }
 0x142   : > { %v1824_v61 = vrot.slane %v1817_v51, %v3938_v42  ;;  %v1885_v50 = vrot.slane %v1878_v23, %v3938_v42  ;;  %v2019_v38 = vpop.f32.mrf.mxu0 }
 0x143   : > { %v3927_v20 = vpop.f32.mrf.mxu1 }
 0x144   : > { %v1826_v18 = vadd.f32 %v1824_v61, %v1781_v63  ;;  %v1892_v56 = vrot.slane %v1885_v50, %v3938_v42  ;;  %v2021_v39 = vpop.f32.mrf.mxu0 }
 0x145   : > { %v2130_v19 = vpop.f32.mrf.mxu1 }
 0x146   : > { %v2131_v48 = vadd.f32 %v2130_v19, %v2017_v53  ;;  %1831 = vst.msk [vmem:[#allocation4] ss:$2 sm:$0x3] %vm3953_vm11, %v1826_v18  ;;  %v1894_v8 = vadd.f32 %v1892_v56, %v1833_v60  ;;  %v3965_v19 = vrot.slane %v1896_v5, %v3523_v62  ;;  %v2023_v16 = vpop.f32.mrf.mxu0  ;;  %v2113_v18 = vadd.f32 %v3880_v13, %v3929_v0 }
 0x147   : > { %v2132_v41 = vpop.f32.mrf.mxu1  ;;  %v2121_v13 = vadd.f32 %v3913_v26, %v3935_v25  ;;  %v2127_v26 = vadd.f32 %v3927_v20, %v3945_v15 }
 0x148   : > { %v2133_v49 = vadd.f32 %v2132_v41, %v2019_v38  ;;  %1895 = vst.msk [vmem:[#allocation4 + $0x1] ss:$2 sm:$0x3] %vm3953_vm11, %v1894_v8  ;;  %v2101_v41 = vadd.f32 %v3848_v59, %v3897_v58  ;;  %v2221_v62 = vpop.f32.mrf.mxu0  ;;  %v2115_v38 = vadd.f32 %v3890_v4, %v3931_v40  ;;  %v2123_v40 = vadd.f32 %v3917_v30, %v3940_v35 }
 0x149   : > { %v2134_v9 = vpop.f32.mrf.mxu1 }
 0x14a   : > { %v2135_v44 = vadd.f32 %v2134_v9, %v2021_v39  ;;  %v2103_v9 = vadd.f32 %v3852_v1, %v3908_v7  ;;  %v2260_v28 = vadd.f32 %v2221_v62, %v2101_v41  ;;  %v2223_v59 = vpop.f32.mrf.mxu0 }
 0x14b   : > { %v2136_v31 = vpop.f32.mrf.mxu1 }
 0x14c   : > { %v2137_v45 = vadd.f32 %v2136_v31, %v2023_v16  ;;  %v2105_v31 = vadd.f32 %v3860_v17, %v3915_v46  ;;  %v2225_v1 = vpop.f32.mrf.mxu0  ;;  %v2287_v17 = vadd.f32 %v3962_v33, %v2260_v28 }
 0x14d   : > { %v2251_v6 = vpop.f32.mrf.mxu1 }
 0x14e   : > { %v2272_v52 = vadd.f32 %v2251_v6, %v2131_v48  ;;  %v2261_v6 = vadd.f32 %v2223_v59, %v2103_v9  ;;  %v2262_v11 = vadd.f32 %v2225_v1, %v2105_v31  ;;  %v2227_v63 = vpop.f32.mrf.mxu0 }
 0x14f   : > { %v2253_v43 = vpop.f32.mrf.mxu1  ;;  %v2478_v51 = vld [vmem:[#allocation4] sm:$0xf]  ;;  %v2263_v53 = vadd.f32 %v2227_v63, %v2107_v12 }
 0x150   : > { %v2273_v29 = vadd.f32 %v2253_v43, %v2133_v49  ;;  %v3972_v2 = vadd.f32 %v3962_v33, %v2272_v52  ;;  %v2288_v46 = vadd.f32 %v3965_v19, %v2261_v6  ;;  %2479 = vst [vmem:[%s724_s26] sm:$0xf] %v2478_v51  ;;  %v2111_v43 = vadd.f32 %v3874_v3, %v3925_v36  ;;  %v2231_v50 = vpop.f32.mrf.mxu0 }
 0x151   : > { %v2255_v57 = vpop.f32.mrf.mxu1  ;;  %v2289_v10 = vadd.f32 %v3962_v33, %v2262_v11  ;;  %v2290_v14 = vadd.f32 %v3965_v19, %v2263_v53  ;;  %v2117_v49 = vadd.f32 %v3904_v34, %v3933_v27 }
 0x152   : > { %v3975_v47 = vadd.f32 %v3965_v19, %v2273_v29  ;;  %v2274_v22 = vadd.f32 %v2255_v57, %v2135_v44  ;;  %v2995_v61 = vpack.c.bf16 %v2288_v46, %v2287_v17  ;;  %v2264_v48 = vadd.f32 %v2231_v50, %v2111_v43  ;;  %v2233_v60 = vpop.f32.mrf.mxu0 }
 0x153   : > { %v2257_v21 = vpop.f32.mrf.mxu1  ;;  %v2996_v5 = vpack.c.bf16 %v2290_v14, %v2289_v10  ;;  %v2265_v36 = vadd.f32 %v2233_v60, %v2113_v18  ;;  %v2410_v57 = vmul.f32 %v2289_v10, %v2289_v10  ;;  %v2408_v29 = vmul.f32 %v2287_v17, %v2287_v17 }
 0x154   : > { %v3001_v24 = vpack.c.bf16 %v3975_v47, %v3972_v2  ;;  %v2275_v58 = vadd.f32 %v2257_v21, %v2137_v45  ;;  %v3998_v7 = vadd.f32 %v3962_v33, %v2274_v22  ;;  %2351 = vst [vmem:[%s3987_s24] sm:$0xff] %v2995_v61  ;;  %v2291_v3 = vadd.f32 %v3962_v33, %v2264_v48  ;;  %v2235_v56 = vpop.f32.mrf.mxu0 }
 0x155   : > { %2352 = vst [vmem:[%s3987_s24 + $0x8] sm:$0xff] %v2996_v5  ;;  %v2266_v52 = vadd.f32 %v2235_v56, %v2115_v38  ;;  %v2292_v39 = vadd.f32 %v3965_v19, %v2265_v36  ;;  %v2360_v27 = vadd.f32 %v2289_v10, %v2287_v17  ;;  %v2411_v41 = vmul.f32 %v2290_v14, %v2290_v14 }
 0x156   : > { %2357 = vst [vmem:[%s3987_s24 + $0x30] sm:$0xff] %v3001_v24  ;;  %v4001_v54 = vadd.f32 %v3965_v19, %v2275_v58  ;;  %v2237_v8 = vpop.f32.mrf.mxu0  ;;  %v2412_v16 = vmul.f32 %v2291_v3, %v2291_v3  ;;  %v2125_v45 = vadd.f32 %v3923_v32, %v3942_v55  ;;  %v2424_v25 = vadd.f32 %v2410_v57, %v2408_v29 }
 0x157   : > { %v2293_v4 = vadd.f32 %v3962_v33, %v2266_v52  ;;  %v2267_v0 = vadd.f32 %v2237_v8, %v2117_v49  ;;  %v2997_v44 = vpack.c.bf16 %v2292_v39, %v2291_v3  ;;  %v2409_v35 = vmul.f32 %v2288_v46, %v2288_v46 }
 0x158   : > { %v3002_v23 = vpack.c.bf16 %v4001_v54, %v3998_v7  ;;  %v2241_v34 = vpop.f32.mrf.mxu0  ;;  %v2373_v9 = vadd.f32 %v2290_v14, %v2288_v46  ;;  %v2361_v28 = vadd.f32 %v2360_v27, %v2291_v3  ;;  %v2425_v59 = vadd.f32 %v2424_v25, %v2412_v16 }
 0x159   : > { %v2294_v21 = vadd.f32 %v3965_v19, %v2267_v0  ;;  %v2268_v62 = vadd.f32 %v2241_v34, %v2121_v13  ;;  %2353 = vst [vmem:[%s3987_s24 + $0x10] sm:$0xff] %v2997_v44  ;;  %v2414_v22 = vmul.f32 %v2293_v4, %v2293_v4  ;;  %v2413_v58 = vmul.f32 %v2292_v39, %v2292_v39 }
 0x15a   : > { %2358 = vst [vmem:[%s3987_s24 + $0x38] sm:$0xff] %v3002_v23  ;;  %v2243_v30 = vpop.f32.mrf.mxu0  ;;  %v2437_v12 = vadd.f32 %v2411_v41, %v2409_v35  ;;  %v2374_v32 = vadd.f32 %v2373_v9, %v2292_v39  ;;  %v2362_v55 = vadd.f32 %v2361_v28, %v2293_v4  ;;  %v2420_v5 = vmul.f32 %v3972_v2, %v3972_v2 }
 0x15b   : > { %v2998_v24 = vpack.c.bf16 %v2294_v21, %v2293_v4  ;;  %v2295_v31 = vadd.f32 %v3962_v33, %v2268_v62  ;;  %v2269_v6 = vadd.f32 %v2243_v30, %v2123_v40  ;;  %v2426_v15 = vadd.f32 %v2425_v59, %v2414_v22 }
 0x15c   : > { %v2245_v1 = vpop.f32.mrf.mxu0  ;;  %v2415_v17 = vmul.f32 %v2294_v21, %v2294_v21  ;;  %v2375_v63 = vadd.f32 %v2374_v32, %v2294_v21  ;;  %v2438_v53 = vadd.f32 %v2437_v12, %v2413_v58  ;;  %v2422_v39 = vmul.f32 %v3998_v7, %v3998_v7 }
 0x15d   : > { %2354 = vst [vmem:[%s3987_s24 + $0x18] sm:$0xff] %v2998_v24  ;;  %v2270_v20 = vadd.f32 %v2245_v1, %v2125_v45  ;;  %v2416_v11 = vmul.f32 %v2295_v31, %v2295_v31  ;;  %v2296_v51 = vadd.f32 %v3965_v19, %v2269_v6  ;;  %v2363_v23 = vadd.f32 %v2362_v55, %v2295_v31 }
 0x15e   : > { %v2247_v46 = vpop.f32.mrf.mxu0  ;;  %v2439_v3 = vadd.f32 %v2438_v53, %v2415_v17  ;;  %v2421_v4 = vmul.f32 %v3975_v47, %v3975_v47  ;;  %v2423_v16 = vmul.f32 %v4001_v54, %v4001_v54 }
 0x15f   : > { %v2297_v43 = vadd.f32 %v3962_v33, %v2270_v20  ;;  %v2271_v61 = vadd.f32 %v2247_v46, %v2127_v26  ;;  %v2427_v50 = vadd.f32 %v2426_v15, %v2416_v11  ;;  %v2999_v10 = vpack.c.bf16 %v2296_v51, %v2295_v31  ;;  %v2359_v15 = vld [vmem:[#allocation5] ss:$2 sm:$0x3] }
 0x160   : > { %v2417_v14 = vmul.f32 %v2296_v51, %v2296_v51  ;;  %v2376_v48 = vadd.f32 %v2375_v63, %v2296_v51  ;;  %v2407_v63 = vld [vmem:[#allocation5 + $0x1] ss:$2 sm:$0x3] }
 0x161   : > { %v2364_v18 = vadd.f32 %v2363_v23, %v2297_v43  ;;  %v2418_v60 = vmul.f32 %v2297_v43, %v2297_v43  ;;  %v2298_v38 = vadd.f32 %v3965_v19, %v2271_v61  ;;  %2355 = vst [vmem:[%s3987_s24 + $0x20] sm:$0xff] %v2999_v10 }
 0x162   : > { %v2440_v52 = vadd.f32 %v2439_v3, %v2417_v14 }
 0x163   : > { %v2365_v36 = vadd.f32 %v2364_v18, %v3972_v2  ;;  %v2428_v56 = vadd.f32 %v2427_v50, %v2418_v60  ;;  %v3000_v33 = vpack.c.bf16 %v2298_v38, %v2297_v43  ;;  %v2377_v49 = vadd.f32 %v2376_v48, %v2298_v38 }
 0x164   : > { %v2419_v57 = vmul.f32 %v2298_v38, %v2298_v38 }
 0x165   : > { %v2366_v8 = vadd.f32 %v2365_v36, %v3998_v7  ;;  %v2429_v13 = vadd.f32 %v2428_v56, %v2420_v5  ;;  %2356 = vst [vmem:[%s3987_s24 + $0x28] sm:$0xff] %v3000_v33  ;;  %v2378_v19 = vadd.f32 %v2377_v49, %v3975_v47 }
 0x166   : > { %v2441_v0 = vadd.f32 %v2440_v52, %v2419_v57 }
 0x167   : > { %v2367_v40 = vrot.slane %v2366_v8, 4  ;;  %v2430_v2 = vadd.f32 %v2429_v13, %v2422_v39  ;;  %v2379_v29 = vadd.f32 %v2378_v19, %v4001_v54 }
 0x168   : > { %v2442_v44 = vadd.f32 %v2441_v0, %v2421_v4 }
 0x169   : > { %v2368_v34 = vadd.f32 %v2367_v40, %v2366_v8  ;;  %v2431_v27 = vrot.slane %v2430_v2, 4  ;;  %v2380_v41 = vrot.slane %v2379_v29, 4 }
 0x16a   : > { %v2443_v7 = vadd.f32 %v2442_v44, %v2423_v16 }
 0x16b   : > { %v2369_v21 = vrot.slane %v2368_v34, 2  ;;  %v2432_v62 = vadd.f32 %v2431_v27, %v2430_v2  ;;  %v2381_v45 = vadd.f32 %v2380_v41, %v2379_v29 }
 0x16c   : > { %v2444_v26 = vrot.slane %v2443_v7, 4 }
 0x16d   : > { %v2370_v25 = vadd.f32 %v2369_v21, %v2368_v34  ;;  %v2433_v22 = vrot.slane %v2432_v62, 2  ;;  %v2382_v47 = vrot.slane %v2381_v45, 2 }
 0x16e   : > { %v2445_v30 = vadd.f32 %v2444_v26, %v2443_v7 }
 0x16f   : > { %v2371_v35 = vrot.slane %v2370_v25, 1  ;;  %v2434_v9 = vadd.f32 %v2433_v22, %v2432_v62  ;;  %v2383_v28 = vadd.f32 %v2382_v47, %v2381_v45 }
 0x170   : > { %v2446_v24 = vrot.slane %v2445_v30, 2 }
 0x171   : > { %v2384_v59 = vrot.slane %v2383_v28, 1  ;;  %v2435_v58 = vrot.slane %v2434_v9, 1  ;;  %v2372_v31 = vadd.f32 %v2371_v35, %v2370_v25 }
 0x172   : > { %v2447_v54 = vadd.f32 %v2446_v24, %v2445_v30 }
 0x173   : > { %v2385_v6 = vadd.f32 %v2384_v59, %v2383_v28  ;;  %v2436_v32 = vadd.f32 %v2435_v58, %v2434_v9 }
 0x174   : > { %v2448_v1 = vrot.slane %v2447_v54, 1 }
 0x175   : > { %v2388_v12 = vcombine.low %v2372_v31, %v2385_v6 }
 0x176   : > { %v2449_v55 = vadd.f32 %v2448_v1, %v2447_v54 }
 0x177   : > { %v2395_v20 = vrot.slane %v2388_v12, %v3938_v42 }
 0x178   : > { %v2452_v17 = vcombine.low %v2436_v32, %v2449_v55 }
 0x179   : > { %v2402_v11 = vrot.slane %v2395_v20, %v3938_v42 }
 0x17a   : > { %v2459_v51 = vrot.slane %v2452_v17, %v3938_v42 }
 0x17b   : > { %v2404_v46 = vadd.f32 %v2402_v11, %v2359_v15 }
 0x17c   : > { %v2466_v23 = vrot.slane %v2459_v51, %v3938_v42 }
 0x17d   : > { %2405 = vst.msk [vmem:[#allocation5] ss:$2 sm:$0x3] %vm3953_vm11, %v2404_v46 }
 0x17e   : > { %v2468_v43 = vadd.f32 %v2466_v23, %v2407_v63 }
 0x180   : > { %2469 = vst.msk [vmem:[#allocation5 + $0x1] ss:$2 sm:$0x3] %vm3953_vm11, %v2468_v43 }
 0x187   : > { %v2480_v61 = vld [vmem:[#allocation5] sm:$0xf] }
 0x188   : > { %2481 = vst [vmem:[%s740_s25] sm:$0xf] %v2480_v61 }
 0x189 PF: > { %s26_s20 = sadd.s32 1, %s3246_s20   ;;  %s4096_s18 = smov %s3242_s19 }
 0x18a   : > { %p23_p5 = scmp.ge.s32.totalorder %s26_s20, 4   ;;  %s4097_s19 = smov %s4099_s21 }
 0x18c   :  { %25 = sbr.rel (!%p23_p5) target bundleno = 2 (0x2), region = 178 }

// kernel: teethgnn_forward.15
= control target key start
LH: loop header
LB: loop body
LE: loop exit
PB: predicated region body
PF: predicated region fallthrough
CT: control target
= control target key end

     0   :  { %s777_s15 = smov 0   ;;  %s779_s16 = smov 0   ;;  %s854_s0 = inlined_call_operand.vmem [shape: bf16[2,64,128], index: 0, kind: input, shape index: {}]   ;;  %s855_s1 = inlined_call_operand.vmem [shape: f32[2,2,128], index: 1, kind: input, shape index: {}]   ;;  %s856_s2 = inlined_call_operand.vmem [shape: bf16[128,3], index: 2, kind: input, shape index: {}]   ;;  %s857_s3 = inlined_call_operand.vmem [shape: f32[2,1,3], index: 3, kind: input, shape index: {}]   ;;  %s858_s4 = inlined_call_operand.vmem [shape: f32[2,64,3], index: 4, kind: output, shape index: {}]  }
   0x1   :  { %s781_s17 = smov 0  }
   0x2 LB: > { %s26_s18 = sadd.s32 1, %s746_s16  ;;  %p604_p0 = scmp.ge.s32.totalorder %s750_s17, 1  ;;  %s750_s17 = sphi %s781_s17, %s14_s17   ;;  %s746_s16 = sphi %s779_s16, %s860_s16   ;;  %s742_s15 = sphi %s777_s15, %s859_s15  }
   0x3   : > { %p28_p1 = scmp.ge.s32.totalorder %s26_s18, 2  ;;  %p200_p2 = scmp.lt.s32.totalorder %s750_s17, 3 }
   0x5   : > { %s862_s18 = smov (%p28_p1, %s26_s18), 0  ;;  %p201_p3 = pnand %p604_p0, %p200_p2 }
   0x6   : > { %p242_p4 = scmp.lt.s32.totalorder (!%p201_p3), %s742_s15, 1 }
   0x7   : > { %204 = sbr.rel (%p201_p3) target bundleno = 258 (0x102), region = 36 }
   0xc   : > { %v718_v0 = vld [vmem:[%s856_s2 + $0x38] sm:$0xff]   ;;  %v719_v1 = vld [vmem:[%s856_s2 + $0x30] sm:$0xff]   ;;  %s864_s15 = smov (!%p242_p4, %s742_s15), 1  ;;  %v720_v2 = vld [vmem:[%s856_s2 + $0x28] sm:$0xff]   ;;  %v295_v12 = vlaneseq  ;;  %vm483_vm8 = vcmask 23552  }
   0xd   : > { %654 = vmatprep.subr.bf16.mxu0 %v718_v0  ;;  %678 = vmatprep.subr.bf16.mxu1 %v718_v0  ;;  %s607_s25 = sshll.u32 %s864_s15, 1  ;;  %v721_v3 = vld [vmem:[%s856_s2 + $0x20] sm:$0xff]   ;;  %v722_v7 = vld [vmem:[%s856_s2 + $0x18] sm:$0xff]   ;;  %v723_v10 = vld [vmem:[%s856_s2 + $0x10] sm:$0xff]   ;;  %s621_s9 = sshll.u32 %s864_s15, 5 }
   0xe   : > { %655 = vmatpush3.bf16.msra.mxu0 %v718_v0  ;;  %686 = vmatpush3.bf16.msra.mxu1 %v718_v0  ;;  %s254_s28 = scalar_lea.vmem %s855_s1, %s607_s25  ;;  %v724_v14 = vld [vmem:[%s856_s2 + $0x8] sm:$0xff]   ;;  %v296_v15 = vshrl.u32 %v295_v12, 7  ;;  %s249_s14 = scalar_lea.vmem %s854_s0, %s621_s9  ;;  %v725_v16 = vld [vmem:[%s856_s2] sm:$0xff]  }
   0xf   : > { %656 = vmatprep.subr.bf16.mxu0 %v719_v1  ;;  %679 = vmatprep.subr.bf16.mxu1 %v719_v1  ;;  %v285_v4 = vld [vmem:[%s254_s28] sm:$0x3]  ;;  %v640_v19 = vld [vmem:[%s249_s14 + $0x10] sm:$0xff]   ;;  %v639_v20 = vld [vmem:[%s249_s14 + $0x8] sm:$0xff]   ;;  %s257_s23 = scalar_lea.vmem %s857_s3, %s864_s15  ;;  %s622_s24 = sshll.u32 %s864_s15, 6 }
  0x10   : > { %v286_v5 = vmul.f32 0.015625, %v285_v4  ;;  %v624_v17 = vld [vmem:[%s249_s14] sm:$0xff]   ;;  %v297_v18 = vsub.s32 0, %v296_v15  ;;  %v641_v21 = vld [vmem:[%s249_s14 + $0x18] sm:$0xff]   ;;  %v633_v25 = vunpack.c.l.bf16 %v640_v19  ;;  %v634_v26 = vunpack.c.h.bf16 %v640_v19  ;;  %s266_s27 = scalar_lea.vmem %s858_s4, %s622_s24 }
  0x11   : > { %v625_v22 = vunpack.c.l.bf16 %v624_v17  ;;  %v626_v23 = vunpack.c.h.bf16 %v624_v17  ;;  %v629_v27 = vunpack.c.l.bf16 %v639_v20  ;;  %v630_v28 = vunpack.c.h.bf16 %v639_v20 }
  0x12   : > { %657 = vmatpush3.bf16.msra.mxu0 %v719_v1  ;;  %687 = vmatpush3.bf16.msra.mxu1 %v719_v1  ;;  %v287_v6 = vmul.f32 %v286_v5, %v286_v5  ;;  %v298_v24 = vrot.slane %v286_v5, %v297_v18  ;;  %v637_v29 = vunpack.c.l.bf16 %v641_v21  ;;  %v638_v30 = vunpack.c.h.bf16 %v641_v21 }
  0x13   : > { %658 = vmatprep.subr.bf16.mxu0 %v720_v2  ;;  %680 = vmatprep.subr.bf16.mxu1 %v720_v2  ;;  %v309_v31 = vsub.s32 1, %v296_v15 }
  0x14   : > { %v289_v8 = vrot.slane %v287_v6, 7  ;;  %v299_v32 = vsub.f32 %v625_v22, %v298_v24  ;;  %v300_v33 = vsub.f32 %v626_v23, %v298_v24  ;;  %v303_v34 = vsub.f32 %v633_v25, %v298_v24  ;;  %v610_v6 = vld [vmem:[%s257_s23] ss:$0 sm:$0xff] }
  0x15   : > { %v304_v35 = vsub.f32 %v634_v26, %v298_v24  ;;  %v301_v37 = vsub.f32 %v629_v27, %v298_v24  ;;  %v302_v38 = vsub.f32 %v630_v28, %v298_v24  ;;  %v305_v39 = vsub.f32 %v637_v29, %v298_v24 }
  0x16   : > { %659 = vmatpush3.bf16.msra.mxu0 %v720_v2  ;;  %688 = vmatpush3.bf16.msra.mxu1 %v720_v2  ;;  %v291_v9 = vsub.f32 %v286_v5, %v289_v8  ;;  %v306_v40 = vsub.f32 %v638_v30, %v298_v24 }
  0x17   : > { %660 = vmatprep.subr.bf16.mxu0 %v721_v3  ;;  %681 = vmatprep.subr.bf16.mxu1 %v721_v3 }
  0x18   : > { %v292_v11 = vmax.f32 %v291_v9, 0.0 }
  0x1a   : > { %661 = vmatpush3.bf16.msra.mxu0 %v721_v3  ;;  %689 = vmatpush3.bf16.msra.mxu1 %v721_v3  ;;  %v293_v13 = vadd.f32 1e-05, %v292_v11 }
  0x1b   : > { %662 = vmatprep.subr.bf16.mxu0 %v722_v7  ;;  %682 = vmatprep.subr.bf16.mxu1 %v722_v7 }
  0x1c   : > { %726 = vrsqrt.f32 %v293_v13 }
  0x1e   : > { %663 = vmatpush3.bf16.msra.mxu0 %v722_v7  ;;  %690 = vmatpush3.bf16.msra.mxu1 %v722_v7 }
  0x1f   : > { %664 = vmatprep.subr.bf16.mxu0 %v723_v10  ;;  %683 = vmatprep.subr.bf16.mxu1 %v723_v10 }
  0x22   : > { %665 = vmatpush3.bf16.msra.mxu0 %v723_v10  ;;  %691 = vmatpush3.bf16.msra.mxu1 %v723_v10 }
  0x23   : > { %666 = vmatprep.subr.bf16.mxu0 %v724_v14  ;;  %684 = vmatprep.subr.bf16.mxu1 %v724_v14 }
  0x26   : > { %667 = vmatpush3.bf16.msra.mxu0 %v724_v14  ;;  %692 = vmatpush3.bf16.msra.mxu1 %v724_v14 }
  0x27   : > { %668 = vmatprep.subr.bf16.mxu0 %v725_v16  ;;  %685 = vmatprep.subr.bf16.mxu1 %v725_v16 }
  0x29   : > { %v727_v36 = vpop.eup %726 }
  0x2a   : > { %669 = vmatpush3.bf16.msra.mxu0 %v725_v16  ;;  %693 = vmatpush3.bf16.msra.mxu1 %v725_v16  ;;  %v310_v41 = vrot.slane %v727_v36, %v309_v31 }
  0x2c   : > { %v311_v42 = vmul.f32 %v310_v41, %v299_v32  ;;  %v312_v43 = vmul.f32 %v310_v41, %v300_v33  ;;  %v315_v44 = vmul.f32 %v310_v41, %v303_v34  ;;  %v316_v45 = vmul.f32 %v310_v41, %v304_v35 }
  0x2d   : > { %v313_v46 = vmul.f32 %v310_v41, %v301_v37  ;;  %v314_v47 = vmul.f32 %v310_v41, %v302_v38  ;;  %v317_v48 = vmul.f32 %v310_v41, %v305_v39  ;;  %v318_v49 = vmul.f32 %v310_v41, %v306_v40 }
  0x2e   : > { %vm319_vm0 = vcmp.gt.f32.partialorder %v311_v42, 0.0  ;;  %vm320_vm1 = vcmp.gt.f32.partialorder %v312_v43, 0.0  ;;  %v327_v50 = vmul.f32 0.2, %v311_v42  ;;  %v328_v51 = vmul.f32 0.2, %v312_v43 }
  0x2f   : > { %vm323_vm2 = vcmp.gt.f32.partialorder %v315_v44, 0.0  ;;  %vm324_vm3 = vcmp.gt.f32.partialorder %v316_v45, 0.0  ;;  %v331_v52 = vmul.f32 0.2, %v315_v44  ;;  %v332_v53 = vmul.f32 0.2, %v316_v45 }
  0x30   : > { %v335_v54 = vsel %vm319_vm0, %v311_v42, %v327_v50  ;;  %v336_v55 = vsel %vm320_vm1, %v312_v43, %v328_v51  ;;  %vm321_vm4 = vcmp.gt.f32.partialorder %v313_v46, 0.0  ;;  %vm322_vm5 = vcmp.gt.f32.partialorder %v314_v47, 0.0 }
  0x31   : > { %v343_v56 = vpack.c.bf16 %v336_v55, %v335_v54  ;;  %v339_v57 = vsel %vm323_vm2, %v315_v44, %v331_v52  ;;  %v340_v58 = vsel %vm324_vm3, %v316_v45, %v332_v53  ;;  %v329_v59 = vmul.f32 0.2, %v313_v46 }
  0x32   : > { %v345_v60 = vpack.c.bf16 %v340_v58, %v339_v57  ;;  %v330_v61 = vmul.f32 0.2, %v314_v47  ;;  %vm325_vm6 = vcmp.gt.f32.partialorder %v317_v48, 0.0  ;;  %vm326_vm7 = vcmp.gt.f32.partialorder %v318_v49, 0.0 }
  0x33   : > { %670 = vmatprep.mubr.bf16.mxu0 %v343_v56  ;;  %v337_v62 = vsel %vm321_vm4, %v313_v46, %v329_v59  ;;  %v333_v63 = vmul.f32 0.2, %v317_v48  ;;  %v334_v0 = vmul.f32 0.2, %v318_v49 }
  0x34   : > { %674 = vmatprep.mubr.bf16.mxu1 %v345_v60  ;;  %v338_v1 = vsel %vm322_vm5, %v314_v47, %v330_v61 }
  0x35   : > { %v344_v2 = vpack.c.bf16 %v338_v1, %v337_v62  ;;  %v341_v3 = vsel %vm325_vm6, %v317_v48, %v333_v63  ;;  %v342_v4 = vsel %vm326_vm7, %v318_v49, %v334_v0 }
  0x36   : > { %v346_v5 = vpack.c.bf16 %v342_v4, %v341_v3 }
  0x37   : > { %671 = vmatmul.mubr.bf16.vlgmr.msra.gmra.mxu0 %v344_v2 }
  0x38   : > { %675 = vmatmul.mubr.bf16.vlgmr.msra.gmra.mxu1 %v346_v5 }
  0xf7   : > { %v672_v7 = vpop.f32.mrf.mxu0 }
  0xf8   : > { %v461_v8 = vadd.f32 %v672_v7, %v610_v6  ;;  %v676_v9 = vpop.f32.mrf.mxu1 }
  0xf9   : > { %v477_v10 = vadd.f32 %v676_v9, %v610_v6  ;;  %v452_v11 = vpop.f32.mrf.mxu0 }
  0xfa   : > { %486 = vst.msk [vmem:[%s266_s27 + $0x10] sm:$0xff] %vm483_vm8, %v461_v8  ;;  %v453_v12 = vadd.f32 %v610_v6, %v452_v11  ;;  %v468_v13 = vpop.f32.mrf.mxu1 }
  0xfb   : > { %490 = vst.msk [vmem:[%s266_s27 + $0x30] sm:$0xff] %vm483_vm8, %v477_v10  ;;  %v469_v14 = vadd.f32 %v610_v6, %v468_v13  ;;  %v673_v15 = vpop.f32.mrf.mxu0 }
  0xfc   : > { %484 = vst.msk [vmem:[%s266_s27] sm:$0xff] %vm483_vm8, %v453_v12  ;;  %v464_v16 = vadd.f32 %v673_v15, %v610_v6  ;;  %v677_v17 = vpop.f32.mrf.mxu1 }
  0xfd   : > { %488 = vst.msk [vmem:[%s266_s27 + $0x20] sm:$0xff] %vm483_vm8, %v469_v14  ;;  %v480_v18 = vadd.f32 %v677_v17, %v610_v6  ;;  %v455_v19 = vpop.f32.mrf.mxu0 }
  0xfe   : > { %487 = vst.msk [vmem:[%s266_s27 + $0x18] sm:$0xff] %vm483_vm8, %v464_v16  ;;  %v456_v20 = vadd.f32 %v610_v6, %v455_v19  ;;  %v471_v21 = vpop.f32.mrf.mxu1 }
  0xff   : > { %491 = vst.msk [vmem:[%s266_s27 + $0x38] sm:$0xff] %vm483_vm8, %v480_v18  ;;  %v472_v22 = vadd.f32 %v610_v6, %v471_v21 }
 0x100   : > { %485 = vst.msk [vmem:[%s266_s27 + $0x8] sm:$0xff] %vm483_vm8, %v456_v20 }
 0x101   : > { %489 = vst.msk [vmem:[%s266_s27 + $0x28] sm:$0xff] %vm483_vm8, %v472_v22 }
 0x102 PF: > { %s14_s17 = sadd.s32 1, %s750_s17   ;;  %s859_s15 = smov %s746_s16 }
 0x103   : > { %p11_p5 = scmp.ge.s32.totalorder %s14_s17, 4   ;;  %s860_s16 = smov %s862_s18 }
 0x105   :  { %13 = sbr.rel (!%p11_p5) target bundleno = 2 (0x2), region = 72 }

// kernel: teethgnn_forward.16
= control target key start
LH: loop header
LB: loop body
LE: loop exit
PB: predicated region body
PF: predicated region fallthrough
CT: control target
= control target key end

     0   :  { %s1658_s21 = smov 0   ;;  %s1660_s22 = smov 0   ;;  %s2084_s0 = inlined_call_operand.vmem [shape: bf16[2,64,256], index: 0, kind: input, shape index: {}]   ;;  %s2085_s1 = inlined_call_operand.vmem [shape: f32[2,2,256], index: 1, kind: input, shape index: {}]   ;;  %s2086_s2 = inlined_call_operand.vmem [shape: f32[2,1,256], index: 2, kind: input, shape index: {}]   ;;  %s2087_s3 = inlined_call_operand.vmem [shape: bf16[256,512], index: 3, kind: input, shape index: {}]   ;;  %s2088_s4 = inlined_call_operand.vmem [shape: f32[2,1,512], index: 4, kind: input, shape index: {}]   ;;  %s2089_s5 = inlined_call_operand.vmem [shape: f32[2,64,256], index: 5, kind: output, shape index: {0}]   ;;  %s2090_s6 = inlined_call_operand.vmem [shape: bf16[2,64,256], index: 6, kind: output, shape index: {1}]  }
   0x1   :  { %s1662_s23 = smov 0  }
   0x2 LB: > { %s29_s24 = sadd.s32 1, %s1617_s22  ;;  %p1380_p0 = scmp.ge.s32.totalorder %s1621_s23, 1  ;;  %s1621_s23 = sphi %s1662_s23, %s17_s23   ;;  %s1617_s22 = sphi %s1660_s22, %s2092_s22   ;;  %s1613_s21 = sphi %s1658_s21, %s2091_s21  }
   0x3   : > { %p31_p1 = scmp.ge.s32.totalorder %s29_s24, 2  ;;  %p267_p2 = scmp.lt.s32.totalorder %s1621_s23, 3 }
   0x5   : > { %s2094_s24 = smov (%p31_p1, %s29_s24), 0  ;;  %p268_p3 = pnand %p1380_p0, %p267_p2 }
   0x6   : > { %p331_p4 = scmp.lt.s32.totalorder (!%p268_p3), %s1613_s21, 1 }
   0x7   : > { %271 = sbr.rel (%p268_p3) target bundleno = 311 (0x137), region = 40 }
   0xc   : > { %v1501_v0 = vld [vmem:[%s2087_s3 + $0xe4] ss:$16 sps:$4 sm:$0xff]   ;;  %v1503_v1 = vld [vmem:[%s2087_s3 + $0xec] ss:$16 sps:$4 sm:$0xff]   ;;  %v1505_v2 = vld [vmem:[%s2087_s3 + $0xe0] ss:$16 sps:$4 sm:$0xff]   ;;  %v402_v52 = vlaneseq }
   0xd   : > { %970 = vmatprep.subr.bf16.mxu0 %v1501_v0  ;;  %v1506_v3 = vld [vmem:[%s2087_s3 + $0xe8] ss:$16 sps:$4 sm:$0xff]   ;;  %1043 = vmatprep.subr.bf16.mxu1 %v1503_v1  ;;  %v1507_v4 = vld [vmem:[%s2087_s3 + $0xc4] ss:$16 sps:$4 sm:$0xff]   ;;  %v1509_v5 = vld [vmem:[%s2087_s3 + $0xcc] ss:$16 sps:$4 sm:$0xff]  }
   0xe   : > { %971 = vmatpush1.bf16.msra.mxu0 %v1505_v2  ;;  %1044 = vmatpush1.bf16.msra.mxu1 %v1506_v3  ;;  %v1511_v6 = vld [vmem:[%s2087_s3 + $0xc0] ss:$16 sps:$4 sm:$0xff]   ;;  %v1512_v7 = vld [vmem:[%s2087_s3 + $0xc8] ss:$16 sps:$4 sm:$0xff]   ;;  %v1513_v8 = vld [vmem:[%s2087_s3 + $0xa4] ss:$16 sps:$4 sm:$0xff]  }
   0xf   : > { %972 = vmatprep.subr.bf16.mxu0 %v1507_v4  ;;  %1045 = vmatprep.subr.bf16.mxu1 %v1509_v5  ;;  %v1515_v9 = vld [vmem:[%s2087_s3 + $0xac] ss:$16 sps:$4 sm:$0xff]   ;;  %v1517_v10 = vld [vmem:[%s2087_s3 + $0xa0] ss:$16 sps:$4 sm:$0xff]   ;;  %v1518_v11 = vld [vmem:[%s2087_s3 + $0xa8] ss:$16 sps:$4 sm:$0xff]  }
  0x10   : > { %v1519_v12 = vld [vmem:[%s2087_s3 + $0x84] ss:$16 sps:$4 sm:$0xff]   ;;  %v1521_v13 = vld [vmem:[%s2087_s3 + $0x8c] ss:$16 sps:$4 sm:$0xff]   ;;  %v1523_v14 = vld [vmem:[%s2087_s3 + $0x80] ss:$16 sps:$4 sm:$0xff]  }
  0x11   : > { %v1524_v15 = vld [vmem:[%s2087_s3 + $0x88] ss:$16 sps:$4 sm:$0xff]   ;;  %v1525_v16 = vld [vmem:[%s2087_s3 + $0x64] ss:$16 sps:$4 sm:$0xff]   ;;  %v1527_v17 = vld [vmem:[%s2087_s3 + $0x6c] ss:$16 sps:$4 sm:$0xff]  }
  0x12   : > { %973 = vmatpush1.bf16.msra.mxu0 %v1511_v6  ;;  %1046 = vmatpush1.bf16.msra.mxu1 %v1512_v7  ;;  %v1529_v18 = vld [vmem:[%s2087_s3 + $0x60] ss:$16 sps:$4 sm:$0xff]   ;;  %v1530_v19 = vld [vmem:[%s2087_s3 + $0x68] ss:$16 sps:$4 sm:$0xff]   ;;  %v1531_v20 = vld [vmem:[%s2087_s3 + $0x44] ss:$16 sps:$4 sm:$0xff]  }
  0x13   : > { %974 = vmatprep.subr.bf16.mxu0 %v1513_v8  ;;  %1047 = vmatprep.subr.bf16.mxu1 %v1515_v9  ;;  %v1533_v21 = vld [vmem:[%s2087_s3 + $0x4c] ss:$16 sps:$4 sm:$0xff]   ;;  %v1535_v22 = vld [vmem:[%s2087_s3 + $0x40] ss:$16 sps:$4 sm:$0xff]   ;;  %v1536_v23 = vld [vmem:[%s2087_s3 + $0x48] ss:$16 sps:$4 sm:$0xff]  }
  0x14   : > { %v1537_v24 = vld [vmem:[%s2087_s3 + $0x24] ss:$16 sps:$4 sm:$0xff]   ;;  %v1539_v25 = vld [vmem:[%s2087_s3 + $0x2c] ss:$16 sps:$4 sm:$0xff]   ;;  %v1541_v26 = vld [vmem:[%s2087_s3 + $0x20] ss:$16 sps:$4 sm:$0xff]  }
  0x15   : > { %v1542_v27 = vld [vmem:[%s2087_s3 + $0x28] ss:$16 sps:$4 sm:$0xff]   ;;  %v1543_v28 = vld [vmem:[%s2087_s3 + $0x4] ss:$16 sps:$4 sm:$0xff]   ;;  %v1545_v29 = vld [vmem:[%s2087_s3 + $0xc] ss:$16 sps:$4 sm:$0xff]  }
  0x16   : > { %975 = vmatpush1.bf16.msra.mxu0 %v1517_v10  ;;  %1048 = vmatpush1.bf16.msra.mxu1 %v1518_v11  ;;  %v1547_v30 = vld [vmem:[%s2087_s3] ss:$16 sps:$4 sm:$0xff]   ;;  %v1548_v31 = vld [vmem:[%s2087_s3 + $0x8] ss:$16 sps:$4 sm:$0xff]   ;;  %v1549_v32 = vld [vmem:[%s2087_s3 + $0x1e4] ss:$16 sps:$4 sm:$0xff]  }
  0x17   : > { %976 = vmatprep.subr.bf16.mxu0 %v1519_v12  ;;  %1049 = vmatprep.subr.bf16.mxu1 %v1521_v13  ;;  %v1551_v33 = vld [vmem:[%s2087_s3 + $0x1ec] ss:$16 sps:$4 sm:$0xff]   ;;  %v1553_v34 = vld [vmem:[%s2087_s3 + $0x1e0] ss:$16 sps:$4 sm:$0xff]   ;;  %v1554_v35 = vld [vmem:[%s2087_s3 + $0x1e8] ss:$16 sps:$4 sm:$0xff]  }
  0x18   : > { %v1555_v36 = vld [vmem:[%s2087_s3 + $0x1c4] ss:$16 sps:$4 sm:$0xff]   ;;  %v1557_v37 = vld [vmem:[%s2087_s3 + $0x1cc] ss:$16 sps:$4 sm:$0xff]   ;;  %s2096_s21 = smov (!%p331_p4, %s1613_s21), 1  ;;  %v1856_v59 = vshrl.u32 %v402_v52, 7 }
  0x19   : > { %v1559_v38 = vld [vmem:[%s2087_s3 + $0x1c0] ss:$16 sps:$4 sm:$0xff]   ;;  %v1560_v39 = vld [vmem:[%s2087_s3 + $0x1c8] ss:$16 sps:$4 sm:$0xff]   ;;  %v1561_v40 = vld [vmem:[%s2087_s3 + $0x1a4] ss:$16 sps:$4 sm:$0xff]  }
  0x1a   : > { %977 = vmatpush1.bf16.msra.mxu0 %v1523_v14  ;;  %1050 = vmatpush1.bf16.msra.mxu1 %v1524_v15  ;;  %v1563_v41 = vld [vmem:[%s2087_s3 + $0x1ac] ss:$16 sps:$4 sm:$0xff]   ;;  %s1466_s29 = sshll.u32 %s2096_s21, 2  ;;  %v1565_v42 = vld [vmem:[%s2087_s3 + $0x1a0] ss:$16 sps:$4 sm:$0xff]   ;;  %s1385_s15 = sshll.u32 %s2096_s21, 1 }
  0x1b   : > { %978 = vmatprep.subr.bf16.mxu0 %v1525_v16  ;;  %1051 = vmatprep.subr.bf16.mxu1 %v1527_v17  ;;  %v1566_v43 = vld [vmem:[%s2087_s3 + $0x1a8] ss:$16 sps:$4 sm:$0xff]   ;;  %v1567_v44 = vld [vmem:[%s2087_s3 + $0x184] ss:$16 sps:$4 sm:$0xff]   ;;  %s345_s14 = scalar_lea.vmem %s2085_s1, %s1466_s29  ;;  %v1569_v45 = vld [vmem:[%s2087_s3 + $0x18c] ss:$16 sps:$4 sm:$0xff]   ;;  %s349_s10 = scalar_lea.vmem %s2086_s2, %s1385_s15 }
  0x1c   : > { %v428_v46 = vld [vmem:[%s345_s14] sm:$0xf]  ;;  %v1572_v48 = vld [vmem:[%s2087_s3 + $0x188] ss:$16 sps:$4 sm:$0xff]   ;;  %v1573_v49 = vld [vmem:[%s2087_s3 + $0x164] ss:$16 sps:$4 sm:$0xff]   ;;  %s353_s13 = scalar_lea.vmem %s2088_s4, %s1466_s29 }
  0x1d   : > { %v1571_v47 = vld [vmem:[%s2087_s3 + $0x180] ss:$16 sps:$4 sm:$0xff]   ;;  %v1575_v50 = vld [vmem:[%s2087_s3 + $0x16c] ss:$16 sps:$4 sm:$0xff]   ;;  %v1838_v51 = vmul.f32 0.015625, %v428_v46  ;;  %s1465_s14 = sshll.u32 %s2096_s21, 6 }
  0x1e   : > { %979 = vmatpush1.bf16.msra.mxu0 %v1529_v18  ;;  %1052 = vmatpush1.bf16.msra.mxu1 %v1530_v19  ;;  %v1577_v54 = vld [vmem:[%s2087_s3 + $0x160] ss:$16 sps:$4 sm:$0xff]   ;;  %v1578_v55 = vld [vmem:[%s2087_s3 + $0x168] ss:$16 sps:$4 sm:$0xff]   ;;  %v1579_v56 = vld [vmem:[%s2087_s3 + $0x144] ss:$16 sps:$4 sm:$0xff]   ;;  %s1870_s26 = scalar_lea.vmem %s2084_s0, %s1465_s14 }
  0x1f   : > { %980 = vmatprep.subr.bf16.mxu0 %v1531_v20  ;;  %1053 = vmatprep.subr.bf16.mxu1 %v1533_v21  ;;  %v430_v53 = vmul.f32 %v1838_v51, %v1838_v51  ;;  %v1581_v57 = vld [vmem:[%s2087_s3 + $0x14c] ss:$16 sps:$4 sm:$0xff]   ;;  %v1583_v61 = vld [vmem:[%s2087_s3 + $0x140] ss:$16 sps:$4 sm:$0xff]   ;;  %v1584_v62 = vld [vmem:[%s2087_s3 + $0x148] ss:$16 sps:$4 sm:$0xff]  }
  0x20   : > { %v1585_v63 = vld [vmem:[%s2087_s3 + $0x124] ss:$16 sps:$4 sm:$0xff]   ;;  %v1587_v0 = vld [vmem:[%s2087_s3 + $0x12c] ss:$16 sps:$4 sm:$0xff]   ;;  %v1589_v2 = vld [vmem:[%s2087_s3 + $0x120] ss:$16 sps:$4 sm:$0xff]  }
  0x21   : > { %v432_v58 = vrot.slane %v430_v53, 7  ;;  %v404_v3 = vsub.s32 0, %v1856_v59  ;;  %v1590_v4 = vld [vmem:[%s2087_s3 + $0x128] ss:$16 sps:$4 sm:$0xff]   ;;  %v376_v5 = vld [vmem:[%s1870_s26] sm:$0xff]  ;;  %v1895_v6 = vsub.s32 1, %v1856_v59 }
  0x22   : > { %981 = vmatpush1.bf16.msra.mxu0 %v1535_v22  ;;  %1054 = vmatpush1.bf16.msra.mxu1 %v1536_v23  ;;  %v377_v8 = vld [vmem:[%s1870_s26 + $0x8] sm:$0xff]  ;;  %v400_v9 = vld [vmem:[%s349_s10] sm:$0x3]  ;;  %v445_v10 = vsub.s32 2, %v1856_v59  ;;  %v1591_v12 = vld [vmem:[%s2087_s3 + $0x104] ss:$16 sps:$4 sm:$0xff]   ;;  %v385_v15 = vunpack.c.h.bf16 %v376_v5  ;;  %v384_v22 = vunpack.c.l.bf16 %v376_v5 }
  0x23   : > { %982 = vmatprep.subr.bf16.mxu0 %v1537_v24  ;;  %1055 = vmatprep.subr.bf16.mxu1 %v1539_v25  ;;  %v434_v60 = vsub.f32 %v1838_v51, %v432_v58  ;;  %v1899_v11 = vld [vmem:[%s353_s13] sm:$0xf]  ;;  %v1593_v13 = vld [vmem:[%s2087_s3 + $0x10c] ss:$16 sps:$4 sm:$0xff]   ;;  %v387_v16 = vunpack.c.h.bf16 %v377_v8  ;;  %v409_v17 = vrot.slane %v400_v9, %v1895_v6  ;;  %v378_v18 = vld [vmem:[%s1870_s26 + $0x10] sm:$0xff]  ;;  %v405_v23 = vrot.slane %v400_v9, %v404_v3  ;;  %s2022_s13 = scalar_lea.vmem %s2090_s6, %s1465_s14 }
  0x24   : > { %v1908_v14 = vrot.slane %v1899_v11, %v404_v3  ;;  %v379_v19 = vld [vmem:[%s1870_s26 + $0x18] sm:$0xff]  ;;  %v1595_v20 = vld [vmem:[%s2087_s3 + $0x100] ss:$16 sps:$4 sm:$0xff]   ;;  %v446_v24 = vrot.slane %v1838_v51, %v445_v10  ;;  %v386_v25 = vunpack.c.l.bf16 %v377_v8 }
  0x25   : > { %v435_v1 = vmax.f32 %v434_v60, 0.0  ;;  %v1596_v21 = vld [vmem:[%s2087_s3 + $0x108] ss:$16 sps:$4 sm:$0xff]  }
  0x26   : > { %983 = vmatpush1.bf16.msra.mxu0 %v1541_v26  ;;  %1056 = vmatpush1.bf16.msra.mxu1 %v1542_v27  ;;  %v442_v26 = vrot.slane %v1838_v51, %v404_v3  ;;  %v380_v27 = vld [vmem:[%s1870_s26 + $0x20] sm:$0xff] }
  0x27   : > { %984 = vmatprep.subr.bf16.mxu0 %v1543_v28  ;;  %1057 = vmatprep.subr.bf16.mxu1 %v1545_v29  ;;  %v436_v7 = vadd.f32 1e-05, %v435_v1  ;;  %v381_v28 = vld [vmem:[%s1870_s26 + $0x28] sm:$0xff]  ;;  %v389_v29 = vunpack.c.h.bf16 %v378_v18 }
  0x29   : > { %1597 = vrsqrt.f32 %v436_v7 }
  0x2a   : > { %985 = vmatpush1.bf16.msra.mxu0 %v1547_v30  ;;  %1058 = vmatpush1.bf16.msra.mxu1 %v1548_v31  ;;  %v391_v30 = vunpack.c.h.bf16 %v379_v19  ;;  %v413_v31 = vadd.f32 %v409_v17, %v385_v15 }
  0x2b   : > { %986 = vmatprep.subr.bf16.mxu0 %v1549_v32  ;;  %1059 = vmatprep.subr.bf16.mxu1 %v1551_v33  ;;  %v415_v32 = vadd.f32 %v409_v17, %v387_v16  ;;  %v388_v33 = vunpack.c.l.bf16 %v378_v18 }
  0x2e   : > { %987 = vmatpush2.bf16.msra.mxu0 %v1553_v34  ;;  %1060 = vmatpush2.bf16.msra.mxu1 %v1554_v35  ;;  %v390_v34 = vunpack.c.l.bf16 %v379_v19  ;;  %v382_v35 = vld [vmem:[%s1870_s26 + $0x30] sm:$0xff] }
  0x2f   : > { %988 = vmatprep.subr.bf16.mxu0 %v1555_v36  ;;  %1061 = vmatprep.subr.bf16.mxu1 %v1557_v37  ;;  %v383_v36 = vld [vmem:[%s1870_s26 + $0x38] sm:$0xff]  ;;  %v1927_v37 = vrot.slane %v446_v24, %v404_v3  ;;  %v397_v46 = vunpack.c.h.bf16 %v382_v35  ;;  %s1467_s26 = sshll.u32 %s2096_s21, 7 }
  0x30   : > { %v418_v51 = vadd.f32 %v405_v23, %v390_v34  ;;  %v398_v1 = vunpack.c.l.bf16 %v383_v36  ;;  %s2010_s10 = scalar_lea.vmem %s2089_s5, %s1467_s26 }
  0x31   : > { %v458_v52 = vsub.f32 %v413_v31, %v1927_v37  ;;  %v460_v53 = vsub.f32 %v415_v32, %v1927_v37 }
  0x32   : > { %989 = vmatpush2.bf16.msra.mxu0 %v1559_v38  ;;  %1062 = vmatpush2.bf16.msra.mxu1 %v1560_v39  ;;  %v412_v38 = vadd.f32 %v405_v23, %v384_v22  ;;  %v393_v39 = vunpack.c.h.bf16 %v380_v27 }
  0x33   : > { %990 = vmatprep.subr.bf16.mxu0 %v1561_v40  ;;  %1063 = vmatprep.subr.bf16.mxu1 %v1563_v41  ;;  %v395_v40 = vunpack.c.h.bf16 %v381_v28  ;;  %v414_v41 = vadd.f32 %v405_v23, %v386_v25 }
  0x36   : > { %991 = vmatpush2.bf16.msra.mxu0 %v1565_v42  ;;  %1064 = vmatpush2.bf16.msra.mxu1 %v1566_v43  ;;  %v1929_v42 = vrot.slane %v442_v26, %v404_v3  ;;  %v392_v43 = vunpack.c.l.bf16 %v380_v27 }
  0x37   : > { %992 = vmatprep.subr.bf16.mxu0 %v1567_v44  ;;  %1065 = vmatprep.subr.bf16.mxu1 %v1569_v45  ;;  %v394_v44 = vunpack.c.l.bf16 %v381_v28  ;;  %v480_v45 = vsub.s32 3, %v1856_v59 }
  0x38   : > { %v420_v58 = vadd.f32 %v405_v23, %v392_v43  ;;  %v463_v8 = vsub.f32 %v418_v51, %v1929_v42 }
  0x39   : > { %v1938_v60 = vadd.f32 %v405_v23, %v394_v44 }
  0x3a   : > { %993 = vmatpush2.bf16.msra.mxu0 %v1571_v47  ;;  %1066 = vmatpush2.bf16.msra.mxu1 %v1572_v48  ;;  %v399_v47 = vunpack.c.h.bf16 %v383_v36  ;;  %v417_v48 = vadd.f32 %v409_v17, %v389_v29  ;;  %v465_v16 = vsub.f32 %v420_v58, %v1929_v42 }
  0x3b   : > { %994 = vmatprep.subr.bf16.mxu0 %v1573_v49  ;;  %1067 = vmatprep.subr.bf16.mxu1 %v1575_v50  ;;  %v419_v49 = vadd.f32 %v409_v17, %v391_v30  ;;  %v416_v50 = vadd.f32 %v405_v23, %v388_v33 }
  0x3d   : > { %v464_v5 = vsub.f32 %v419_v49, %v1927_v37  ;;  %v461_v7 = vsub.f32 %v416_v50, %v1929_v42 }
  0x3e   : > { %995 = vmatpush2.bf16.msra.mxu0 %v1577_v54  ;;  %1068 = vmatpush2.bf16.msra.mxu1 %v1578_v55  ;;  %v421_v54 = vadd.f32 %v409_v17, %v393_v39  ;;  %v1934_v55 = vadd.f32 %v409_v17, %v395_v40 }
  0x3f   : > { %996 = vmatprep.subr.bf16.mxu0 %v1579_v56  ;;  %1069 = vmatprep.subr.bf16.mxu1 %v1581_v57  ;;  %v457_v56 = vsub.f32 %v412_v38, %v1929_v42  ;;  %v459_v57 = vsub.f32 %v414_v41, %v1929_v42 }
  0x40   : > { %v466_v9 = vsub.f32 %v421_v54, %v1927_v37 }
  0x42   : > { %997 = vmatpush2.bf16.msra.mxu0 %v1583_v61  ;;  %1070 = vmatpush2.bf16.msra.mxu1 %v1584_v62  ;;  %v1598_v61 = vpop.eup %1597  ;;  %v1940_v62 = vadd.f32 %v409_v17, %v397_v46 }
  0x43   : > { %998 = vmatprep.subr.bf16.mxu0 %v1585_v63  ;;  %1071 = vmatprep.subr.bf16.mxu1 %v1587_v0  ;;  %v1942_v63 = vadd.f32 %v409_v17, %v399_v47  ;;  %v396_v0 = vunpack.c.l.bf16 %v382_v35  ;;  %v477_v3 = vrot.slane %v1598_v61, %v1895_v6  ;;  %v467_v17 = vsub.f32 %v1938_v60, %v1929_v42 }
  0x44   : > { %v470_v18 = vsub.f32 %v1940_v62, %v1927_v37 }
  0x45   : > { %v1958_v15 = vrot.slane %v477_v3, %v1895_v6  ;;  %v472_v19 = vsub.f32 %v1942_v63, %v1927_v37 }
  0x46   : > { %999 = vmatpush2.bf16.msra.mxu0 %v1589_v2  ;;  %1072 = vmatpush2.bf16.msra.mxu1 %v1590_v4  ;;  %v481_v2 = vrot.slane %v1598_v61, %v480_v45  ;;  %v462_v4 = vsub.f32 %v417_v48, %v1927_v37 }
  0x47   : > { %1000 = vmatprep.subr.bf16.mxu0 %v1591_v12  ;;  %1073 = vmatprep.subr.bf16.mxu1 %v1593_v13  ;;  %v468_v12 = vsub.f32 %v1934_v55, %v1927_v37  ;;  %v492_v25 = vmul.f32 %v1958_v15, %v457_v56  ;;  %v494_v26 = vmul.f32 %v1958_v15, %v459_v57 }
  0x48   : > { %v1955_v13 = vrot.slane %v481_v2, %v1895_v6  ;;  %v496_v29 = vmul.f32 %v1958_v15, %v461_v7  ;;  %v498_v30 = vmul.f32 %v1958_v15, %v463_v8  ;;  %v500_v50 = vmul.f32 %v1958_v15, %v465_v16 }
  0x49   : > { %vm508_vm2 = vcmp.gt.f32.partialorder %v492_v25, 0.0  ;;  %vm510_vm3 = vcmp.gt.f32.partialorder %v494_v26, 0.0  ;;  %v524_v32 = vmul.f32 0.2, %v492_v25  ;;  %v526_v33 = vmul.f32 0.2, %v494_v26 }
  0x4a   : > { %1001 = vmatpush2.bf16.msra.mxu0 %v1595_v20  ;;  %1074 = vmatpush2.bf16.msra.mxu1 %v1596_v21  ;;  %v1967_v20 = vadd.f32 %v405_v23, %v396_v0  ;;  %v1969_v21 = vadd.f32 %v405_v23, %v398_v1  ;;  %v493_v22 = vmul.f32 %v1955_v13, %v458_v52  ;;  %vm512_vm6 = vcmp.gt.f32.partialorder %v496_v29, 0.0 }
  0x4b   : > { %v495_v24 = vmul.f32 %v1955_v13, %v460_v53  ;;  %v497_v27 = vmul.f32 %v1955_v13, %v462_v4  ;;  %v499_v28 = vmul.f32 %v1955_v13, %v464_v5  ;;  %v540_v37 = vsel %vm508_vm2, %v492_v25, %v524_v32 }
  0x4c   : > { %vm509_vm0 = vcmp.gt.f32.partialorder %v493_v22, 0.0  ;;  %v525_v23 = vmul.f32 0.2, %v493_v22  ;;  %v542_v38 = vsel %vm510_vm3, %v494_v26, %v526_v33  ;;  %vm514_vm7 = vcmp.gt.f32.partialorder %v498_v30, 0.0 }
  0x4d   : > { %vm511_vm1 = vcmp.gt.f32.partialorder %v495_v24, 0.0  ;;  %v527_v31 = vmul.f32 0.2, %v495_v24  ;;  %vm513_vm4 = vcmp.gt.f32.partialorder %v497_v27, 0.0  ;;  %vm515_vm5 = vcmp.gt.f32.partialorder %v499_v28, 0.0 }
  0x4e   : > { %v541_v34 = vsel %vm509_vm0, %v493_v22, %v525_v23  ;;  %v529_v39 = vmul.f32 0.2, %v497_v27  ;;  %v556_v40 = vpack.c.bf16 %v542_v38, %v540_v37  ;;  %v531_v41 = vmul.f32 0.2, %v499_v28 }
  0x4f   : > { %v543_v35 = vsel %vm511_vm1, %v495_v24, %v527_v31  ;;  %v528_v44 = vmul.f32 0.2, %v496_v29  ;;  %v530_v46 = vmul.f32 0.2, %v498_v30  ;;  %v501_v47 = vmul.f32 %v1955_v13, %v466_v9 }
  0x50   : > { %v557_v36 = vpack.c.bf16 %v543_v35, %v541_v34  ;;  %v545_v43 = vsel %vm513_vm4, %v497_v27, %v529_v39  ;;  %v547_v48 = vsel %vm515_vm5, %v499_v28, %v531_v41  ;;  %v503_v49 = vmul.f32 %v1955_v13, %v468_v12 }
  0x51   : > { %v559_v51 = vpack.c.bf16 %v547_v48, %v545_v43  ;;  %v544_v52 = vsel %vm512_vm6, %v496_v29, %v528_v44  ;;  %v546_v53 = vsel %vm514_vm7, %v498_v30, %v530_v46  ;;  %vm517_vm8 = vcmp.gt.f32.partialorder %v501_v47, 0.0 }
  0x52   : > { %1002 = vmatprep.mubr.bf16.mxu0 %v557_v36  ;;  %1075 = vmatprep.mubr.bf16.mxu1 %v557_v36  ;;  %vm519_vm9 = vcmp.gt.f32.partialorder %v503_v49, 0.0  ;;  %v533_v54 = vmul.f32 0.2, %v501_v47  ;;  %v535_v55 = vmul.f32 0.2, %v503_v49  ;;  %v502_v56 = vmul.f32 %v1958_v15, %v467_v17 }
  0x53   : > { %1003 = vmatmul.mubr.bf16.vlgmr.msra.gmra.mxu0 %v556_v40  ;;  %1076 = vmatmul.mubr.bf16.vlgmr.msra.gmra.mxu1 %v556_v40  ;;  %v505_v57 = vmul.f32 %v1955_v13, %v470_v18  ;;  %v469_v58 = vsub.f32 %v1967_v20, %v1929_v42  ;;  %v558_v60 = vpack.c.bf16 %v546_v53, %v544_v52  ;;  %v532_v1 = vmul.f32 0.2, %v500_v50 }
  0x54   : > { %1012 = vmatprep.mubr.bf16.mxu0 %v559_v51  ;;  %1085 = vmatprep.mubr.bf16.mxu1 %v559_v51  ;;  %v549_v61 = vsel %vm517_vm8, %v501_v47, %v533_v54  ;;  %v551_v62 = vsel %vm519_vm9, %v503_v49, %v535_v55  ;;  %v507_v63 = vmul.f32 %v1955_v13, %v472_v19  ;;  %v534_v2 = vmul.f32 0.2, %v502_v56 }
  0x55   : > { %v561_v0 = vpack.c.bf16 %v551_v62, %v549_v61  ;;  %v471_v3 = vsub.f32 %v1969_v21, %v1929_v42  ;;  %vm516_vm10 = vcmp.gt.f32.partialorder %v500_v50, 0.0  ;;  %vm518_vm11 = vcmp.gt.f32.partialorder %v502_v56, 0.0 }
  0x56   : > { %v537_v4 = vmul.f32 0.2, %v505_v57  ;;  %v539_v5 = vmul.f32 0.2, %v507_v63  ;;  %vm521_vm12 = vcmp.gt.f32.partialorder %v505_v57, 0.0  ;;  %vm523_vm13 = vcmp.gt.f32.partialorder %v507_v63, 0.0 }
  0x57   : > { %v504_v7 = vmul.f32 %v1958_v15, %v469_v58  ;;  %v548_v8 = vsel %vm516_vm10, %v500_v50, %v532_v1  ;;  %v550_v9 = vsel %vm518_vm11, %v502_v56, %v534_v2  ;;  %v506_v12 = vmul.f32 %v1958_v15, %v471_v3 }
  0x58   : > { %v553_v13 = vsel %vm521_vm12, %v505_v57, %v537_v4  ;;  %v555_v16 = vsel %vm523_vm13, %v507_v63, %v539_v5  ;;  %v560_v42 = vpack.c.bf16 %v550_v9, %v548_v8  ;;  %v1996_v15 = vrot.slane %v1899_v11, %v445_v10 }
  0x59   : > { %v563_v17 = vpack.c.bf16 %v555_v16, %v553_v13  ;;  %v536_v18 = vmul.f32 0.2, %v504_v7  ;;  %v538_v19 = vmul.f32 0.2, %v506_v12  ;;  %vm520_vm14 = vcmp.gt.f32.partialorder %v504_v7, 0.0 }
  0x5a   : > { %vm522_vm15 = vcmp.gt.f32.partialorder %v506_v12, 0.0  ;;  %v2000_v24 = vrot.slane %v1899_v11, %v1895_v6  ;;  %v2005_v25 = vrot.slane %v1899_v11, %v480_v45 }
  0x5b   : > { %1013 = vmatmul.mubr.bf16.gmra.mxu0 %v558_v60  ;;  %1086 = vmatmul.mubr.bf16.gmra.mxu1 %v558_v60  ;;  %v552_v20 = vsel %vm520_vm14, %v504_v7, %v536_v18  ;;  %v554_v21 = vsel %vm522_vm15, %v506_v12, %v538_v19 }
  0x5c   : > { %1022 = vmatprep.mubr.bf16.mxu0 %v561_v0  ;;  %1095 = vmatprep.mubr.bf16.mxu1 %v561_v0  ;;  %v562_v22 = vpack.c.bf16 %v554_v21, %v552_v20 }
  0x63   : > { %1023 = vmatmul.mubr.bf16.gmra.mxu0 %v560_v42  ;;  %1096 = vmatmul.mubr.bf16.gmra.mxu1 %v560_v42 }
  0x64   : > { %1032 = vmatprep.mubr.bf16.mxu0 %v563_v17  ;;  %1105 = vmatprep.mubr.bf16.mxu1 %v563_v17 }
  0x6b   : > { %1033 = vmatmul.mubr.bf16.gmra.mxu0 %v562_v22  ;;  %1106 = vmatmul.mubr.bf16.gmra.mxu1 %v562_v22 }
 0x113   : > { %v1004_v26 = vpop.f32.mrf.mxu0  ;;  %v1077_v27 = vpop.f32.mrf.mxu1 }
 0x114   : > { %v1005_v10 = vadd.f32 %v1004_v26, %v1908_v14  ;;  %v1078_v59 = vadd.f32 %v1077_v27, %v1996_v15 }
 0x115   : > { %v1006_v28 = vpop.f32.mrf.mxu0  ;;  %v1079_v6 = vpop.f32.mrf.mxu1 }
 0x116   : > { %1116 = vst [vmem:[%s2010_s10] sm:$0xff] %v1005_v10  ;;  %v1007_v11 = vadd.f32 %v1006_v28, %v2000_v24  ;;  %v1080_v45 = vadd.f32 %v1079_v6, %v2005_v25 }
 0x117   : > { %v1008_v29 = vpop.f32.mrf.mxu0  ;;  %v1081_v30 = vpop.f32.mrf.mxu1 }
 0x118   : > { %1117 = vst [vmem:[%s2010_s10 + $0x8] sm:$0xff] %v1007_v11  ;;  %v1469_v23 = vpack.c.bf16 %v1080_v45, %v1078_v59  ;;  %v1009_v31 = vadd.f32 %v1008_v29, %v1908_v14  ;;  %v1082_v34 = vadd.f32 %v1081_v30, %v1996_v15 }
 0x119   : > { %v1010_v32 = vpop.f32.mrf.mxu0  ;;  %v1083_v33 = vpop.f32.mrf.mxu1 }
 0x11a   : > { %1180 = vst [vmem:[%s2022_s13] sm:$0xff] %v1469_v23  ;;  %1118 = vst [vmem:[%s2010_s10 + $0x10] sm:$0xff] %v1009_v31  ;;  %v1011_v35 = vadd.f32 %v1010_v32, %v2000_v24  ;;  %v1084_v36 = vadd.f32 %v1083_v33, %v2005_v25 }
 0x11b   : > { %v1014_v37 = vpop.f32.mrf.mxu0  ;;  %v1087_v38 = vpop.f32.mrf.mxu1 }
 0x11c   : > { %1119 = vst [vmem:[%s2010_s10 + $0x18] sm:$0xff] %v1011_v35  ;;  %v1470_v39 = vpack.c.bf16 %v1084_v36, %v1082_v34  ;;  %v1015_v40 = vadd.f32 %v1014_v37, %v1908_v14  ;;  %v1088_v44 = vadd.f32 %v1087_v38, %v1996_v15 }
 0x11d   : > { %v1016_v41 = vpop.f32.mrf.mxu0  ;;  %v1089_v43 = vpop.f32.mrf.mxu1 }
 0x11e   : > { %1181 = vst [vmem:[%s2022_s13 + $0x8] sm:$0xff] %v1470_v39  ;;  %1120 = vst [vmem:[%s2010_s10 + $0x20] sm:$0xff] %v1015_v40  ;;  %v1017_v46 = vadd.f32 %v1016_v41, %v2000_v24  ;;  %v1090_v47 = vadd.f32 %v1089_v43, %v2005_v25 }
 0x11f   : > { %v1018_v48 = vpop.f32.mrf.mxu0  ;;  %v1091_v49 = vpop.f32.mrf.mxu1 }
 0x120   : > { %1121 = vst [vmem:[%s2010_s10 + $0x28] sm:$0xff] %v1017_v46  ;;  %v1471_v50 = vpack.c.bf16 %v1090_v47, %v1088_v44  ;;  %v1019_v51 = vadd.f32 %v1018_v48, %v1908_v14  ;;  %v1092_v54 = vadd.f32 %v1091_v49, %v1996_v15 }
 0x121   : > { %v1020_v52 = vpop.f32.mrf.mxu0  ;;  %v1093_v53 = vpop.f32.mrf.mxu1 }
 0x122   : > { %1182 = vst [vmem:[%s2022_s13 + $0x10] sm:$0xff] %v1471_v50  ;;  %1122 = vst [vmem:[%s2010_s10 + $0x30] sm:$0xff] %v1019_v51  ;;  %v1021_v55 = vadd.f32 %v1020_v52, %v2000_v24  ;;  %v1094_v56 = vadd.f32 %v1093_v53, %v2005_v25 }
 0x123   : > { %v1024_v57 = vpop.f32.mrf.mxu0  ;;  %v1097_v58 = vpop.f32.mrf.mxu1 }
 0x124   : > { %1123 = vst [vmem:[%s2010_s10 + $0x38] sm:$0xff] %v1021_v55  ;;  %v1472_v60 = vpack.c.bf16 %v1094_v56, %v1092_v54  ;;  %v1025_v61 = vadd.f32 %v1024_v57, %v1908_v14  ;;  %v1098_v0 = vadd.f32 %v1097_v58, %v1996_v15 }
 0x125   : > { %v1026_v62 = vpop.f32.mrf.mxu0  ;;  %v1099_v63 = vpop.f32.mrf.mxu1 }
 0x126   : > { %1183 = vst [vmem:[%s2022_s13 + $0x18] sm:$0xff] %v1472_v60  ;;  %1124 = vst [vmem:[%s2010_s10 + $0x40] sm:$0xff] %v1025_v61  ;;  %v1027_v1 = vadd.f32 %v1026_v62, %v2000_v24  ;;  %v1100_v2 = vadd.f32 %v1099_v63, %v2005_v25 }
 0x127   : > { %v1028_v3 = vpop.f32.mrf.mxu0  ;;  %v1101_v4 = vpop.f32.mrf.mxu1 }
 0x128   : > { %1125 = vst [vmem:[%s2010_s10 + $0x48] sm:$0xff] %v1027_v1  ;;  %v1473_v5 = vpack.c.bf16 %v1100_v2, %v1098_v0  ;;  %v1029_v7 = vadd.f32 %v1028_v3, %v1908_v14  ;;  %v1102_v12 = vadd.f32 %v1101_v4, %v1996_v15 }
 0x129   : > { %v1030_v8 = vpop.f32.mrf.mxu0  ;;  %v1103_v9 = vpop.f32.mrf.mxu1 }
 0x12a   : > { %1184 = vst [vmem:[%s2022_s13 + $0x20] sm:$0xff] %v1473_v5  ;;  %1126 = vst [vmem:[%s2010_s10 + $0x50] sm:$0xff] %v1029_v7  ;;  %v1031_v13 = vadd.f32 %v1030_v8, %v2000_v24  ;;  %v1104_v16 = vadd.f32 %v1103_v9, %v2005_v25 }
 0x12b   : > { %v1034_v42 = vpop.f32.mrf.mxu0  ;;  %v1107_v17 = vpop.f32.mrf.mxu1 }
 0x12c   : > { %1127 = vst [vmem:[%s2010_s10 + $0x58] sm:$0xff] %v1031_v13  ;;  %v1474_v18 = vpack.c.bf16 %v1104_v16, %v1102_v12  ;;  %v1035_v19 = vadd.f32 %v1034_v42, %v1908_v14  ;;  %v1108_v22 = vadd.f32 %v1107_v17, %v1996_v15 }
 0x12d   : > { %v1036_v20 = vpop.f32.mrf.mxu0  ;;  %v1109_v21 = vpop.f32.mrf.mxu1 }
 0x12e   : > { %1185 = vst [vmem:[%s2022_s13 + $0x28] sm:$0xff] %v1474_v18  ;;  %1128 = vst [vmem:[%s2010_s10 + $0x60] sm:$0xff] %v1035_v19  ;;  %v1037_v26 = vadd.f32 %v1036_v20, %v2000_v24  ;;  %v1110_v27 = vadd.f32 %v1109_v21, %v2005_v25 }
 0x12f   : > { %v1038_v10 = vpop.f32.mrf.mxu0  ;;  %v1111_v28 = vpop.f32.mrf.mxu1 }
 0x130   : > { %1129 = vst [vmem:[%s2010_s10 + $0x68] sm:$0xff] %v1037_v26  ;;  %v1475_v6 = vpack.c.bf16 %v1110_v27, %v1108_v22  ;;  %v1039_v59 = vadd.f32 %v1038_v10, %v1908_v14  ;;  %v1112_v29 = vadd.f32 %v1111_v28, %v1996_v15 }
 0x131   : > { %v1040_v11 = vpop.f32.mrf.mxu0  ;;  %v1113_v45 = vpop.f32.mrf.mxu1 }
 0x132   : > { %1186 = vst [vmem:[%s2022_s13 + $0x30] sm:$0xff] %v1475_v6  ;;  %1130 = vst [vmem:[%s2010_s10 + $0x70] sm:$0xff] %v1039_v59  ;;  %v1041_v30 = vadd.f32 %v1040_v11, %v2000_v24  ;;  %v1114_v23 = vadd.f32 %v1113_v45, %v2005_v25 }
 0x134   : > { %1131 = vst [vmem:[%s2010_s10 + $0x78] sm:$0xff] %v1041_v30  ;;  %v1476_v31 = vpack.c.bf16 %v1114_v23, %v1112_v29 }
 0x136   : > { %1187 = vst [vmem:[%s2022_s13 + $0x38] sm:$0xff] %v1476_v31 }
 0x137 PF: > { %s17_s23 = sadd.s32 1, %s1621_s23   ;;  %s2091_s21 = smov %s1617_s22 }
 0x138   : > { %p14_p5 = scmp.ge.s32.totalorder %s17_s23, 4   ;;  %s2092_s22 = smov %s2094_s24 }
 0x13a   :  { %16 = sbr.rel (!%p14_p5) target bundleno = 2 (0x2), region = 91 }

// kernel: teethgnn_forward.19
= control target key start
LH: loop header
LB: loop body
LE: loop exit
PB: predicated region body
PF: predicated region fallthrough
CT: control target
= control target key end

     0   :  { %s777_s15 = smov 0   ;;  %s779_s16 = smov 0   ;;  %s854_s0 = inlined_call_operand.vmem [shape: bf16[2,64,128], index: 0, kind: input, shape index: {}]   ;;  %s855_s1 = inlined_call_operand.vmem [shape: f32[2,2,128], index: 1, kind: input, shape index: {}]   ;;  %s856_s2 = inlined_call_operand.vmem [shape: bf16[128,8], index: 2, kind: input, shape index: {}]   ;;  %s857_s3 = inlined_call_operand.vmem [shape: f32[2,1,8], index: 3, kind: input, shape index: {}]   ;;  %s858_s4 = inlined_call_operand.vmem [shape: f32[2,64,8], index: 4, kind: output, shape index: {}]  }
   0x1   :  { %s781_s17 = smov 0  }
   0x2 LB: > { %s26_s18 = sadd.s32 1, %s746_s16  ;;  %p604_p0 = scmp.ge.s32.totalorder %s750_s17, 1  ;;  %s750_s17 = sphi %s781_s17, %s14_s17   ;;  %s746_s16 = sphi %s779_s16, %s860_s16   ;;  %s742_s15 = sphi %s777_s15, %s859_s15  }
   0x3   : > { %p28_p1 = scmp.ge.s32.totalorder %s26_s18, 2  ;;  %p200_p2 = scmp.lt.s32.totalorder %s750_s17, 3 }
   0x5   : > { %s862_s18 = smov (%p28_p1, %s26_s18), 0  ;;  %p201_p3 = pnand %p604_p0, %p200_p2 }
   0x6   : > { %p242_p4 = scmp.lt.s32.totalorder (!%p201_p3), %s742_s15, 1 }
   0x7   : > { %204 = sbr.rel (%p201_p3) target bundleno = 258 (0x102), region = 36 }
   0xc   : > { %v718_v0 = vld [vmem:[%s856_s2 + $0x38] sm:$0xff]   ;;  %v719_v1 = vld [vmem:[%s856_s2 + $0x30] sm:$0xff]   ;;  %s864_s15 = smov (!%p242_p4, %s742_s15), 1  ;;  %v720_v2 = vld [vmem:[%s856_s2 + $0x28] sm:$0xff]   ;;  %v295_v12 = vlaneseq  ;;  %vm483_vm8 = vcmask 64512  }
   0xd   : > { %654 = vmatprep.subr.bf16.mxu0 %v718_v0  ;;  %678 = vmatprep.subr.bf16.mxu1 %v718_v0  ;;  %s607_s25 = sshll.u32 %s864_s15, 1  ;;  %v721_v3 = vld [vmem:[%s856_s2 + $0x20] sm:$0xff]   ;;  %v722_v7 = vld [vmem:[%s856_s2 + $0x18] sm:$0xff]   ;;  %v723_v10 = vld [vmem:[%s856_s2 + $0x10] sm:$0xff]   ;;  %s621_s9 = sshll.u32 %s864_s15, 5 }
   0xe   : > { %655 = vmatpush3.bf16.msra.mxu0 %v718_v0  ;;  %686 = vmatpush3.bf16.msra.mxu1 %v718_v0  ;;  %s254_s28 = scalar_lea.vmem %s855_s1, %s607_s25  ;;  %v724_v14 = vld [vmem:[%s856_s2 + $0x8] sm:$0xff]   ;;  %v296_v15 = vshrl.u32 %v295_v12, 7  ;;  %s249_s14 = scalar_lea.vmem %s854_s0, %s621_s9  ;;  %v725_v16 = vld [vmem:[%s856_s2] sm:$0xff]  }
   0xf   : > { %656 = vmatprep.subr.bf16.mxu0 %v719_v1  ;;  %679 = vmatprep.subr.bf16.mxu1 %v719_v1  ;;  %v285_v4 = vld [vmem:[%s254_s28] sm:$0x3]  ;;  %v640_v19 = vld [vmem:[%s249_s14 + $0x10] sm:$0xff]   ;;  %v639_v20 = vld [vmem:[%s249_s14 + $0x8] sm:$0xff]   ;;  %s257_s23 = scalar_lea.vmem %s857_s3, %s864_s15  ;;  %s622_s24 = sshll.u32 %s864_s15, 6 }
  0x10   : > { %v286_v5 = vmul.f32 0.015625, %v285_v4  ;;  %v624_v17 = vld [vmem:[%s249_s14] sm:$0xff]   ;;  %v297_v18 = vsub.s32 0, %v296_v15  ;;  %v641_v21 = vld [vmem:[%s249_s14 + $0x18] sm:$0xff]   ;;  %v633_v25 = vunpack.c.l.bf16 %v640_v19  ;;  %v634_v26 = vunpack.c.h.bf16 %v640_v19  ;;  %s266_s27 = scalar_lea.vmem %s858_s4, %s622_s24 }
  0x11   : > { %v625_v22 = vunpack.c.l.bf16 %v624_v17  ;;  %v626_v23 = vunpack.c.h.bf16 %v624_v17  ;;  %v629_v27 = vunpack.c.l.bf16 %v639_v20  ;;  %v630_v28 = vunpack.c.h.bf16 %v639_v20 }
  0x12   : > { %657 = vmatpush3.bf16.msra.mxu0 %v719_v1  ;;  %687 = vmatpush3.bf16.msra.mxu1 %v719_v1  ;;  %v287_v6 = vmul.f32 %v286_v5, %v286_v5  ;;  %v298_v24 = vrot.slane %v286_v5, %v297_v18  ;;  %v637_v29 = vunpack.c.l.bf16 %v641_v21  ;;  %v638_v30 = vunpack.c.h.bf16 %v641_v21 }
  0x13   : > { %658 = vmatprep.subr.bf16.mxu0 %v720_v2  ;;  %680 = vmatprep.subr.bf16.mxu1 %v720_v2  ;;  %v309_v31 = vsub.s32 1, %v296_v15 }
  0x14   : > { %v289_v8 = vrot.slane %v287_v6, 7  ;;  %v299_v32 = vsub.f32 %v625_v22, %v298_v24  ;;  %v300_v33 = vsub.f32 %v626_v23, %v298_v24  ;;  %v303_v34 = vsub.f32 %v633_v25, %v298_v24  ;;  %v610_v6 = vld [vmem:[%s257_s23] ss:$0 sm:$0xff] }
  0x15   : > { %v304_v35 = vsub.f32 %v634_v26, %v298_v24  ;;  %v301_v37 = vsub.f32 %v629_v27, %v298_v24  ;;  %v302_v38 = vsub.f32 %v630_v28, %v298_v24  ;;  %v305_v39 = vsub.f32 %v637_v29, %v298_v24 }
  0x16   : > { %659 = vmatpush3.bf16.msra.mxu0 %v720_v2  ;;  %688 = vmatpush3.bf16.msra.mxu1 %v720_v2  ;;  %v291_v9 = vsub.f32 %v286_v5, %v289_v8  ;;  %v306_v40 = vsub.f32 %v638_v30, %v298_v24 }
  0x17   : > { %660 = vmatprep.subr.bf16.mxu0 %v721_v3  ;;  %681 = vmatprep.subr.bf16.mxu1 %v721_v3 }
  0x18   : > { %v292_v11 = vmax.f32 %v291_v9, 0.0 }
  0x1a   : > { %661 = vmatpush3.bf16.msra.mxu0 %v721_v3  ;;  %689 = vmatpush3.bf16.msra.mxu1 %v721_v3  ;;  %v293_v13 = vadd.f32 1e-05, %v292_v11 }
  0x1b   : > { %662 = vmatprep.subr.bf16.mxu0 %v722_v7  ;;  %682 = vmatprep.subr.bf16.mxu1 %v722_v7 }
  0x1c   : > { %726 = vrsqrt.f32 %v293_v13 }
  0x1e   : > { %663 = vmatpush3.bf16.msra.mxu0 %v722_v7  ;;  %690 = vmatpush3.bf16.msra.mxu1 %v722_v7 }
  0x1f   : > { %664 = vmatprep.subr.bf16.mxu0 %v723_v10  ;;  %683 = vmatprep.subr.bf16.mxu1 %v723_v10 }
  0x22   : > { %665 = vmatpush3.bf16.msra.mxu0 %v723_v10  ;;  %691 = vmatpush3.bf16.msra.mxu1 %v723_v10 }
  0x23   : > { %666 = vmatprep.subr.bf16.mxu0 %v724_v14  ;;  %684 = vmatprep.subr.bf16.mxu1 %v724_v14 }
  0x26   : > { %667 = vmatpush3.bf16.msra.mxu0 %v724_v14  ;;  %692 = vmatpush3.bf16.msra.mxu1 %v724_v14 }
  0x27   : > { %668 = vmatprep.subr.bf16.mxu0 %v725_v16  ;;  %685 = vmatprep.subr.bf16.mxu1 %v725_v16 }
  0x29   : > { %v727_v36 = vpop.eup %726 }
  0x2a   : > { %669 = vmatpush3.bf16.msra.mxu0 %v725_v16  ;;  %693 = vmatpush3.bf16.msra.mxu1 %v725_v16  ;;  %v310_v41 = vrot.slane %v727_v36, %v309_v31 }
  0x2c   : > { %v311_v42 = vmul.f32 %v310_v41, %v299_v32  ;;  %v312_v43 = vmul.f32 %v310_v41, %v300_v33  ;;  %v315_v44 = vmul.f32 %v310_v41, %v303_v34  ;;  %v316_v45 = vmul.f32 %v310_v41, %v304_v35 }
  0x2d   : > { %v313_v46 = vmul.f32 %v310_v41, %v301_v37  ;;  %v314_v47 = vmul.f32 %v310_v41, %v302_v38  ;;  %v317_v48 = vmul.f32 %v310_v41, %v305_v39  ;;  %v318_v49 = vmul.f32 %v310_v41, %v306_v40 }
  0x2e   : > { %vm319_vm0 = vcmp.gt.f32.partialorder %v311_v42, 0.0  ;;  %vm320_vm1 = vcmp.gt.f32.partialorder %v312_v43, 0.0  ;;  %v327_v50 = vmul.f32 0.2, %v311_v42  ;;  %v328_v51 = vmul.f32 0.2, %v312_v43 }
  0x2f   : > { %vm323_vm2 = vcmp.gt.f32.partialorder %v315_v44, 0.0  ;;  %vm324_vm3 = vcmp.gt.f32.partialorder %v316_v45, 0.0  ;;  %v331_v52 = vmul.f32 0.2, %v315_v44  ;;  %v332_v53 = vmul.f32 0.2, %v316_v45 }
  0x30   : > { %v335_v54 = vsel %vm319_vm0, %v311_v42, %v327_v50  ;;  %v336_v55 = vsel %vm320_vm1, %v312_v43, %v328_v51  ;;  %vm321_vm4 = vcmp.gt.f32.partialorder %v313_v46, 0.0  ;;  %vm322_vm5 = vcmp.gt.f32.partialorder %v314_v47, 0.0 }
  0x31   : > { %v343_v56 = vpack.c.bf16 %v336_v55, %v335_v54  ;;  %v339_v57 = vsel %vm323_vm2, %v315_v44, %v331_v52  ;;  %v340_v58 = vsel %vm324_vm3, %v316_v45, %v332_v53  ;;  %v329_v59 = vmul.f32 0.2, %v313_v46 }
  0x32   : > { %v345_v60 = vpack.c.bf16 %v340_v58, %v339_v57  ;;  %v330_v61 = vmul.f32 0.2, %v314_v47  ;;  %vm325_vm6 = vcmp.gt.f32.partialorder %v317_v48, 0.0  ;;  %vm326_vm7 = vcmp.gt.f32.partialorder %v318_v49, 0.0 }
  0x33   : > { %670 = vmatprep.mubr.bf16.mxu0 %v343_v56  ;;  %v337_v62 = vsel %vm321_vm4, %v313_v46, %v329_v59  ;;  %v333_v63 = vmul.f32 0.2, %v317_v48  ;;  %v334_v0 = vmul.f32 0.2, %v318_v49 }
  0x34   : > { %674 = vmatprep.mubr.bf16.mxu1 %v345_v60  ;;  %v338_v1 = vsel %vm322_vm5, %v314_v47, %v330_v61 }
  0x35   : > { %v344_v2 = vpack.c.bf16 %v338_v1, %v337_v62  ;;  %v341_v3 = vsel %vm325_vm6, %v317_v48, %v333_v63  ;;  %v342_v4 = vsel %vm326_vm7, %v318_v49, %v334_v0 }
  0x36   : > { %v346_v5 = vpack.c.bf16 %v342_v4, %v341_v3 }
  0x37   : > { %671 = vmatmul.mubr.bf16.vlgmr.msra.gmra.mxu0 %v344_v2 }
  0x38   : > { %675 = vmatmul.mubr.bf16.vlgmr.msra.gmra.mxu1 %v346_v5 }
  0xf7   : > { %v672_v7 = vpop.f32.mrf.mxu0 }
  0xf8   : > { %v461_v8 = vadd.f32 %v672_v7, %v610_v6  ;;  %v676_v9 = vpop.f32.mrf.mxu1 }
  0xf9   : > { %v477_v10 = vadd.f32 %v676_v9, %v610_v6  ;;  %v452_v11 = vpop.f32.mrf.mxu0 }
  0xfa   : > { %486 = vst.msk [vmem:[%s266_s27 + $0x10] sm:$0xff] %vm483_vm8, %v461_v8  ;;  %v453_v12 = vadd.f32 %v610_v6, %v452_v11  ;;  %v468_v13 = vpop.f32.mrf.mxu1 }
  0xfb   : > { %490 = vst.msk [vmem:[%s266_s27 + $0x30] sm:$0xff] %vm483_vm8, %v477_v10  ;;  %v469_v14 = vadd.f32 %v610_v6, %v468_v13  ;;  %v673_v15 = vpop.f32.mrf.mxu0 }
  0xfc   : > { %484 = vst.msk [vmem:[%s266_s27] sm:$0xff] %vm483_vm8, %v453_v12  ;;  %v464_v16 = vadd.f32 %v673_v15, %v610_v6  ;;  %v677_v17 = vpop.f32.mrf.mxu1 }
  0xfd   : > { %488 = vst.msk [vmem:[%s266_s27 + $0x20] sm:$0xff] %vm483_vm8, %v469_v14  ;;  %v480_v18 = vadd.f32 %v677_v17, %v610_v6  ;;  %v455_v19 = vpop.f32.mrf.mxu0 }
  0xfe   : > { %487 = vst.msk [vmem:[%s266_s27 + $0x18] sm:$0xff] %vm483_vm8, %v464_v16  ;;  %v456_v20 = vadd.f32 %v610_v6, %v455_v19  ;;  %v471_v21 = vpop.f32.mrf.mxu1 }
  0xff   : > { %491 = vst.msk [vmem:[%s266_s27 + $0x38] sm:$0xff] %vm483_vm8, %v480_v18  ;;  %v472_v22 = vadd.f32 %v610_v6, %v471_v21 }
 0x100   : > { %485 = vst.msk [vmem:[%s266_s27 + $0x8] sm:$0xff] %vm483_vm8, %v456_v20 }
 0x101   : > { %489 = vst.msk [vmem:[%s266_s27 + $0x28] sm:$0xff] %vm483_vm8, %v472_v22 }
 0x102 PF: > { %s14_s17 = sadd.s32 1, %s750_s17   ;;  %s859_s15 = smov %s746_s16 }
 0x103   : > { %p11_p5 = scmp.ge.s32.totalorder %s14_s17, 4   ;;  %s860_s16 = smov %s862_s18 }
 0x105   :  { %13 = sbr.rel (!%p11_p5) target bundleno = 2 (0x2), region = 72 }

// kernel: teethgnn_forward.17
= control target key start
LH: loop header
LB: loop body
LE: loop exit
PB: predicated region body
PF: predicated region fallthrough
CT: control target
= control target key end

     0   :  { %s1412_s21 = smov 0   ;;  %s1414_s22 = smov 0   ;;  %s1746_s0 = inlined_call_operand.vmem [shape: bf16[2,64,256], index: 0, kind: input, shape index: {}]   ;;  %s1747_s1 = inlined_call_operand.vmem [shape: f32[2,2,256], index: 1, kind: input, shape index: {}]   ;;  %s1748_s2 = inlined_call_operand.vmem [shape: f32[2,1,256], index: 2, kind: input, shape index: {}]   ;;  %s1749_s3 = inlined_call_operand.vmem [shape: bf16[256,256], index: 3, kind: input, shape index: {}]   ;;  %s1750_s4 = inlined_call_operand.vmem [shape: f32[2,1,256], index: 4, kind: input, shape index: {}]   ;;  %s1751_s5 = inlined_call_operand.vmem [shape: bf16[2,64,256], index: 5, kind: output, shape index: {0}]   ;;  %s1752_s6 = inlined_call_operand.vmem [shape: f32[2,2,256], index: 6, kind: output, shape index: {1}]  }
   0x1   :  { %s1416_s23 = smov 0  }
   0x2 LB: > { %s29_s24 = sadd.s32 1, %s1369_s22  ;;  %p1178_p0 = scmp.ge.s32.totalorder %s1373_s23, 1  ;;  %s1373_s23 = sphi %s1416_s23, %s17_s23   ;;  %s1369_s22 = sphi %s1414_s22, %s1754_s22   ;;  %s1365_s21 = sphi %s1412_s21, %s1753_s21  }
   0x3   : > { %p31_p1 = scmp.ge.s32.totalorder %s29_s24, 2  ;;  %p265_p2 = scmp.lt.s32.totalorder %s1373_s23, 3 }
   0x5   : > { %s1756_s24 = smov (%p31_p1, %s29_s24), 0  ;;  %p266_p3 = pnand %p1178_p0, %p265_p2 }
   0x6   : > { %p324_p4 = scmp.lt.s32.totalorder (!%p266_p3), %s1365_s21, 1 }
   0x7   : > { %269 = sbr.rel (%p266_p3) target bundleno = 327 (0x147), region = 40 }
   0xc   : > { %v1301_v0 = vld [vmem:[%s1749_s3 + $0x74] ss:$8 sps:$4 sm:$0xff]   ;;  %v1303_v1 = vld [vmem:[%s1749_s3 + $0x70] ss:$8 sps:$4 sm:$0xff]   ;;  %v1304_v2 = vld [vmem:[%s1749_s3 + $0x64] ss:$8 sps:$4 sm:$0xff]   ;;  %v394_v17 = vlaneseq }
   0xd   : > { %760 = vmatprep.subr.bf16.mxu0 %v1301_v0  ;;  %1243 = vmatprep.subr.bf16.mxu1 %v1301_v0  ;;  %v1306_v3 = vld [vmem:[%s1749_s3 + $0x60] ss:$8 sps:$4 sm:$0xff]   ;;  %v1307_v4 = vld [vmem:[%s1749_s3 + $0x54] ss:$8 sps:$4 sm:$0xff]   ;;  %v1309_v5 = vld [vmem:[%s1749_s3 + $0x50] ss:$8 sps:$4 sm:$0xff]  }
   0xe   : > { %761 = vmatpush1.bf16.msra.mxu0 %v1303_v1  ;;  %1259 = vmatpush1.bf16.msra.mxu1 %v1303_v1  ;;  %v1310_v6 = vld [vmem:[%s1749_s3 + $0x44] ss:$8 sps:$4 sm:$0xff]   ;;  %v1312_v7 = vld [vmem:[%s1749_s3 + $0x40] ss:$8 sps:$4 sm:$0xff]   ;;  %v1313_v8 = vld [vmem:[%s1749_s3 + $0x34] ss:$8 sps:$4 sm:$0xff]  }
   0xf   : > { %762 = vmatprep.subr.bf16.mxu0 %v1304_v2  ;;  %1244 = vmatprep.subr.bf16.mxu1 %v1304_v2  ;;  %s1758_s21 = smov (!%p324_p4, %s1365_s21), 1  ;;  %v1315_v9 = vld [vmem:[%s1749_s3 + $0x30] ss:$8 sps:$4 sm:$0xff]   ;;  %v1316_v10 = vld [vmem:[%s1749_s3 + $0x24] ss:$8 sps:$4 sm:$0xff]   ;;  %v1500_v22 = vshrl.u32 %v394_v17, 7 }
  0x10   : > { %s1232_s27 = sshll.u32 %s1758_s21, 2  ;;  %v1318_v11 = vld [vmem:[%s1749_s3 + $0x20] ss:$8 sps:$4 sm:$0xff]   ;;  %v1319_v12 = vld [vmem:[%s1749_s3 + $0x14] ss:$8 sps:$4 sm:$0xff]   ;;  %s1231_s17 = sshll.u32 %s1758_s21, 6 }
  0x11   : > { %s338_s8 = scalar_lea.vmem %s1747_s1, %s1232_s27  ;;  %v1321_v14 = vld [vmem:[%s1749_s3 + $0x10] ss:$8 sps:$4 sm:$0xff]   ;;  %v1322_v16 = vld [vmem:[%s1749_s3 + $0x4] ss:$8 sps:$4 sm:$0xff]   ;;  %v1324_v19 = vld [vmem:[%s1749_s3] ss:$8 sps:$4 sm:$0xff]   ;;  %s1511_s7 = scalar_lea.vmem %s1746_s0, %s1231_s17 }
  0x12   : > { %763 = vmatpush1.bf16.msra.mxu0 %v1306_v3  ;;  %1260 = vmatpush1.bf16.msra.mxu1 %v1306_v3  ;;  %v420_v13 = vld [vmem:[%s338_s8] sm:$0xf]  ;;  %s1183_s18 = sshll.u32 %s1758_s21, 1  ;;  %v1325_v21 = vld [vmem:[%s1749_s3 + $0xf4] ss:$8 sps:$4 sm:$0xff]   ;;  %v396_v27 = vsub.s32 0, %v1500_v22  ;;  %s362_s9 = scalar_lea.vmem %s1752_s6, %s1232_s27 }
  0x13   : > { %764 = vmatprep.subr.bf16.mxu0 %v1307_v4  ;;  %1245 = vmatprep.subr.bf16.mxu1 %v1307_v4  ;;  %v1484_v15 = vmul.f32 0.001953125, %v420_v13  ;;  %s346_s28 = scalar_lea.vmem %s1750_s4, %s1183_s18  ;;  %s342_s10 = scalar_lea.vmem %s1748_s2, %s1183_s18  ;;  %v1327_v24 = vld [vmem:[%s1749_s3 + $0xf0] ss:$8 sps:$4 sm:$0xff]   ;;  %v1328_v26 = vld [vmem:[%s1749_s3 + $0xe4] ss:$8 sps:$4 sm:$0xff]   ;;  %v1524_v28 = vsub.s32 1, %v1500_v22 }
  0x14   : > { %v1526_v29 = vld [vmem:[%s346_s28] sm:$0x3]  ;;  %v437_v33 = vsub.s32 2, %v1500_v22  ;;  %v369_v34 = vld [vmem:[%s1511_s7 + $0x8] sm:$0xff]  ;;  %v1331_v38 = vld [vmem:[%s1749_s3 + $0xd4] ss:$8 sps:$4 sm:$0xff]  }
  0x15   : > { %v422_v18 = vmul.f32 %v1484_v15, %v1484_v15  ;;  %v368_v30 = vld [vmem:[%s1511_s7] sm:$0xff]  ;;  %v1536_v37 = vrot.slane %v1526_v29, %v396_v27  ;;  %v373_v42 = vld [vmem:[%s1511_s7 + $0x28] sm:$0xff]  ;;  %v379_v43 = vunpack.c.h.bf16 %v369_v34  ;;  %v370_v47 = vld [vmem:[%s1511_s7 + $0x10] sm:$0xff]  ;;  %v434_v48 = vrot.slane %v1484_v15, %v396_v27 }
  0x16   : > { %765 = vmatpush1.bf16.msra.mxu0 %v1309_v5  ;;  %1261 = vmatpush1.bf16.msra.mxu1 %v1309_v5  ;;  %v392_v31 = vld [vmem:[%s342_s10] sm:$0x3]  ;;  %v376_v39 = vunpack.c.l.bf16 %v368_v30  ;;  %v377_v40 = vunpack.c.h.bf16 %v368_v30  ;;  %v438_v45 = vrot.slane %v1484_v15, %v437_v33  ;;  %v1333_v49 = vld [vmem:[%s1749_s3 + $0xd0] ss:$8 sps:$4 sm:$0xff]   ;;  %v378_v50 = vunpack.c.l.bf16 %v369_v34  ;;  %v1334_v54 = vld [vmem:[%s1749_s3 + $0xc4] ss:$8 sps:$4 sm:$0xff]  }
  0x17   : > { %766 = vmatprep.subr.bf16.mxu0 %v1310_v6  ;;  %1246 = vmatprep.subr.bf16.mxu1 %v1310_v6  ;;  %v424_v20 = vrot.slane %v422_v18, 7  ;;  %v372_v35 = vld [vmem:[%s1511_s7 + $0x20] sm:$0xff]  ;;  %v1542_v41 = vrot.slane %v392_v31, %v1524_v28  ;;  %v1545_v44 = vrot.slane %v392_v31, %v396_v27  ;;  %v387_v52 = vunpack.c.h.bf16 %v373_v42  ;;  %v371_v53 = vld [vmem:[%s1511_s7 + $0x18] sm:$0xff]  ;;  %v374_v59 = vld [vmem:[%s1511_s7 + $0x30] sm:$0xff] }
  0x18   : > { %v1330_v36 = vld [vmem:[%s1749_s3 + $0xe0] ss:$8 sps:$4 sm:$0xff]   ;;  %v385_v46 = vunpack.c.h.bf16 %v372_v35  ;;  %v384_v51 = vunpack.c.l.bf16 %v372_v35  ;;  %v472_v56 = vsub.s32 3, %v1500_v22  ;;  %v386_v57 = vunpack.c.l.bf16 %v373_v42  ;;  %v375_v0 = vld [vmem:[%s1511_s7 + $0x38] sm:$0xff]  ;;  %s1708_s7 = scalar_lea.vmem %s1751_s5, %s1231_s17 }
  0x19   : > { %v426_v23 = vsub.f32 %v1484_v15, %v424_v20  ;;  %v1558_v55 = vadd.f32 %v1542_v41, %v377_v40  ;;  %v381_v58 = vunpack.c.h.bf16 %v370_v47  ;;  %v1563_v60 = vadd.f32 %v1542_v41, %v379_v43  ;;  %v1336_v5 = vld [vmem:[%s1749_s3 + $0xc0] ss:$8 sps:$4 sm:$0xff]  }
  0x1a   : > { %767 = vmatpush1.bf16.msra.mxu0 %v1312_v7  ;;  %1262 = vmatpush1.bf16.msra.mxu1 %v1312_v7  ;;  %v1565_v61 = vrot.slane %v438_v45, %v396_v27  ;;  %v1568_v62 = vadd.f32 %v1545_v44, %v376_v39  ;;  %v1571_v63 = vadd.f32 %v1542_v41, %v385_v46  ;;  %v383_v2 = vunpack.c.h.bf16 %v371_v53  ;;  %v1342_v45 = vld [vmem:[%s1749_s3 + $0xa0] ss:$8 sps:$4 sm:$0xff]  }
  0x1b   : > { %768 = vmatprep.subr.bf16.mxu0 %v1313_v8  ;;  %1247 = vmatprep.subr.bf16.mxu1 %v1313_v8  ;;  %v427_v25 = vmax.f32 %v426_v23, 0.0  ;;  %v1574_v1 = vrot.slane %v434_v48, %v396_v27  ;;  %v380_v3 = vunpack.c.l.bf16 %v370_v47  ;;  %v382_v4 = vunpack.c.l.bf16 %v371_v53 }
  0x1c   : > { %v406_v6 = vadd.f32 %v1545_v44, %v378_v50  ;;  %v415_v7 = vadd.f32 %v1542_v41, %v387_v52  ;;  %v412_v8 = vadd.f32 %v1545_v44, %v384_v51  ;;  %v388_v13 = vunpack.c.l.bf16 %v374_v59 }
  0x1d   : > { %v428_v32 = vadd.f32 1e-05, %v427_v25  ;;  %v450_v15 = vsub.f32 %v1558_v55, %v1565_v61  ;;  %v458_v18 = vsub.f32 %v1571_v63, %v1565_v61  ;;  %v449_v20 = vsub.f32 %v1568_v62, %v1574_v1  ;;  %v1339_v25 = vld [vmem:[%s1749_s3 + $0xb0] ss:$8 sps:$4 sm:$0xff]  }
  0x1e   : > { %769 = vmatpush1.bf16.msra.mxu0 %v1315_v9  ;;  %1263 = vmatpush1.bf16.msra.mxu1 %v1315_v9  ;;  %v389_v9 = vunpack.c.h.bf16 %v374_v59  ;;  %v1601_v23 = vadd.f32 %v1545_v44, %v380_v3  ;;  %v460_v27 = vsub.f32 %v415_v7, %v1565_v61  ;;  %v1621_v34 = vadd.f32 %v1545_v44, %v388_v13 }
  0x1f   : > { %770 = vmatprep.subr.bf16.mxu0 %v1316_v10  ;;  %1248 = vmatprep.subr.bf16.mxu1 %v1316_v10  ;;  %1349 = vrsqrt.f32 %v428_v32  ;;  %v1337_v10 = vld [vmem:[%s1749_s3 + $0xb4] ss:$8 sps:$4 sm:$0xff]   ;;  %v1340_v32 = vld [vmem:[%s1749_s3 + $0xa4] ss:$8 sps:$4 sm:$0xff]   ;;  %v457_v39 = vsub.f32 %v412_v8, %v1574_v1 }
  0x20   : > { %v1612_v30 = vadd.f32 %v1542_v41, %v389_v9  ;;  %v453_v43 = vsub.f32 %v1601_v23, %v1574_v1  ;;  %v461_v51 = vsub.f32 %v1621_v34, %v1574_v1 }
  0x22   : > { %771 = vmatpush1.bf16.msra.mxu0 %v1318_v11  ;;  %1264 = vmatpush1.bf16.msra.mxu1 %v1318_v11  ;;  %v414_v11 = vadd.f32 %v1545_v44, %v386_v57  ;;  %v462_v48 = vsub.f32 %v1612_v30, %v1565_v61  ;;  %v1345_v57 = vld [vmem:[%s1749_s3 + $0x90] ss:$8 sps:$4 sm:$0xff]  }
  0x23   : > { %772 = vmatprep.subr.bf16.mxu0 %v1319_v12  ;;  %1249 = vmatprep.subr.bf16.mxu1 %v1319_v12  ;;  %v391_v12 = vunpack.c.h.bf16 %v375_v0 }
  0x24   : > { %v459_v40 = vsub.f32 %v414_v11, %v1574_v1  ;;  %v1348_v11 = vld [vmem:[%s1749_s3 + $0x80] ss:$8 sps:$4 sm:$0xff]  }
  0x25   : > { %v1618_v33 = vadd.f32 %v1542_v41, %v391_v12 }
  0x26   : > { %773 = vmatpush1.bf16.msra.mxu0 %v1321_v14  ;;  %1265 = vmatpush1.bf16.msra.mxu1 %v1321_v14  ;;  %v390_v14 = vunpack.c.l.bf16 %v375_v0 }
  0x27   : > { %774 = vmatprep.subr.bf16.mxu0 %v1322_v16  ;;  %1250 = vmatprep.subr.bf16.mxu1 %v1322_v16  ;;  %v452_v16 = vsub.f32 %v1563_v60, %v1565_v61  ;;  %v464_v50 = vsub.f32 %v1618_v33, %v1565_v61 }
  0x28   : > { %v1624_v35 = vadd.f32 %v1545_v44, %v390_v14 }
  0x2a   : > { %775 = vmatpush1.bf16.msra.mxu0 %v1324_v19  ;;  %1266 = vmatpush1.bf16.msra.mxu1 %v1324_v19  ;;  %v1593_v19 = vadd.f32 %v1542_v41, %v381_v58  ;;  %v463_v52 = vsub.f32 %v1624_v35, %v1574_v1  ;;  %v1346_v58 = vld [vmem:[%s1749_s3 + $0x84] ss:$8 sps:$4 sm:$0xff]  }
  0x2b   : > { %776 = vmatprep.subr.bf16.mxu0 %v1325_v21  ;;  %1251 = vmatprep.subr.bf16.mxu1 %v1325_v21  ;;  %v1598_v21 = vadd.f32 %v1542_v41, %v383_v2 }
  0x2c   : > { %v1350_v31 = vpop.eup %1349  ;;  %v454_v42 = vsub.f32 %v1593_v19, %v1565_v61 }
  0x2d   : > { %v456_v41 = vsub.f32 %v1598_v21, %v1565_v61 }
  0x2e   : > { %777 = vmatpush2.bf16.msra.mxu0 %v1327_v24  ;;  %1267 = vmatpush2.bf16.msra.mxu1 %v1327_v24  ;;  %v1604_v24 = vadd.f32 %v1545_v44, %v382_v4 }
  0x2f   : > { %778 = vmatprep.subr.bf16.mxu0 %v1328_v26  ;;  %1252 = vmatprep.subr.bf16.mxu1 %v1328_v26  ;;  %v451_v26 = vsub.f32 %v406_v6, %v1574_v1 }
  0x30   : > { %v455_v44 = vsub.f32 %v1604_v24, %v1574_v1  ;;  %v1697_v1 = vrot.slane %v1526_v29, %v1524_v28 }
  0x32   : > { %779 = vmatpush2.bf16.msra.mxu0 %v1330_v36  ;;  %1268 = vmatpush2.bf16.msra.mxu1 %v1330_v36  ;;  %v473_v36 = vrot.slane %v1350_v31, %v472_v56 }
  0x33   : > { %780 = vmatprep.subr.bf16.mxu0 %v1331_v38  ;;  %1253 = vmatprep.subr.bf16.mxu1 %v1331_v38  ;;  %v469_v38 = vrot.slane %v1350_v31, %v1524_v28 }
  0x34   : > { %v1641_v46 = vrot.slane %v473_v36, %v1524_v28 }
  0x35   : > { %v1644_v47 = vrot.slane %v469_v38, %v1524_v28 }
  0x36   : > { %781 = vmatpush2.bf16.msra.mxu0 %v1333_v49  ;;  %1269 = vmatpush2.bf16.msra.mxu1 %v1333_v49  ;;  %v1343_v49 = vld [vmem:[%s1749_s3 + $0x94] ss:$8 sps:$4 sm:$0xff]   ;;  %v485_v53 = vmul.f32 %v1641_v46, %v450_v15  ;;  %v493_v59 = vmul.f32 %v1641_v46, %v458_v18  ;;  %v495_v60 = vmul.f32 %v1641_v46, %v460_v27 }
  0x37   : > { %782 = vmatprep.subr.bf16.mxu0 %v1334_v54  ;;  %1254 = vmatprep.subr.bf16.mxu1 %v1334_v54  ;;  %v487_v54 = vmul.f32 %v1641_v46, %v452_v16  ;;  %v484_v55 = vmul.f32 %v1644_v47, %v449_v20  ;;  %v486_v56 = vmul.f32 %v1644_v47, %v451_v26 }
  0x38   : > { %v492_v62 = vmul.f32 %v1644_v47, %v457_v39  ;;  %v494_v63 = vmul.f32 %v1644_v47, %v459_v40  ;;  %vm501_vm0 = vcmp.gt.f32.partialorder %v485_v53, 0.0  ;;  %v517_v0 = vmul.f32 0.2, %v485_v53 }
  0x39   : > { %vm503_vm1 = vcmp.gt.f32.partialorder %v487_v54, 0.0  ;;  %v519_v2 = vmul.f32 0.2, %v487_v54  ;;  %vm500_vm2 = vcmp.gt.f32.partialorder %v484_v55, 0.0  ;;  %vm502_vm3 = vcmp.gt.f32.partialorder %v486_v56, 0.0 }
  0x3a   : > { %783 = vmatpush2.bf16.msra.mxu0 %v1336_v5  ;;  %1270 = vmatpush2.bf16.msra.mxu1 %v1336_v5  ;;  %v516_v3 = vmul.f32 0.2, %v484_v55  ;;  %v518_v4 = vmul.f32 0.2, %v486_v56  ;;  %v533_v5 = vsel %vm501_vm0, %v485_v53, %v517_v0  ;;  %vm509_vm4 = vcmp.gt.f32.partialorder %v493_v59, 0.0 }
  0x3b   : > { %784 = vmatprep.subr.bf16.mxu0 %v1337_v10  ;;  %1255 = vmatprep.subr.bf16.mxu1 %v1337_v10  ;;  %v535_v6 = vsel %vm503_vm1, %v487_v54, %v519_v2  ;;  %vm511_vm5 = vcmp.gt.f32.partialorder %v495_v60, 0.0  ;;  %v525_v10 = vmul.f32 0.2, %v493_v59  ;;  %v527_v13 = vmul.f32 0.2, %v495_v60 }
  0x3c   : > { %v549_v7 = vpack.c.bf16 %v535_v6, %v533_v5  ;;  %v532_v8 = vsel %vm500_vm2, %v484_v55, %v516_v3  ;;  %v534_v9 = vsel %vm502_vm3, %v486_v56, %v518_v4  ;;  %vm508_vm6 = vcmp.gt.f32.partialorder %v492_v62, 0.0 }
  0x3d   : > { %v548_v12 = vpack.c.bf16 %v534_v9, %v532_v8  ;;  %vm510_vm7 = vcmp.gt.f32.partialorder %v494_v63, 0.0  ;;  %v541_v14 = vsel %vm509_vm4, %v493_v59, %v525_v10  ;;  %v524_v15 = vmul.f32 0.2, %v492_v62 }
  0x3e   : > { %785 = vmatpush2.bf16.msra.mxu0 %v1339_v25  ;;  %1271 = vmatpush2.bf16.msra.mxu1 %v1339_v25  ;;  %v526_v16 = vmul.f32 0.2, %v494_v63  ;;  %v489_v18 = vmul.f32 %v1641_v46, %v454_v42  ;;  %v543_v19 = vsel %vm511_vm5, %v495_v60, %v527_v13  ;;  %v491_v20 = vmul.f32 %v1641_v46, %v456_v41 }
  0x3f   : > { %786 = vmatprep.subr.bf16.mxu0 %v1340_v32  ;;  %1256 = vmatprep.subr.bf16.mxu1 %v1340_v32  ;;  %v488_v21 = vmul.f32 %v1644_v47, %v453_v43  ;;  %v490_v23 = vmul.f32 %v1644_v47, %v455_v44  ;;  %v553_v24 = vpack.c.bf16 %v543_v19, %v541_v14  ;;  %vm937_vm0 = vcmp.lt.s32.totalorder %v394_v17, 256 }
  0x40   : > { %792 = vmatprep.mubr.bf16.mxu0 %v549_v7  ;;  %v540_v25 = vsel %vm508_vm6, %v492_v62, %v524_v15  ;;  %v542_v26 = vsel %vm510_vm7, %v494_v63, %v526_v16  ;;  %vm505_vm8 = vcmp.gt.f32.partialorder %v489_v18, 0.0  ;;  %vm507_vm9 = vcmp.gt.f32.partialorder %v491_v20, 0.0 }
  0x41   : > { %v552_v27 = vpack.c.bf16 %v542_v26, %v540_v25  ;;  %v521_v31 = vmul.f32 0.2, %v489_v18  ;;  %v523_v32 = vmul.f32 0.2, %v491_v20  ;;  %812 = vmatprep.mubr.bf16.mxu1 %v553_v24  ;;  %vm504_vm10 = vcmp.gt.f32.partialorder %v488_v21, 0.0 }
  0x42   : > { %787 = vmatpush2.bf16.msra.mxu0 %v1342_v45  ;;  %1272 = vmatpush2.bf16.msra.mxu1 %v1342_v45  ;;  %vm506_vm11 = vcmp.gt.f32.partialorder %v490_v23, 0.0  ;;  %v520_v36 = vmul.f32 0.2, %v488_v21  ;;  %v522_v38 = vmul.f32 0.2, %v490_v23  ;;  %v497_v42 = vmul.f32 %v1641_v46, %v462_v48 }
  0x43   : > { %788 = vmatprep.subr.bf16.mxu0 %v1343_v49  ;;  %1257 = vmatprep.subr.bf16.mxu1 %v1343_v49  ;;  %v537_v39 = vsel %vm505_vm8, %v489_v18, %v521_v31  ;;  %v539_v40 = vsel %vm507_vm9, %v491_v20, %v523_v32  ;;  %v499_v41 = vmul.f32 %v1641_v46, %v464_v50 }
  0x44   : > { %v551_v43 = vpack.c.bf16 %v539_v40, %v537_v39  ;;  %v536_v44 = vsel %vm504_vm10, %v488_v21, %v520_v36  ;;  %v538_v45 = vsel %vm506_vm11, %v490_v23, %v522_v38  ;;  %vm513_vm12 = vcmp.gt.f32.partialorder %v497_v42, 0.0 }
  0x45   : > { %vm515_vm13 = vcmp.gt.f32.partialorder %v499_v41, 0.0  ;;  %v529_v49 = vmul.f32 0.2, %v497_v42  ;;  %v531_v53 = vmul.f32 0.2, %v499_v41  ;;  %v496_v30 = vmul.f32 %v1644_v47, %v461_v51 }
  0x46   : > { %789 = vmatpush2.bf16.msra.mxu0 %v1345_v57  ;;  %1273 = vmatpush2.bf16.msra.mxu1 %v1345_v57  ;;  %v498_v61 = vmul.f32 %v1644_v47, %v463_v52  ;;  %v550_v33 = vpack.c.bf16 %v538_v45, %v536_v44  ;;  %v1375_v51 = vmov 0.0  }
  0x47   : > { %790 = vmatprep.subr.bf16.mxu0 %v1346_v58  ;;  %1258 = vmatprep.subr.bf16.mxu1 %v1346_v58  ;;  %v545_v46 = vsel %vm513_vm12, %v497_v42, %v529_v49  ;;  %v547_v48 = vsel %vm515_vm13, %v499_v41, %v531_v53  ;;  %vm512_vm14 = vcmp.gt.f32.partialorder %v496_v30, 0.0  ;;  %v528_v50 = vmul.f32 0.2, %v496_v30  ;;  %367 = vst [vmem:[#allocation2] sm:$0xf] %v1375_v51 }
  0x48   : > { %vm514_vm15 = vcmp.gt.f32.partialorder %v498_v61, 0.0  ;;  %v555_v54 = vpack.c.bf16 %v547_v48, %v545_v46  ;;  %v530_v55 = vmul.f32 0.2, %v498_v61 }
  0x49   : > { %v544_v56 = vsel %vm512_vm14, %v496_v30, %v528_v50 }
  0x4a   : > { %791 = vmatpush2.bf16.msra.mxu0 %v1348_v11  ;;  %1274 = vmatpush2.bf16.msra.mxu1 %v1348_v11  ;;  %v546_v57 = vsel %vm514_vm15, %v498_v61, %v530_v55 }
  0x4b   : > { %v554_v34 = vpack.c.bf16 %v546_v57, %v544_v56 }
  0x4d   : > { %793 = vmatmul.mubr.bf16.vlgmr.msra.gmra.mxu0 %v548_v12  ;;  %813 = vmatmul.mubr.bf16.vlgmr.msra.gmra.mxu1 %v552_v27 }
  0x4e   : > { %802 = vmatprep.mubr.bf16.mxu0 %v551_v43  ;;  %822 = vmatprep.mubr.bf16.mxu1 %v555_v54 }
  0x55   : > { %803 = vmatmul.mubr.bf16.gmra.mxu0 %v550_v33  ;;  %823 = vmatmul.mubr.bf16.gmra.mxu1 %v554_v34 }
 0x10d   : > { %v794_v35 = vpop.f32.mrf.mxu0  ;;  %v814_v47 = vpop.f32.mrf.mxu1 }
 0x10e   : > { %v815_v52 = vadd.f32 %v814_v47, %v1536_v37  ;;  %v795_v60 = vadd.f32 %v794_v35, %v1536_v37 }
 0x10f   : > { %v796_v58 = vpop.f32.mrf.mxu0  ;;  %v816_v59 = vpop.f32.mrf.mxu1 }
 0x110   : > { %v797_v62 = vadd.f32 %v796_v58, %v1697_v1  ;;  %v817_v63 = vadd.f32 %v816_v59, %v1697_v1  ;;  %v942_v16 = vmul.f32 %v795_v60, %v795_v60  ;;  %v950_v56 = vmul.f32 %v815_v52, %v815_v52 }
 0x111   : > { %v798_v28 = vpop.f32.mrf.mxu0  ;;  %v818_v29 = vpop.f32.mrf.mxu1 }
 0x112   : > { %v1235_v0 = vpack.c.bf16 %v797_v62, %v795_v60  ;;  %v799_v2 = vadd.f32 %v798_v28, %v1536_v37  ;;  %v1239_v3 = vpack.c.bf16 %v817_v63, %v815_v52  ;;  %v819_v5 = vadd.f32 %v818_v29, %v1536_v37 }
 0x113   : > { %v800_v4 = vpop.f32.mrf.mxu0  ;;  %v820_v6 = vpop.f32.mrf.mxu1  ;;  %v943_v20 = vmul.f32 %v797_v62, %v797_v62  ;;  %v951_v35 = vmul.f32 %v817_v63, %v817_v63 }
 0x114   : > { %881 = vst [vmem:[%s1708_s7] sm:$0xff] %v1235_v0  ;;  %885 = vst [vmem:[%s1708_s7 + $0x20] sm:$0xff] %v1239_v3  ;;  %v801_v7 = vadd.f32 %v800_v4, %v1697_v1  ;;  %v821_v8 = vadd.f32 %v820_v6, %v1697_v1  ;;  %v944_v10 = vmul.f32 %v799_v2, %v799_v2 }
 0x115   : > { %v804_v9 = vpop.f32.mrf.mxu0  ;;  %v824_v15 = vpop.f32.mrf.mxu1  ;;  %v890_v21 = vadd.f32 %v799_v2, %v795_v60  ;;  %v952_v59 = vmul.f32 %v819_v5, %v819_v5 }
 0x116   : > { %v1236_v11 = vpack.c.bf16 %v801_v7, %v799_v2  ;;  %v805_v12 = vadd.f32 %v804_v9, %v1536_v37  ;;  %v1240_v13 = vpack.c.bf16 %v821_v8, %v819_v5  ;;  %v945_v18 = vmul.f32 %v801_v7, %v801_v7 }
 0x117   : > { %v806_v14 = vpop.f32.mrf.mxu0  ;;  %v825_v24 = vadd.f32 %v824_v15, %v1536_v37  ;;  %v826_v26 = vpop.f32.mrf.mxu1  ;;  %v958_v27 = vadd.f32 %v944_v10, %v942_v16  ;;  %v903_v31 = vadd.f32 %v801_v7, %v797_v62  ;;  %v953_v28 = vmul.f32 %v821_v8, %v821_v8 }
 0x118   : > { %882 = vst [vmem:[%s1708_s7 + $0x8] sm:$0xff] %v1236_v11  ;;  %v807_v19 = vadd.f32 %v806_v14, %v1697_v1  ;;  %v946_v23 = vmul.f32 %v805_v12, %v805_v12  ;;  %886 = vst [vmem:[%s1708_s7 + $0x28] sm:$0xff] %v1240_v13  ;;  %v891_v38 = vadd.f32 %v890_v21, %v805_v12 }
 0x119   : > { %v808_v25 = vpop.f32.mrf.mxu0  ;;  %v827_v40 = vadd.f32 %v826_v26, %v1697_v1  ;;  %v828_v41 = vpop.f32.mrf.mxu1  ;;  %v971_v43 = vadd.f32 %v945_v18, %v943_v20  ;;  %v954_v2 = vmul.f32 %v825_v24, %v825_v24 }
 0x11a   : > { %v1237_v32 = vpack.c.bf16 %v807_v19, %v805_v12  ;;  %v947_v36 = vmul.f32 %v807_v19, %v807_v19  ;;  %v809_v39 = vadd.f32 %v808_v25, %v1536_v37  ;;  %v959_v44 = vadd.f32 %v958_v27, %v946_v23 }
 0x11b   : > { %v810_v42 = vpop.f32.mrf.mxu0  ;;  %v904_v45 = vadd.f32 %v903_v31, %v807_v19  ;;  %v1241_v61 = vpack.c.bf16 %v827_v40, %v825_v24  ;;  %v829_v33 = vadd.f32 %v828_v41, %v1536_v37  ;;  %v830_v46 = vpop.f32.mrf.mxu1  ;;  %v1376_v19 = vmov 1966171168  }
 0x11c   : > { %883 = vst [vmem:[%s1708_s7 + $0x10] sm:$0xff] %v1237_v32  ;;  %v811_v49 = vadd.f32 %v810_v42, %v1697_v1  ;;  %v892_v53 = vadd.f32 %v891_v38, %v809_v39  ;;  %v948_v30 = vmul.f32 %v809_v39, %v809_v39  ;;  %v972_v48 = vadd.f32 %v971_v43, %v947_v36 }
 0x11d   : > { %887 = vst [vmem:[%s1708_s7 + $0x30] sm:$0xff] %v1241_v61  ;;  %v831_v51 = vadd.f32 %v830_v46, %v1697_v1  ;;  %v956_v1 = vmul.f32 %v829_v33, %v829_v33  ;;  %v920_v20 = vunpack.c.l.s4 %v1376_v19 }
 0x11e   : > { %v1238_v50 = vpack.c.bf16 %v811_v49, %v809_v39  ;;  %v905_v54 = vadd.f32 %v904_v45, %v811_v49  ;;  %v949_v55 = vmul.f32 %v811_v49, %v811_v49  ;;  %v893_v57 = vadd.f32 %v892_v53, %v815_v52 }
 0x11f   : > { %v960_v34 = vadd.f32 %v959_v44, %v948_v30  ;;  %v1242_v37 = vpack.c.bf16 %v831_v51, %v829_v33  ;;  %v955_v52 = vmul.f32 %v827_v40, %v827_v40  ;;  %v921_v36 = vunpack.c.0.s8 %v920_v20 }
 0x120   : > { %884 = vst [vmem:[%s1708_s7 + $0x18] sm:$0xff] %v1238_v50  ;;  %v906_v47 = vadd.f32 %v905_v54, %v817_v63  ;;  %v973_v58 = vadd.f32 %v972_v48, %v949_v55  ;;  %v894_v62 = vadd.f32 %v893_v57, %v819_v5  ;;  %v957_v63 = vmul.f32 %v831_v51, %v831_v51  ;;  %v889_v50 = vld [vmem:[#allocation2] ss:$2 sm:$0x3] }
 0x121   : > { %v961_v60 = vadd.f32 %v960_v34, %v950_v56  ;;  %888 = vst [vmem:[%s1708_s7 + $0x38] sm:$0xff] %v1242_v37  ;;  %v924_v49 = vsub.s32 %v921_v36, %v1500_v22  ;;  %v941_v56 = vld [vmem:[#allocation2 + $0x1] ss:$2 sm:$0x3] }
 0x122   : > { %v974_v29 = vadd.f32 %v973_v58, %v951_v35  ;;  %v907_v0 = vadd.f32 %v906_v47, %v821_v8  ;;  %v895_v3 = vadd.f32 %v894_v62, %v825_v24 }
 0x123   : > { %v962_v4 = vadd.f32 %v961_v60, %v952_v59 }
 0x124   : > { %v908_v6 = vadd.f32 %v907_v0, %v827_v40  ;;  %v975_v7 = vadd.f32 %v974_v29, %v953_v28  ;;  %v896_v9 = vadd.f32 %v895_v3, %v829_v33 }
 0x125   : > { %v963_v10 = vadd.f32 %v962_v4, %v954_v2 }
 0x126   : > { %v909_v11 = vadd.f32 %v908_v6, %v831_v51  ;;  %v976_v12 = vadd.f32 %v975_v7, %v955_v52  ;;  %v897_v13 = vrot.slane %v896_v9, 4 }
 0x127   : > { %v964_v14 = vadd.f32 %v963_v10, %v956_v1 }
 0x128   : > { %v910_v5 = vrot.slane %v909_v11, 4  ;;  %v977_v15 = vadd.f32 %v976_v12, %v957_v63  ;;  %v898_v16 = vadd.f32 %v897_v13, %v896_v9 }
 0x129   : > { %v965_v18 = vrot.slane %v964_v14, 4 }
 0x12a   : > { %v911_v8 = vadd.f32 %v910_v5, %v909_v11  ;;  %v978_v21 = vrot.slane %v977_v15, 4  ;;  %v899_v23 = vrot.slane %v898_v16, 2 }
 0x12b   : > { %v966_v24 = vadd.f32 %v965_v18, %v964_v14 }
 0x12c   : > { %v912_v25 = vrot.slane %v911_v8, 2  ;;  %v979_v26 = vadd.f32 %v978_v21, %v977_v15  ;;  %v900_v27 = vadd.f32 %v899_v23, %v898_v16 }
 0x12d   : > { %v967_v31 = vrot.slane %v966_v24, 2 }
 0x12e   : > { %v913_v32 = vadd.f32 %v912_v25, %v911_v8  ;;  %v980_v38 = vrot.slane %v979_v26, 2  ;;  %v901_v39 = vrot.slane %v900_v27, 1 }
 0x12f   : > { %v968_v40 = vadd.f32 %v967_v31, %v966_v24 }
 0x130   : > { %v914_v42 = vrot.slane %v913_v32, 1  ;;  %v981_v41 = vadd.f32 %v980_v38, %v979_v26  ;;  %v902_v44 = vadd.f32 %v901_v39, %v900_v27 }
 0x131   : > { %v969_v43 = vrot.slane %v968_v40, 1 }
 0x132   : > { %v915_v45 = vadd.f32 %v914_v42, %v913_v32  ;;  %v982_v53 = vrot.slane %v981_v41, 1 }
 0x133   : > { %v970_v30 = vadd.f32 %v969_v43, %v968_v40 }
 0x134   : > { %v918_v61 = vcombine.low %v902_v44, %v915_v45  ;;  %v983_v33 = vadd.f32 %v982_v53, %v981_v41 }
 0x136   : > { %v925_v46 = vrot.slane %v918_v61, %v924_v49  ;;  %v986_v48 = vcombine.low %v970_v30, %v983_v33 }
 0x138   : > { %v932_v54 = vrot.slane %v925_v46, %v924_v49  ;;  %v993_v55 = vrot.slane %v986_v48, %v924_v49 }
 0x13a   : > { %v934_v57 = vadd.f32 %v932_v54, %v889_v50  ;;  %v1000_v34 = vrot.slane %v993_v55, %v924_v49 }
 0x13c   : > { %939 = vst.msk [vmem:[#allocation2] ss:$2 sm:$0x3] %vm937_vm0, %v934_v57  ;;  %v1002_v51 = vadd.f32 %v1000_v34, %v941_v56 }
 0x13e   : > { %1003 = vst.msk [vmem:[#allocation2 + $0x1] ss:$2 sm:$0x3] %vm937_vm0, %v1002_v51 }
 0x145   : > { %v1007_v22 = vld [vmem:[#allocation2] sm:$0xf] }
 0x146   : > { %1008 = vst [vmem:[%s362_s9] sm:$0xf] %v1007_v22 }
 0x147 PF: > { %s17_s23 = sadd.s32 1, %s1373_s23   ;;  %s1753_s21 = smov %s1369_s22 }
 0x148   : > { %p14_p5 = scmp.ge.s32.totalorder %s17_s23, 4   ;;  %s1754_s22 = smov %s1756_s24 }
 0x14a   :  { %16 = sbr.rel (!%p14_p5) target bundleno = 2 (0x2), region = 100 }

</bundles_post_ra>
